<compile_context>
chip_gen: v5e
topology: v5e:2x2
jax: 0.10.0
libtpu: 0.0.40
codegen_flags: <defaults>
</compile_context>

<pallas_src>
import functools

import jax
import jax.numpy as jnp
from jax.experimental import pallas as pl
from jax.experimental.pallas import tpu as pltpu


# ---------------------------------------------------------------------------
# Fused ResBlock kernel: (conv1 || dim_equalizer) -> conv2 -> residual add
# ---------------------------------------------------------------------------
def _resblock_kernel(xpad_ref, wa_ref, ba_ref, w2_ref, b2_ref, o_ref, h1p_ref,
                     *, H, W, cin, cout, identity_res, neg_slope):
    f32 = jnp.float32
    # Halo tile of one image, cast once to f32 so all slicing/reshaping happens
    # on 32-bit data (layout-safe); matmul operands are cast back to the
    # storage dtype (bf16 or f32) right before the MXU.
    x = xpad_ref[0].astype(f32)                       # (H+2, W+2, cin)
    wa = wa_ref[...]                                  # (9*cin, c1)
    w2 = w2_ref[...]                                  # (9*cout, cout)
    mxu_dt = wa.dtype

    # ---- stage 1: conv1 (+ dim_equalizer) as 9 accumulated tap GEMMs -------
    c1 = wa.shape[1]
    acc1 = jnp.zeros((H * W, c1), f32)
    for t in range(9):
        dy, dx = t // 3, t % 3
        xs = x[dy:dy + H, dx:dx + W, :].reshape(H * W, cin)
        acc1 = acc1 + jnp.dot(xs.astype(mxu_dt), wa[t * cin:(t + 1) * cin, :],
                              preferred_element_type=f32)
    acc1 = acc1 + ba_ref[...]                         # folded BN bias (f32)
    act1 = jnp.where(acc1 >= 0, acc1, neg_slope * acc1)   # LeakyReLU(0.1)

    h1 = act1[:, :cout]                               # cnn1(x), activated
    if identity_res:
        residual = x[1:1 + H, 1:1 + W, :].reshape(H * W, cin)   # identity
    else:
        residual = act1[:, cout:]                     # dim_equalizer(x)

    # ---- zero-padded h1 staged in a VMEM scratch ----------------------------
    # Interior is written at sublane offset 8 (aligned store); the zero halo
    # needed by conv2 lives at columns 7 and 8+W and rows 0 / H+1.
    h1p_ref[...] = jnp.zeros_like(h1p_ref)
    h1p_ref[1:1 + H, 8:8 + W, :] = h1.reshape(H, W, cout)

    # ---- stage 2: conv2 over the zero-padded h1 ------------------------------
    acc2 = jnp.zeros((H * W, cout), f32)
    for t in range(9):
        dy, dx = t // 3, t % 3
        hs = h1p_ref[dy:dy + H, 7 + dx:7 + dx + W, :].reshape(H * W, cout)
        acc2 = acc2 + jnp.dot(hs.astype(mxu_dt), w2[t * cout:(t + 1) * cout, :],
                              preferred_element_type=f32)
    acc2 = acc2 + b2_ref[...]
    act2 = jnp.where(acc2 >= 0, acc2, neg_slope * acc2)

    # cnn2(cnn1(x)) + initial
    o_ref[0] = (act2 + residual).astype(o_ref.dtype)


# ---------------------------------------------------------------------------
# Parameter folding (conv bias + BatchNorm running stats -> weight/bias)
# ---------------------------------------------------------------------------
def fold_cnnblock_params(p, eps=1e-3):
    """Fold BN (running stats) into the conv weight; return (w2d, bias)."""
    scale = p["gamma"] / jnp.sqrt(p["var"] + eps)                 # (Cout,)
    bias = (p["b"] - p["mean"]) * scale + p["beta"]               # (Cout,)
    cout = p["w"].shape[0]
    # (Cout, Cin, 3, 3) -> (ky, kx, Cin, Cout), BN scale folded in,
    # -> (9*Cin, Cout); row order matches the kernel's tap slicing.
    w = jnp.transpose(p["w"], (2, 3, 1, 0)) * scale[None, None, None, :]
    return w.reshape(-1, cout), bias


def init_cnnblock_params(key, cin, cout):
    ks = jax.random.split(key, 6)
    return dict(
        w=0.1 * jax.random.normal(ks[0], (cout, cin, 3, 3), jnp.float32),
        b=0.1 * jax.random.normal(ks[1], (cout,), jnp.float32),
        gamma=1.0 + 0.1 * jax.random.normal(ks[2], (cout,), jnp.float32),
        beta=0.1 * jax.random.normal(ks[3], (cout,), jnp.float32),
        mean=0.1 * jax.random.normal(ks[4], (cout,), jnp.float32),
        var=1.0 + 0.5 * jax.random.uniform(ks[5], (cout,), jnp.float32),
    )


# ---------------------------------------------------------------------------
# ResBlock forward (NCHW in / NCHW out, like the PyTorch module)
# ---------------------------------------------------------------------------
def resblock_forward(x_nchw, p1, p2, peq, in_channels, out_channels,
                     compute_dtype=jnp.float32):
    N, cin, H, W = x_nchw.shape
    assert cin == in_channels
    assert W % 8 == 0, "TODO(synk): pad W to a multiple of 8 for general widths"
    identity_res = (in_channels == out_channels)

    w1, b1 = fold_cnnblock_params(p1)
    w2, b2 = fold_cnnblock_params(p2)
    if identity_res:
        wa, ba = w1, b1
    else:
        weq, beq = fold_cnnblock_params(peq)
        wa = jnp.concatenate([w1, weq], axis=1)     # fused cnn1 | dim_equalizer
        ba = jnp.concatenate([b1, beq], axis=0)
    c1 = wa.shape[1]

    # NHWC + 1-pixel halo; cast the (small, un-inflated) activation to the
    # storage / MXU dtype once here.  These are the only wrapper-side passes.
    x_nhwc = jnp.transpose(x_nchw, (0, 2, 3, 1))
    xpad = jnp.pad(x_nhwc, ((0, 0), (1, 1), (1, 1), (0, 0))).astype(compute_dtype)

    kernel = functools.partial(
        _resblock_kernel, H=H, W=W, cin=cin, cout=out_channels,
        identity_res=identity_res, neg_slope=0.1)

    out_flat = pl.pallas_call(
        kernel,
        out_shape=jax.ShapeDtypeStruct((N, H * W, out_channels), compute_dtype),
        grid=(N,),
        in_specs=[
            pl.BlockSpec((1, H + 2, W + 2, cin), lambda n: (n, 0, 0, 0)),
            pl.BlockSpec((9 * cin, c1), lambda n: (0, 0)),
            pl.BlockSpec((1, c1), lambda n: (0, 0)),
            pl.BlockSpec((9 * out_channels, out_channels), lambda n: (0, 0)),
            pl.BlockSpec((1, out_channels), lambda n: (0, 0)),
        ],
        out_specs=pl.BlockSpec((1, H * W, out_channels), lambda n: (n, 0, 0)),
        # zero-padded h1 staging buffer: interior at [1:H+1, 8:8+W, :]
        scratch_shapes=[pltpu.VMEM((H + 2, W + 16, out_channels), jnp.float32)],
        compiler_params=pltpu.CompilerParams(
            dimension_semantics=("parallel",)),   # batch split across TCs (v7x)
    )(xpad,
      wa.astype(compute_dtype),
      ba.reshape(1, c1).astype(jnp.float32),
      w2.astype(compute_dtype),
      b2.reshape(1, out_channels).astype(jnp.float32))

    out = out_flat.astype(jnp.float32).reshape(N, H, W, out_channels)
    return jnp.transpose(out, (0, 3, 1, 2))       # back to NCHW


# ---------------------------------------------------------------------------
# Pure-JAX reference (XLA conv, highest precision) for correctness checks
# ---------------------------------------------------------------------------
def _ref_cnnblock(x, p, eps=1e-3):
    y = jax.lax.conv_general_dilated(
        x, p["w"], window_strides=(1, 1), padding=((1, 1), (1, 1)),
        dimension_numbers=("NCHW", "OIHW", "NCHW"),
        precision=jax.lax.Precision.HIGHEST)
    y = y + p["b"][None, :, None, None]
    y = (y - p["mean"][None, :, None, None]) / jnp.sqrt(
        p["var"][None, :, None, None] + eps)
    y = p["gamma"][None, :, None, None] * y + p["beta"][None, :, None, None]
    return jnp.where(y >= 0, y, 0.1 * y)


def _ref_resblock(x, p1, p2, peq, cin, cout):
    h = _ref_cnnblock(_ref_cnnblock(x, p1), p2)
    initial = _ref_cnnblock(x, peq) if cin != cout else x
    return h + initial


if __name__ == "__main__":
    N, H, W = 2, 16, 16
    root = jax.random.PRNGKey(0)
    kx, k1, k2, k3, kx2, k4, k5 = jax.random.split(root, 7)

    # ---- case 1: in_channels != out_channels (dim_equalizer branch), f32 ----
    CIN, COUT = 4, 8
    x = jax.random.normal(kx, (N, CIN, H, W), jnp.float32)
    p_cnn1 = init_cnnblock_params(k1, CIN, COUT)
    p_cnn2 = init_cnnblock_params(k2, COUT, COUT)
    p_eq = init_cnnblock_params(k3, CIN, COUT)

    out = jax.block_until_ready(resblock_forward(x, p_cnn1, p_cnn2, p_eq, CIN, COUT))
    ref = jax.block_until_ready(_ref_resblock(x, p_cnn1, p_cnn2, p_eq, CIN, COUT))
    assert out.shape == (N, COUT, H, W), out.shape
    # f32 path accumulates in f32 -> tolerance tightened (was 5e-2).
    assert jnp.allclose(out, ref, atol=1e-3, rtol=1e-3), (
        float(jnp.max(jnp.abs(out - ref))))

    # ---- case 2: in_channels == out_channels (identity residual), f32 -------
    x2 = jax.random.normal(kx2, (N, COUT, H, W), jnp.float32)
    p1b = init_cnnblock_params(k4, COUT, COUT)
    p2b = init_cnnblock_params(k5, COUT, COUT)
    out2 = jax.block_until_ready(resblock_forward(x2, p1b, p2b, None, COUT, COUT))
    ref2 = jax.block_until_ready(_ref_resblock(x2, p1b, p2b, None, COUT, COUT))
    assert jnp.allclose(out2, ref2, atol=1e-3, rtol=1e-3), (
        float(jnp.max(jnp.abs(out2 - ref2))))

    # ---- case 3: bf16 storage / MXU operands, f32 accumulation ---------------
    out_bf = jax.block_until_ready(
        resblock_forward(x, p_cnn1, p_cnn2, p_eq, CIN, COUT,
                         compute_dtype=jnp.bfloat16))
    assert jnp.allclose(out_bf, ref, atol=5e-2, rtol=5e-2), (
        float(jnp.max(jnp.abs(out_bf - ref))))

    print("KERNEL_OK")
</pallas_src>

<mosaic_0001>
module attributes {stable_mosaic.version = 11 : i64} {
  func.func @_resblock_kernel(%arg0: i32, %arg1: memref<1x18x18x4xf32, #tpu.memory_space<vmem>>, %arg2: memref<36x16xf32, #tpu.memory_space<vmem>>, %arg3: memref<1x16xf32, #tpu.memory_space<vmem>>, %arg4: memref<72x8xf32, #tpu.memory_space<vmem>>, %arg5: memref<1x8xf32, #tpu.memory_space<vmem>>, %arg6: memref<1x256x8xf32, #tpu.memory_space<vmem>>, %arg7: memref<18x32x8xf32, #tpu.memory_space<vmem>>) attributes {dimension_semantics = [#tpu.dimension_semantics<parallel>], iteration_bounds = array<i64: 2>, scalar_prefetch = 0 : i64, scratch_operands = 1 : i64, tpu.core_type = #tpu.core_type<tc>, window_params = [{transform_indices = @transform_0, window_bounds = array<i64: 1, 18, 18, 4>}, {pipeline_mode = #tpu.pipeline_mode<synchronous>, transform_indices = @transform_1, window_bounds = array<i64: 36, 16>}, {pipeline_mode = #tpu.pipeline_mode<synchronous>, transform_indices = @transform_2, window_bounds = array<i64: 1, 16>}, {pipeline_mode = #tpu.pipeline_mode<synchronous>, transform_indices = @transform_3, window_bounds = array<i64: 72, 8>}, {pipeline_mode = #tpu.pipeline_mode<synchronous>, transform_indices = @transform_4, window_bounds = array<i64: 1, 8>}, {transform_indices = @transform_5, window_bounds = array<i64: 1, 256, 8>}]} {
    %c0 = arith.constant 0 : index
    %c0_0 = arith.constant 0 : index
    %c0_1 = arith.constant 0 : index
    %c0_2 = arith.constant 0 : index
    %0 = vector.load %arg1[%c0, %c0_0, %c0_1, %c0_2] : memref<1x18x18x4xf32, #tpu.memory_space<vmem>>, vector<1x18x18x4xf32>
    %1 = vector.shape_cast %0 : vector<1x18x18x4xf32> to vector<18x18x4xf32>
    %c0_3 = arith.constant 0 : index
    %c0_4 = arith.constant 0 : index
    %2 = vector.load %arg2[%c0_3, %c0_4] : memref<36x16xf32, #tpu.memory_space<vmem>>, vector<36x16xf32>
    %c0_5 = arith.constant 0 : index
    %c0_6 = arith.constant 0 : index
    %3 = vector.load %arg4[%c0_5, %c0_6] : memref<72x8xf32, #tpu.memory_space<vmem>>, vector<72x8xf32>
    %cst = arith.constant 0.000000e+00 : f32
    %4 = vector.broadcast %cst : f32 to vector<256x16xf32>
    %5 = vector.extract_strided_slice %1 {offsets = [0, 0, 0], sizes = [16, 16, 4], strides = [1, 1, 1]} : vector<18x18x4xf32> to vector<16x16x4xf32>
    %6 = vector.shape_cast %5 : vector<16x16x4xf32> to vector<256x4xf32>
    %7 = vector.extract_strided_slice %2 {offsets = [0, 0], sizes = [4, 16], strides = [1, 1]} : vector<36x16xf32> to vector<4x16xf32>
    %cst_7 = arith.constant dense<0.000000e+00> : vector<256x16xf32>
    %8 = tpu.matmul %6, %7, %cst_7 {dimension_numbers = #tpu.dot_dimension_numbers<[1], [0], [0], [1], [0, 0, 1, 1], [], []>} : vector<256x4xf32>, vector<4x16xf32>, vector<256x16xf32> -> vector<256x16xf32>
    %9 = arith.addf %4, %8 : vector<256x16xf32>
    %10 = vector.extract_strided_slice %1 {offsets = [0, 1, 0], sizes = [16, 16, 4], strides = [1, 1, 1]} : vector<18x18x4xf32> to vector<16x16x4xf32>
    %11 = vector.shape_cast %10 : vector<16x16x4xf32> to vector<256x4xf32>
    %12 = vector.extract_strided_slice %2 {offsets = [4, 0], sizes = [4, 16], strides = [1, 1]} : vector<36x16xf32> to vector<4x16xf32>
    %cst_8 = arith.constant dense<0.000000e+00> : vector<256x16xf32>
    %13 = tpu.matmul %11, %12, %cst_8 {dimension_numbers = #tpu.dot_dimension_numbers<[1], [0], [0], [1], [0, 0, 1, 1], [], []>} : vector<256x4xf32>, vector<4x16xf32>, vector<256x16xf32> -> vector<256x16xf32>
    %14 = arith.addf %9, %13 : vector<256x16xf32>
    %15 = vector.extract_strided_slice %1 {offsets = [0, 2, 0], sizes = [16, 16, 4], strides = [1, 1, 1]} : vector<18x18x4xf32> to vector<16x16x4xf32>
    %16 = vector.shape_cast %15 : vector<16x16x4xf32> to vector<256x4xf32>
    %17 = vector.extract_strided_slice %2 {offsets = [8, 0], sizes = [4, 16], strides = [1, 1]} : vector<36x16xf32> to vector<4x16xf32>
    %cst_9 = arith.constant dense<0.000000e+00> : vector<256x16xf32>
    %18 = tpu.matmul %16, %17, %cst_9 {dimension_numbers = #tpu.dot_dimension_numbers<[1], [0], [0], [1], [0, 0, 1, 1], [], []>} : vector<256x4xf32>, vector<4x16xf32>, vector<256x16xf32> -> vector<256x16xf32>
    %19 = arith.addf %14, %18 : vector<256x16xf32>
    %20 = vector.extract_strided_slice %1 {offsets = [1, 0, 0], sizes = [16, 16, 4], strides = [1, 1, 1]} : vector<18x18x4xf32> to vector<16x16x4xf32>
    %21 = vector.shape_cast %20 : vector<16x16x4xf32> to vector<256x4xf32>
    %22 = vector.extract_strided_slice %2 {offsets = [12, 0], sizes = [4, 16], strides = [1, 1]} : vector<36x16xf32> to vector<4x16xf32>
    %cst_10 = arith.constant dense<0.000000e+00> : vector<256x16xf32>
    %23 = tpu.matmul %21, %22, %cst_10 {dimension_numbers = #tpu.dot_dimension_numbers<[1], [0], [0], [1], [0, 0, 1, 1], [], []>} : vector<256x4xf32>, vector<4x16xf32>, vector<256x16xf32> -> vector<256x16xf32>
    %24 = arith.addf %19, %23 : vector<256x16xf32>
    %25 = vector.extract_strided_slice %1 {offsets = [1, 1, 0], sizes = [16, 16, 4], strides = [1, 1, 1]} : vector<18x18x4xf32> to vector<16x16x4xf32>
    %26 = vector.shape_cast %25 : vector<16x16x4xf32> to vector<256x4xf32>
    %27 = vector.extract_strided_slice %2 {offsets = [16, 0], sizes = [4, 16], strides = [1, 1]} : vector<36x16xf32> to vector<4x16xf32>
    %cst_11 = arith.constant dense<0.000000e+00> : vector<256x16xf32>
    %28 = tpu.matmul %26, %27, %cst_11 {dimension_numbers = #tpu.dot_dimension_numbers<[1], [0], [0], [1], [0, 0, 1, 1], [], []>} : vector<256x4xf32>, vector<4x16xf32>, vector<256x16xf32> -> vector<256x16xf32>
    %29 = arith.addf %24, %28 : vector<256x16xf32>
    %30 = vector.extract_strided_slice %1 {offsets = [1, 2, 0], sizes = [16, 16, 4], strides = [1, 1, 1]} : vector<18x18x4xf32> to vector<16x16x4xf32>
    %31 = vector.shape_cast %30 : vector<16x16x4xf32> to vector<256x4xf32>
    %32 = vector.extract_strided_slice %2 {offsets = [20, 0], sizes = [4, 16], strides = [1, 1]} : vector<36x16xf32> to vector<4x16xf32>
    %cst_12 = arith.constant dense<0.000000e+00> : vector<256x16xf32>
    %33 = tpu.matmul %31, %32, %cst_12 {dimension_numbers = #tpu.dot_dimension_numbers<[1], [0], [0], [1], [0, 0, 1, 1], [], []>} : vector<256x4xf32>, vector<4x16xf32>, vector<256x16xf32> -> vector<256x16xf32>
    %34 = arith.addf %29, %33 : vector<256x16xf32>
    %35 = vector.extract_strided_slice %1 {offsets = [2, 0, 0], sizes = [16, 16, 4], strides = [1, 1, 1]} : vector<18x18x4xf32> to vector<16x16x4xf32>
    %36 = vector.shape_cast %35 : vector<16x16x4xf32> to vector<256x4xf32>
    %37 = vector.extract_strided_slice %2 {offsets = [24, 0], sizes = [4, 16], strides = [1, 1]} : vector<36x16xf32> to vector<4x16xf32>
    %cst_13 = arith.constant dense<0.000000e+00> : vector<256x16xf32>
    %38 = tpu.matmul %36, %37, %cst_13 {dimension_numbers = #tpu.dot_dimension_numbers<[1], [0], [0], [1], [0, 0, 1, 1], [], []>} : vector<256x4xf32>, vector<4x16xf32>, vector<256x16xf32> -> vector<256x16xf32>
    %39 = arith.addf %34, %38 : vector<256x16xf32>
    %40 = vector.extract_strided_slice %1 {offsets = [2, 1, 0], sizes = [16, 16, 4], strides = [1, 1, 1]} : vector<18x18x4xf32> to vector<16x16x4xf32>
    %41 = vector.shape_cast %40 : vector<16x16x4xf32> to vector<256x4xf32>
    %42 = vector.extract_strided_slice %2 {offsets = [28, 0], sizes = [4, 16], strides = [1, 1]} : vector<36x16xf32> to vector<4x16xf32>
    %cst_14 = arith.constant dense<0.000000e+00> : vector<256x16xf32>
    %43 = tpu.matmul %41, %42, %cst_14 {dimension_numbers = #tpu.dot_dimension_numbers<[1], [0], [0], [1], [0, 0, 1, 1], [], []>} : vector<256x4xf32>, vector<4x16xf32>, vector<256x16xf32> -> vector<256x16xf32>
    %44 = arith.addf %39, %43 : vector<256x16xf32>
    %45 = vector.extract_strided_slice %1 {offsets = [2, 2, 0], sizes = [16, 16, 4], strides = [1, 1, 1]} : vector<18x18x4xf32> to vector<16x16x4xf32>
    %46 = vector.shape_cast %45 : vector<16x16x4xf32> to vector<256x4xf32>
    %47 = vector.extract_strided_slice %2 {offsets = [32, 0], sizes = [4, 16], strides = [1, 1]} : vector<36x16xf32> to vector<4x16xf32>
    %cst_15 = arith.constant dense<0.000000e+00> : vector<256x16xf32>
    %48 = tpu.matmul %46, %47, %cst_15 {dimension_numbers = #tpu.dot_dimension_numbers<[1], [0], [0], [1], [0, 0, 1, 1], [], []>} : vector<256x4xf32>, vector<4x16xf32>, vector<256x16xf32> -> vector<256x16xf32>
    %49 = arith.addf %44, %48 : vector<256x16xf32>
    %c0_16 = arith.constant 0 : index
    %c0_17 = arith.constant 0 : index
    %50 = vector.load %arg3[%c0_16, %c0_17] : memref<1x16xf32, #tpu.memory_space<vmem>>, vector<1x16xf32>
    %51 = vector.broadcast %50 : vector<1x16xf32> to vector<256x16xf32>
    %52 = arith.addf %49, %51 : vector<256x16xf32>
    %cst_18 = arith.constant 0.000000e+00 : f32
    %53 = vector.broadcast %cst_18 : f32 to vector<256x16xf32>
    %54 = arith.cmpf oge, %52, %53 : vector<256x16xf32>
    %cst_19 = arith.constant 1.000000e-01 : f32
    %55 = vector.broadcast %cst_19 : f32 to vector<256x16xf32>
    %56 = arith.mulf %55, %52 : vector<256x16xf32>
    %57 = arith.select %54, %52, %56 : vector<256x16xi1>, vector<256x16xf32>
    %58 = vector.extract_strided_slice %57 {offsets = [0, 0], sizes = [256, 8], strides = [1, 1]} : vector<256x16xf32> to vector<256x8xf32>
    %59 = vector.extract_strided_slice %57 {offsets = [0, 8], sizes = [256, 8], strides = [1, 1]} : vector<256x16xf32> to vector<256x8xf32>
    %cst_20 = arith.constant 0.000000e+00 : f32
    %60 = vector.broadcast %cst_20 : f32 to vector<18x32x8xf32>
    %c0_21 = arith.constant 0 : index
    %c0_22 = arith.constant 0 : index
    %c0_23 = arith.constant 0 : index
    %61 = vector.load %arg7[%c0_21, %c0_22, %c0_23] : memref<18x32x8xf32, #tpu.memory_space<vmem>>, vector<18x32x8xf32>
    tpu.vector_store %arg7[%c0_21, %c0_22, %c0_23], %60 {strides = array<i32>} : memref<18x32x8xf32, #tpu.memory_space<vmem>>, vector<18x32x8xf32>,
    %62 = vector.shape_cast %58 : vector<256x8xf32> to vector<16x16x8xf32>
    %c1 = arith.constant 1 : index
    %c8 = arith.constant 8 : index
    %c0_24 = arith.constant 0 : index
    %63 = vector.load %arg7[%c1, %c8, %c0_24] : memref<18x32x8xf32, #tpu.memory_space<vmem>>, vector<16x16x8xf32>
    tpu.vector_store %arg7[%c1, %c8, %c0_24], %62 {strides = array<i32>} : memref<18x32x8xf32, #tpu.memory_space<vmem>>, vector<16x16x8xf32>,
    %cst_25 = arith.constant 0.000000e+00 : f32
    %64 = vector.broadcast %cst_25 : f32 to vector<256x8xf32>
    %c0_26 = arith.constant 0 : index
    %c7 = arith.constant 7 : index
    %c0_27 = arith.constant 0 : index
    %65 = vector.load %arg7[%c0_26, %c7, %c0_27] : memref<18x32x8xf32, #tpu.memory_space<vmem>>, vector<16x16x8xf32>
    %66 = vector.shape_cast %65 : vector<16x16x8xf32> to vector<256x8xf32>
    %67 = vector.extract_strided_slice %3 {offsets = [0, 0], sizes = [8, 8], strides = [1, 1]} : vector<72x8xf32> to vector<8x8xf32>
    %cst_28 = arith.constant dense<0.000000e+00> : vector<256x8xf32>
    %68 = tpu.matmul %66, %67, %cst_28 {dimension_numbers = #tpu.dot_dimension_numbers<[1], [0], [0], [1], [0, 0, 1, 1], [], []>} : vector<256x8xf32>, vector<8x8xf32>, vector<256x8xf32> -> vector<256x8xf32>
    %69 = arith.addf %64, %68 : vector<256x8xf32>
    %c0_29 = arith.constant 0 : index
    %c8_30 = arith.constant 8 : index
    %c0_31 = arith.constant 0 : index
    %70 = vector.load %arg7[%c0_29, %c8_30, %c0_31] : memref<18x32x8xf32, #tpu.memory_space<vmem>>, vector<16x16x8xf32>
    %71 = vector.shape_cast %70 : vector<16x16x8xf32> to vector<256x8xf32>
    %72 = vector.extract_strided_slice %3 {offsets = [8, 0], sizes = [8, 8], strides = [1, 1]} : vector<72x8xf32> to vector<8x8xf32>
    %cst_32 = arith.constant dense<0.000000e+00> : vector<256x8xf32>
    %73 = tpu.matmul %71, %72, %cst_32 {dimension_numbers = #tpu.dot_dimension_numbers<[1], [0], [0], [1], [0, 0, 1, 1], [], []>} : vector<256x8xf32>, vector<8x8xf32>, vector<256x8xf32> -> vector<256x8xf32>
    %74 = arith.addf %69, %73 : vector<256x8xf32>
    %c0_33 = arith.constant 0 : index
    %c9 = arith.constant 9 : index
    %c0_34 = arith.constant 0 : index
    %75 = vector.load %arg7[%c0_33, %c9, %c0_34] : memref<18x32x8xf32, #tpu.memory_space<vmem>>, vector<16x16x8xf32>
    %76 = vector.shape_cast %75 : vector<16x16x8xf32> to vector<256x8xf32>
    %77 = vector.extract_strided_slice %3 {offsets = [16, 0], sizes = [8, 8], strides = [1, 1]} : vector<72x8xf32> to vector<8x8xf32>
    %cst_35 = arith.constant dense<0.000000e+00> : vector<256x8xf32>
    %78 = tpu.matmul %76, %77, %cst_35 {dimension_numbers = #tpu.dot_dimension_numbers<[1], [0], [0], [1], [0, 0, 1, 1], [], []>} : vector<256x8xf32>, vector<8x8xf32>, vector<256x8xf32> -> vector<256x8xf32>
    %79 = arith.addf %74, %78 : vector<256x8xf32>
    %c1_36 = arith.constant 1 : index
    %c7_37 = arith.constant 7 : index
    %c0_38 = arith.constant 0 : index
    %80 = vector.load %arg7[%c1_36, %c7_37, %c0_38] : memref<18x32x8xf32, #tpu.memory_space<vmem>>, vector<16x16x8xf32>
    %81 = vector.shape_cast %80 : vector<16x16x8xf32> to vector<256x8xf32>
    %82 = vector.extract_strided_slice %3 {offsets = [24, 0], sizes = [8, 8], strides = [1, 1]} : vector<72x8xf32> to vector<8x8xf32>
    %cst_39 = arith.constant dense<0.000000e+00> : vector<256x8xf32>
    %83 = tpu.matmul %81, %82, %cst_39 {dimension_numbers = #tpu.dot_dimension_numbers<[1], [0], [0], [1], [0, 0, 1, 1], [], []>} : vector<256x8xf32>, vector<8x8xf32>, vector<256x8xf32> -> vector<256x8xf32>
    %84 = arith.addf %79, %83 : vector<256x8xf32>
    %c1_40 = arith.constant 1 : index
    %c8_41 = arith.constant 8 : index
    %c0_42 = arith.constant 0 : index
    %85 = vector.load %arg7[%c1_40, %c8_41, %c0_42] : memref<18x32x8xf32, #tpu.memory_space<vmem>>, vector<16x16x8xf32>
    %86 = vector.shape_cast %85 : vector<16x16x8xf32> to vector<256x8xf32>
    %87 = vector.extract_strided_slice %3 {offsets = [32, 0], sizes = [8, 8], strides = [1, 1]} : vector<72x8xf32> to vector<8x8xf32>
    %cst_43 = arith.constant dense<0.000000e+00> : vector<256x8xf32>
    %88 = tpu.matmul %86, %87, %cst_43 {dimension_numbers = #tpu.dot_dimension_numbers<[1], [0], [0], [1], [0, 0, 1, 1], [], []>} : vector<256x8xf32>, vector<8x8xf32>, vector<256x8xf32> -> vector<256x8xf32>
    %89 = arith.addf %84, %88 : vector<256x8xf32>
    %c1_44 = arith.constant 1 : index
    %c9_45 = arith.constant 9 : index
    %c0_46 = arith.constant 0 : index
    %90 = vector.load %arg7[%c1_44, %c9_45, %c0_46] : memref<18x32x8xf32, #tpu.memory_space<vmem>>, vector<16x16x8xf32>
    %91 = vector.shape_cast %90 : vector<16x16x8xf32> to vector<256x8xf32>
    %92 = vector.extract_strided_slice %3 {offsets = [40, 0], sizes = [8, 8], strides = [1, 1]} : vector<72x8xf32> to vector<8x8xf32>
    %cst_47 = arith.constant dense<0.000000e+00> : vector<256x8xf32>
    %93 = tpu.matmul %91, %92, %cst_47 {dimension_numbers = #tpu.dot_dimension_numbers<[1], [0], [0], [1], [0, 0, 1, 1], [], []>} : vector<256x8xf32>, vector<8x8xf32>, vector<256x8xf32> -> vector<256x8xf32>
    %94 = arith.addf %89, %93 : vector<256x8xf32>
    %c2 = arith.constant 2 : index
    %c7_48 = arith.constant 7 : index
    %c0_49 = arith.constant 0 : index
    %95 = vector.load %arg7[%c2, %c7_48, %c0_49] : memref<18x32x8xf32, #tpu.memory_space<vmem>>, vector<16x16x8xf32>
    %96 = vector.shape_cast %95 : vector<16x16x8xf32> to vector<256x8xf32>
    %97 = vector.extract_strided_slice %3 {offsets = [48, 0], sizes = [8, 8], strides = [1, 1]} : vector<72x8xf32> to vector<8x8xf32>
    %cst_50 = arith.constant dense<0.000000e+00> : vector<256x8xf32>
    %98 = tpu.matmul %96, %97, %cst_50 {dimension_numbers = #tpu.dot_dimension_numbers<[1], [0], [0], [1], [0, 0, 1, 1], [], []>} : vector<256x8xf32>, vector<8x8xf32>, vector<256x8xf32> -> vector<256x8xf32>
    %99 = arith.addf %94, %98 : vector<256x8xf32>
    %c2_51 = arith.constant 2 : index
    %c8_52 = arith.constant 8 : index
    %c0_53 = arith.constant 0 : index
    %100 = vector.load %arg7[%c2_51, %c8_52, %c0_53] : memref<18x32x8xf32, #tpu.memory_space<vmem>>, vector<16x16x8xf32>
    %101 = vector.shape_cast %100 : vector<16x16x8xf32> to vector<256x8xf32>
    %102 = vector.extract_strided_slice %3 {offsets = [56, 0], sizes = [8, 8], strides = [1, 1]} : vector<72x8xf32> to vector<8x8xf32>
    %cst_54 = arith.constant dense<0.000000e+00> : vector<256x8xf32>
    %103 = tpu.matmul %101, %102, %cst_54 {dimension_numbers = #tpu.dot_dimension_numbers<[1], [0], [0], [1], [0, 0, 1, 1], [], []>} : vector<256x8xf32>, vector<8x8xf32>, vector<256x8xf32> -> vector<256x8xf32>
    %104 = arith.addf %99, %103 : vector<256x8xf32>
    %c2_55 = arith.constant 2 : index
    %c9_56 = arith.constant 9 : index
    %c0_57 = arith.constant 0 : index
    %105 = vector.load %arg7[%c2_55, %c9_56, %c0_57] : memref<18x32x8xf32, #tpu.memory_space<vmem>>, vector<16x16x8xf32>
    %106 = vector.shape_cast %105 : vector<16x16x8xf32> to vector<256x8xf32>
    %107 = vector.extract_strided_slice %3 {offsets = [64, 0], sizes = [8, 8], strides = [1, 1]} : vector<72x8xf32> to vector<8x8xf32>
    %cst_58 = arith.constant dense<0.000000e+00> : vector<256x8xf32>
    %108 = tpu.matmul %106, %107, %cst_58 {dimension_numbers = #tpu.dot_dimension_numbers<[1], [0], [0], [1], [0, 0, 1, 1], [], []>} : vector<256x8xf32>, vector<8x8xf32>, vector<256x8xf32> -> vector<256x8xf32>
    %109 = arith.addf %104, %108 : vector<256x8xf32>
    %c0_59 = arith.constant 0 : index
    %c0_60 = arith.constant 0 : index
    %110 = vector.load %arg5[%c0_59, %c0_60] : memref<1x8xf32, #tpu.memory_space<vmem>>, vector<1x8xf32>
    %111 = vector.broadcast %110 : vector<1x8xf32> to vector<256x8xf32>
    %112 = arith.addf %109, %111 : vector<256x8xf32>
    %cst_61 = arith.constant 0.000000e+00 : f32
    %113 = vector.broadcast %cst_61 : f32 to vector<256x8xf32>
    %114 = arith.cmpf oge, %112, %113 : vector<256x8xf32>
    %cst_62 = arith.constant 1.000000e-01 : f32
    %115 = vector.broadcast %cst_62 : f32 to vector<256x8xf32>
    %116 = arith.mulf %115, %112 : vector<256x8xf32>
    %117 = arith.select %114, %112, %116 : vector<256x8xi1>, vector<256x8xf32>
    %118 = arith.addf %117, %59 : vector<256x8xf32>
    %c0_63 = arith.constant 0 : index
    %c0_64 = arith.constant 0 : index
    %c0_65 = arith.constant 0 : index
    %119 = vector.load %arg6[%c0_63, %c0_64, %c0_65] : memref<1x256x8xf32, #tpu.memory_space<vmem>>, vector<1x256x8xf32>
    %120 = vector.shape_cast %119 : vector<1x256x8xf32> to vector<256x8xf32>
    %121 = vector.shape_cast %118 : vector<256x8xf32> to vector<1x256x8xf32>
    tpu.vector_store %arg6[%c0_63, %c0_64, %c0_65], %121 {strides = array<i32>} : memref<1x256x8xf32, #tpu.memory_space<vmem>>, vector<1x256x8xf32>,
    return
  }
  func.func @transform_0(%arg0: i32) -> (i32, i32, i32, i32) {
    %c0_i32 = arith.constant 0 : i32
    %c0_i32_0 = arith.constant 0 : i32
    %c0_i32_1 = arith.constant 0 : i32
    %c0_i32_2 = arith.constant 0 : i32
    return %arg0, %c0_i32, %c0_i32_0, %c0_i32_1 : i32, i32, i32, i32
  }
  func.func @transform_1(%arg0: i32) -> (i32, i32) {
    %c0_i32 = arith.constant 0 : i32
    %c0_i32_0 = arith.constant 0 : i32
    %c0_i32_1 = arith.constant 0 : i32
    return %c0_i32, %c0_i32_0 : i32, i32
  }
  func.func @transform_2(%arg0: i32) -> (i32, i32) {
    %c0_i32 = arith.constant 0 : i32
    %c0_i32_0 = arith.constant 0 : i32
    %c0_i32_1 = arith.constant 0 : i32
    return %c0_i32, %c0_i32_0 : i32, i32
  }
  func.func @transform_3(%arg0: i32) -> (i32, i32) {
    %c0_i32 = arith.constant 0 : i32
    %c0_i32_0 = arith.constant 0 : i32
    %c0_i32_1 = arith.constant 0 : i32
    return %c0_i32, %c0_i32_0 : i32, i32
  }
  func.func @transform_4(%arg0: i32) -> (i32, i32) {
    %c0_i32 = arith.constant 0 : i32
    %c0_i32_0 = arith.constant 0 : i32
    %c0_i32_1 = arith.constant 0 : i32
    return %c0_i32, %c0_i32_0 : i32, i32
  }
  func.func @transform_5(%arg0: i32) -> (i32, i32, i32) {
    %c0_i32 = arith.constant 0 : i32
    %c0_i32_0 = arith.constant 0 : i32
    %c0_i32_1 = arith.constant 0 : i32
    return %arg0, %c0_i32, %c0_i32_0 : i32, i32, i32
  }
}

</mosaic_0001>

<bundles_post_ra>
// kernel: tpu_custom_call.1
= control target key start
LH: loop header
LB: loop body
LE: loop exit
PB: predicated region body
PF: predicated region fallthrough
CT: control target
= control target key end

     0   :  { %s5707_s18 = smov 0   ;;  %s8504_s0 = inlined_call_operand.vmem [shape: f32[2,18,18,4], index: 0, kind: input, shape index: {}]   ;;  %s8505_s1 = inlined_call_operand.vmem [shape: f32[36,16], index: 1, kind: input, shape index: {}]   ;;  %s8506_s2 = inlined_call_operand.vmem [shape: f32[1,16], index: 2, kind: input, shape index: {}]   ;;  %s8507_s3 = inlined_call_operand.vmem [shape: f32[72,8], index: 3, kind: input, shape index: {}]   ;;  %s8508_s4 = inlined_call_operand.vmem [shape: f32[1,8], index: 4, kind: input, shape index: {}]   ;;  %s8509_s5 = inlined_call_operand.vmem [shape: f32[2,256,8], index: 5, kind: output, shape index: {}]  }
   0x1 LB: > { %s5026_s19 = sadd.s32 4294967295, %s5673_s18   ;;  %p5030_p0 = scmp.ge.s32.totalorder %s5673_s18, 1  ;;  %s5673_s18 = sphi %s5707_s18, %s15_s18  }
   0x2   : > { %p187_p1 = scmp.lt.s32.totalorder %s5673_s18, 3 }
   0x4   : > { %p188_p2 = pnand %p5030_p0, %p187_p1 }
   0x6   : > { %191 = sbr.rel (%p188_p2) target bundleno = 1459 (0x5b3), region = 40 }
   0xb   : > { %v279_v0 = vld [vmem:[%s8505_s1] sm:$0xff]  ;;  %vm489_vm0 = vcmask 1043456   ;;  %p215_p3 = scmp.lt.s32.totalorder %s5026_s19, 1  ;;  %v280_v1 = vld [vmem:[%s8505_s1 + $0x8] sm:$0xff]  ;;  %v281_v4 = vld [vmem:[%s8505_s1 + $0x10] sm:$0xff]  ;;  %vm424_vm1 = vcmask 31744  }
   0xc   : > { %5623 = vmatpush.msk.msra.mxu3 %vm489_vm0, %v279_v0  ;;  %v423_v2 = vrot.slane %v279_v0, 4  ;;  %v1077_v3 = vrot.slane %v280_v1, 4  ;;  %5067 = vmatpush.msk.msra.mxu1 %vm489_vm0, %v279_v0  ;;  %v1394_v5 = vrot.slane %v281_v4, 4  ;;  %vm341_vm2 = vcmask 1046528   ;;  %s5676_s23 = smov 120  }
   0xd   : > { %s8860_s19 = smov (!%p215_p3, %s5026_s19), 1  ;;  %vm784_vm3 = vcmask 1045504   ;;  %vm2147_vm4 = vcmask 64512  }
   0xe   : > { %5034 = vmatpush.msk.msra.mxu0 %vm489_vm0, %v423_v2  ;;  %5622 = vmatpush.msk.msra.mxu2 %vm489_vm0, %v423_v2  ;;  %s5624_s26 = smul.u32 432, %s8860_s19  ;;  %s5621_s11 = sshll.u32 %s8860_s19, 8 }
   0xf   : > { %5133 = vmatpush.msk.msrb.mxu3 %vm489_vm0, %v1077_v3  ;;  %5199 = vmatpush.msk.msrb.mxu1 %vm489_vm0, %v1394_v5  ;;  %s8247_s14 = scalar_lea.vmem %s8509_s5, %s5621_s11 }
  0x10   : > { %5100 = vmatpush.msk.msrb.mxu2 %vm489_vm0, %v280_v1  ;;  %5166 = vmatpush.msk.msrb.mxu0 %vm489_vm0, %v281_v4  ;;  %s5738_s29 = scalar_lea.vmem %s8504_s0, %s5624_s26 }
  0x11   : > { %v5741_v6 = vld [vmem:[%s5738_s29 + $0xc0] sm:$0xff]  ;;  %v5747_v8 = vld [vmem:[%s5738_s29 + $0x8] sm:$0xff]  ;;  %v5761_v14 = vld [vmem:[%s5738_s29 + $0x10] sm:$0x3] }
  0x12   : > { %v5744_v7 = vld [vmem:[%s5738_s29] sm:$0xff]  ;;  %5084 = vmatmul.msk.f32.vlgmr.msra.gmra.mxu3 %vm424_vm1, %v5741_v6  ;;  %v343_v10 = vrot.slane %v5747_v8, 1  ;;  %v5754_v11 = vld [vmem:[%s5738_s29 + $0xc8] sm:$0xff]  ;;  %v382_v12 = vrot.slane %v5741_v6, 1  ;;  %v5765_v16 = vld [vmem:[%s5738_s29 + $0xd0] sm:$0x3] }
  0x13   : > { %v342_v9 = vrot.slane %v5744_v7, 1  ;;  %5068 = vmatmul.msk.f32.vlgmr.msra.gmra.mxu1 %vm424_vm1, %v5744_v7  ;;  %v383_v13 = vrot.slane %v5754_v11, 1  ;;  %v345_v18 = vrot.slane %v5761_v14, 1  ;;  %v385_v19 = vrot.slane %v5765_v16, 1  ;;  %v5784_v22 = vld [vmem:[%s5738_s29 + $0x18] sm:$0xff]  ;;  %v5787_v23 = vld [vmem:[%s5738_s29 + $0x20] sm:$0xff] }
  0x14   : > { %v5790_v24 = vld [vmem:[%s5738_s29 + $0xd8] sm:$0xff]  ;;  %v5793_v25 = vld [vmem:[%s5738_s29 + $0xe0] sm:$0xff]  ;;  %v347_v26 = vrot.slane %v5784_v22, 1  ;;  %v348_v27 = vrot.slane %v5787_v23, 1  ;;  %v5813_v32 = vld [vmem:[%s5738_s29 + $0x28] sm:$0x3] }
  0x15   : > { %v344_v15 = vsel %vm341_vm2, %v342_v9, %v343_v10  ;;  %v5769_v17 = vsel %vm341_vm2, %v382_v12, %v383_v13  ;;  %v346_v20 = vsel %vm341_vm2, %v343_v10, %v345_v18  ;;  %v5781_v21 = vsel %vm341_vm2, %v383_v13, %v385_v19  ;;  %v5816_v33 = vld [vmem:[%s5738_s29 + $0xe8] sm:$0x3]  ;;  %v5835_v38 = vld [vmem:[%s5738_s29 + $0x30] sm:$0xff]  ;;  %v5838_v39 = vld [vmem:[%s5738_s29 + $0x38] sm:$0xff] }
  0x16   : > { %5035 = vmatmul.msk.f32.vlgmr.msra.gmra.mxu0 %vm424_vm1, %v344_v15  ;;  %8606 = vst [vmem:[#allocation3_spill] sm:$0xff] %v5769_v17  ;;  %5051 = vmatmul.msk.f32.vlgmr.msra.gmra.mxu2 %vm424_vm1, %v5769_v17  ;;  %v387_v28 = vrot.slane %v5790_v24, 1  ;;  %v388_v29 = vrot.slane %v5793_v25, 1  ;;  %v5805_v30 = vsel %vm341_vm2, %v347_v26, %v348_v27  ;;  %v350_v34 = vrot.slane %v5813_v32, 1  ;;  %v5841_v40 = vld [vmem:[%s5738_s29 + $0xf0] sm:$0xff]  ;;  %v5844_v41 = vld [vmem:[%s5738_s29 + $0xf8] sm:$0xff] }
  0x17   : > { %8607 = vst [vmem:[#allocation4_spill] sm:$0xff] %v5781_v21  ;;  %v390_v35 = vrot.slane %v5816_v33, 1  ;;  %v352_v42 = vrot.slane %v5835_v38, 1  ;;  %v353_v43 = vrot.slane %v5838_v39, 1  ;;  %v392_v44 = vrot.slane %v5841_v40, 1  ;;  %v5887_v54 = vld [vmem:[%s5738_s29 + $0x48] sm:$0xff] }
  0x18   : > { %v5810_v31 = vsel %vm341_vm2, %v387_v28, %v388_v29  ;;  %v5827_v36 = vsel %vm341_vm2, %v348_v27, %v350_v34  ;;  %v393_v45 = vrot.slane %v5844_v41, 1  ;;  %v5865_v48 = vld [vmem:[%s5738_s29 + $0x40] sm:$0x3]  ;;  %v5890_v55 = vld [vmem:[%s5738_s29 + $0x50] sm:$0xff]  ;;  %v5893_v56 = vld [vmem:[%s5738_s29 + $0x108] sm:$0xff]  ;;  %v357_v58 = vrot.slane %v5887_v54, 1 }
  0x19   : > { %8608 = vst [vmem:[#allocation5_spill] sm:$0xff] %v5810_v31  ;;  %v5832_v37 = vsel %vm341_vm2, %v388_v29, %v390_v35  ;;  %v5857_v46 = vsel %vm341_vm2, %v352_v42, %v353_v43  ;;  %v5868_v49 = vld [vmem:[%s5738_s29 + $0x100] sm:$0x3]  ;;  %v355_v50 = vrot.slane %v5865_v48, 1  ;;  %v5896_v57 = vld [vmem:[%s5738_s29 + $0x110] sm:$0xff]  ;;  %v358_v59 = vrot.slane %v5890_v55, 1 }
  0x1a   : > { %5085 = vmatmul.msk.f32.gmra.mxu3 %vm424_vm1, %v5754_v11  ;;  %v5862_v47 = vsel %vm341_vm2, %v392_v44, %v393_v45  ;;  %v395_v51 = vrot.slane %v5868_v49, 1  ;;  %8610 = vst [vmem:[#allocation7_spill] sm:$0xff] %v5893_v56  ;;  %v397_v60 = vrot.slane %v5893_v56, 1  ;;  %v398_v61 = vrot.slane %v5896_v57, 1  ;;  %v5917_v0 = vld [vmem:[%s5738_s29 + $0x58] sm:$0x3] }
  0x1b   : > { %5069 = vmatmul.msk.f32.gmra.mxu1 %vm424_vm1, %v5747_v8  ;;  %v5879_v52 = vsel %vm341_vm2, %v353_v43, %v355_v50  ;;  %8611 = vst [vmem:[#allocation8_spill] sm:$0xff] %v5896_v57  ;;  %v5909_v62 = vsel %vm341_vm2, %v357_v58, %v358_v59  ;;  %v5920_v1 = vld [vmem:[%s5738_s29 + $0x118] sm:$0x3]  ;;  %v360_v2 = vrot.slane %v5917_v0, 1  ;;  %v5939_v9 = vld [vmem:[%s5738_s29 + $0x60] sm:$0xff]  ;;  %v5942_v10 = vld [vmem:[%s5738_s29 + $0x68] sm:$0xff] }
  0x1c   : > { %v5884_v53 = vsel %vm341_vm2, %v393_v45, %v395_v51  ;;  %8612 = vst [vmem:[#allocation9_spill] sm:$0xff] %v5909_v62  ;;  %v5914_v63 = vsel %vm341_vm2, %v397_v60, %v398_v61  ;;  %v400_v3 = vrot.slane %v5920_v1, 1  ;;  %v5945_v12 = vld [vmem:[%s5738_s29 + $0x120] sm:$0xff]  ;;  %v5948_v13 = vld [vmem:[%s5738_s29 + $0x128] sm:$0xff]  ;;  %v362_v15 = vrot.slane %v5939_v9, 1  ;;  %v5991_v44 = vld [vmem:[%s5738_s29 + $0x78] sm:$0xff] }
  0x1d   : > { %8609 = vst [vmem:[#allocation6_spill] sm:$0xff] %v5884_v53  ;;  %v5931_v4 = vsel %vm341_vm2, %v358_v59, %v360_v2  ;;  %v363_v18 = vrot.slane %v5942_v10, 1  ;;  %v402_v19 = vrot.slane %v5945_v12, 1  ;;  %v5969_v28 = vld [vmem:[%s5738_s29 + $0x70] sm:$0x3]  ;;  %v5994_v45 = vld [vmem:[%s5738_s29 + $0x80] sm:$0xff] }
  0x1e   : > { %5036 = vmatmul.msk.f32.gmra.mxu0 %vm424_vm1, %v346_v20  ;;  %5052 = vmatmul.msk.f32.gmra.mxu2 %vm424_vm1, %v5781_v21  ;;  %8613 = vst [vmem:[#allocation10_spill] sm:$0xff] %v5914_v63  ;;  %v5936_v5 = vsel %vm341_vm2, %v398_v61, %v400_v3  ;;  %v403_v20 = vrot.slane %v5948_v13, 1  ;;  %v5972_v29 = vld [vmem:[%s5738_s29 + $0x130] sm:$0x3]  ;;  %v365_v34 = vrot.slane %v5969_v28, 1  ;;  %v5997_v50 = vld [vmem:[%s5738_s29 + $0x138] sm:$0xff] }
  0x1f   : > { %8614 = vst [vmem:[#allocation11_spill] sm:$0xff] %v5920_v1  ;;  %v5961_v26 = vsel %vm341_vm2, %v362_v15, %v363_v18  ;;  %v405_v35 = vrot.slane %v5972_v29, 1  ;;  %v6000_v51 = vld [vmem:[%s5738_s29 + $0x140] sm:$0xff]  ;;  %v367_v58 = vrot.slane %v5991_v44, 1  ;;  %v368_v59 = vrot.slane %v5994_v45, 1 }
  0x20   : > { %8615 = vst [vmem:[#allocation12_spill] sm:$0xff] %v5931_v4  ;;  %v5966_v27 = vsel %vm341_vm2, %v402_v19, %v403_v20  ;;  %v5983_v42 = vsel %vm341_vm2, %v363_v18, %v365_v34  ;;  %v407_v60 = vrot.slane %v5997_v50, 1  ;;  %v408_v61 = vrot.slane %v6000_v51, 1  ;;  %v6021_v15 = vld [vmem:[%s5738_s29 + $0x88] sm:$0x3] }
  0x21   : > { %8616 = vst [vmem:[#allocation13_spill] sm:$0xff] %v5936_v5  ;;  %v5988_v43 = vsel %vm341_vm2, %v403_v20, %v405_v35  ;;  %v6013_v2 = vsel %vm341_vm2, %v367_v58, %v368_v59  ;;  %v6024_v18 = vld [vmem:[%s5738_s29 + $0x148] sm:$0x3]  ;;  %v370_v19 = vrot.slane %v6021_v15, 1  ;;  %v6043_v58 = vld [vmem:[%s5738_s29 + $0x90] sm:$0xff]  ;;  %v790_v1 = vrot.slane %v5784_v22, 2 }
  0x22   : > { %5086 = vmatmul.msk.f32.gmra.mxu3 %vm424_vm1, %v5790_v24  ;;  %8617 = vst [vmem:[#allocation14_spill] sm:$0xff] %v5945_v12  ;;  %v6018_v3 = vsel %vm341_vm2, %v407_v60, %v408_v61  ;;  %v410_v20 = vrot.slane %v6024_v18, 1  ;;  %v6046_v60 = vld [vmem:[%s5738_s29 + $0x98] sm:$0xff] }
  0x23   : > { %5070 = vmatmul.msk.f32.gmra.mxu1 %vm424_vm1, %v5784_v22  ;;  %8618 = vst [vmem:[#allocation15_spill] sm:$0xff] %v5948_v13  ;;  %v6035_v34 = vsel %vm341_vm2, %v368_v59, %v370_v19  ;;  %v372_v59 = vrot.slane %v6043_v58, 1 }
  0x24   : > { %8619 = vst [vmem:[#allocation16_spill] sm:$0xff] %v5961_v26  ;;  %v6040_v35 = vsel %vm341_vm2, %v408_v61, %v410_v20  ;;  %v373_v61 = vrot.slane %v6046_v60, 1 }
  0x25   : > { %8620 = vst [vmem:[#allocation17_spill] sm:$0xff] %v5966_v27 }
  0x26   : > { %5037 = vmatmul.msk.f32.gmra.mxu0 %vm424_vm1, %v5805_v30  ;;  %5053 = vmatmul.msk.f32.gmra.mxu2 %vm424_vm1, %v5810_v31  ;;  %8621 = vst [vmem:[#allocation18_spill] sm:$0xff] %v5972_v29 }
  0x27   : > { %8622 = vst [vmem:[#allocation19_spill] sm:$0xff] %v5983_v42 }
  0x28   : > { %8623 = vst [vmem:[#allocation20_spill] sm:$0xff] %v5988_v43 }
  0x29   : > { %8624 = vst [vmem:[#allocation21_spill] sm:$0xff] %v5997_v50 }
  0x2a   : > { %5087 = vmatmul.msk.f32.gmra.mxu3 %vm424_vm1, %v5793_v25  ;;  %8625 = vst [vmem:[#allocation22_spill] sm:$0xff] %v6000_v51 }
  0x2b   : > { %5071 = vmatmul.msk.f32.gmra.mxu1 %vm424_vm1, %v5787_v23  ;;  %8626 = vst [vmem:[#allocation23_spill] sm:$0xff] %v6013_v2 }
  0x2c   : > { %8627 = vst [vmem:[#allocation24_spill] sm:$0xff] %v6018_v3 }
  0x2d   : > { %8628 = vst [vmem:[#allocation25_spill] sm:$0xff] %v6024_v18  ;;  %v6052_v18 = vld [vmem:[%s5738_s29 + $0x158] sm:$0xff] }
  0x2e   : > { %5038 = vmatmul.msk.f32.gmra.mxu0 %vm424_vm1, %v5827_v36  ;;  %5054 = vmatmul.msk.f32.gmra.mxu2 %vm424_vm1, %v5832_v37  ;;  %8629 = vst [vmem:[#allocation26_spill] sm:$0xff] %v6035_v34  ;;  %v413_v20 = vrot.slane %v6052_v18, 1 }
  0x2f   : > { %8630 = vst [vmem:[#allocation27_spill] sm:$0xff] %v6040_v35 }
  0x30   : > { %8632 = vst [vmem:[#allocation29_spill] sm:$0xff] %v6052_v18 }
  0x32   : > { %5088 = vmatmul.msk.f32.gmra.mxu3 %vm424_vm1, %v5841_v40 }
  0x33   : > { %5072 = vmatmul.msk.f32.gmra.mxu1 %vm424_vm1, %v5835_v38 }
  0x36   : > { %5039 = vmatmul.msk.f32.gmra.mxu0 %vm424_vm1, %v5857_v46  ;;  %5055 = vmatmul.msk.f32.gmra.mxu2 %vm424_vm1, %v5862_v47 }
  0x3a   : > { %5089 = vmatmul.msk.f32.gmra.mxu3 %vm424_vm1, %v5844_v41 }
  0x3b   : > { %5073 = vmatmul.msk.f32.gmra.mxu1 %vm424_vm1, %v5838_v39 }
  0x3e   : > { %5040 = vmatmul.msk.f32.gmra.mxu0 %vm424_vm1, %v5879_v52  ;;  %5056 = vmatmul.msk.f32.gmra.mxu2 %vm424_vm1, %v5884_v53 }
  0x42   : > { %5090 = vmatmul.msk.f32.gmra.mxu3 %vm424_vm1, %v5893_v56 }
  0x43   : > { %5074 = vmatmul.msk.f32.gmra.mxu1 %vm424_vm1, %v5887_v54 }
  0x46   : > { %5041 = vmatmul.msk.f32.gmra.mxu0 %vm424_vm1, %v5909_v62  ;;  %5057 = vmatmul.msk.f32.gmra.mxu2 %vm424_vm1, %v5914_v63  ;;  %v6137_v63 = vld [vmem:[%s5738_s29 + $0x178] sm:$0x3] }
  0x47   : > { %8642 = vst [vmem:[#allocation39_spill] sm:$0xff] %v6137_v63 }
  0x4a   : > { %5091 = vmatmul.msk.f32.gmra.mxu3 %vm424_vm1, %v5896_v57 }
  0x4b   : > { %5075 = vmatmul.msk.f32.gmra.mxu1 %vm424_vm1, %v5890_v55 }
  0x4e   : > { %5042 = vmatmul.msk.f32.gmra.mxu0 %vm424_vm1, %v5931_v4  ;;  %5058 = vmatmul.msk.f32.gmra.mxu2 %vm424_vm1, %v5936_v5  ;;  %v6100_v5 = vld [vmem:[%s5738_s29 + $0xa8] sm:$0xff] }
  0x52   : > { %5092 = vmatmul.msk.f32.gmra.mxu3 %vm424_vm1, %v5945_v12  ;;  %v6134_v12 = vld [vmem:[%s5738_s29 + $0xb8] sm:$0x3] }
  0x53   : > { %5076 = vmatmul.msk.f32.gmra.mxu1 %vm424_vm1, %v5939_v9 }
  0x56   : > { %5043 = vmatmul.msk.f32.gmra.mxu0 %vm424_vm1, %v5961_v26  ;;  %5059 = vmatmul.msk.f32.gmra.mxu2 %vm424_vm1, %v5966_v27 }
  0x5a   : > { %5093 = vmatmul.msk.f32.gmra.mxu3 %vm424_vm1, %v5948_v13 }
  0x5b   : > { %5077 = vmatmul.msk.f32.gmra.mxu1 %vm424_vm1, %v5942_v10 }
  0x5e   : > { %5044 = vmatmul.msk.f32.gmra.mxu0 %vm424_vm1, %v5983_v42  ;;  %5060 = vmatmul.msk.f32.gmra.mxu2 %vm424_vm1, %v5988_v43  ;;  %v6065_v43 = vsel %vm341_vm2, %v372_v59, %v373_v61 }
  0x5f   : > { %8633 = vst [vmem:[#allocation30_spill] sm:$0xff] %v6065_v43 }
  0x62   : > { %5094 = vmatmul.msk.f32.gmra.mxu3 %vm424_vm1, %v5997_v50  ;;  %v6076_v50 = vld [vmem:[%s5738_s29 + $0x160] sm:$0x3] }
  0x63   : > { %5078 = vmatmul.msk.f32.gmra.mxu1 %vm424_vm1, %v5991_v44  ;;  %8635 = vst [vmem:[#allocation32_spill] sm:$0xff] %v6076_v50 }
  0x66   : > { %5045 = vmatmul.msk.f32.gmra.mxu0 %vm424_vm1, %v6013_v2  ;;  %5061 = vmatmul.msk.f32.gmra.mxu2 %vm424_vm1, %v6018_v3  ;;  %v6049_v3 = vld [vmem:[%s5738_s29 + $0x150] sm:$0xff] }
  0x67   : > { %8631 = vst [vmem:[#allocation28_spill] sm:$0xff] %v6049_v3  ;;  %v412_v19 = vrot.slane %v6049_v3, 1 }
  0x6a   : > { %5095 = vmatmul.msk.f32.gmra.mxu3 %vm424_vm1, %v6000_v51  ;;  %v6073_v51 = vld [vmem:[%s5738_s29 + $0xa0] sm:$0x3] }
  0x6b   : > { %5079 = vmatmul.msk.f32.gmra.mxu1 %vm424_vm1, %v5994_v45  ;;  %v375_v59 = vrot.slane %v6073_v51, 1 }
  0x6d   : > { %v6092_v29 = vsel %vm341_vm2, %v373_v61, %v375_v59  ;;  %v377_v61 = vrot.slane %v6100_v5, 1 }
  0x6e   : > { %5046 = vmatmul.msk.f32.gmra.mxu0 %vm424_vm1, %v6035_v34  ;;  %5062 = vmatmul.msk.f32.gmra.mxu2 %vm424_vm1, %v6040_v35  ;;  %v6070_v35 = vsel %vm341_vm2, %v412_v19, %v413_v20  ;;  %v282_v19 = vld [vmem:[%s8505_s1 + $0x18] sm:$0xff]  ;;  %8636 = vst [vmem:[#allocation33_spill] sm:$0xff] %v6092_v29 }
  0x6f   : > { %8634 = vst [vmem:[#allocation31_spill] sm:$0xff] %v6070_v35  ;;  %5232 = vmatpush.msk.msra.mxu2 %vm489_vm0, %v282_v19  ;;  %v1706_v27 = vrot.slane %v282_v19, 4  ;;  %v6106_v19 = vld [vmem:[%s5738_s29 + $0x168] sm:$0xff] }
  0x70   : > { %8638 = vst [vmem:[#allocation35_spill] sm:$0xff] %v6106_v19  ;;  %v417_v59 = vrot.slane %v6106_v19, 1 }
  0x71   : > { %5265 = vmatpush.msk.msra.mxu3 %vm489_vm0, %v1706_v27  ;;  %v6109_v27 = vld [vmem:[%s5738_s29 + $0x170] sm:$0xff] }
  0x72   : > { %5096 = vmatmul.msk.f32.gmra.mxu3 %vm424_vm1, %v6049_v3  ;;  %v415_v3 = vrot.slane %v6076_v50, 1  ;;  %v6103_v50 = vld [vmem:[%s5738_s29 + $0xb0] sm:$0xff]  ;;  %8639 = vst [vmem:[#allocation36_spill] sm:$0xff] %v6109_v27 }
  0x73   : > { %5080 = vmatmul.msk.f32.gmra.mxu1 %vm424_vm1, %v6043_v58 }
  0x76   : > { %5047 = vmatmul.msk.f32.gmra.mxu0 %vm424_vm1, %v6065_v43  ;;  %5063 = vmatmul.msk.f32.gmra.mxu2 %vm424_vm1, %v6070_v35  ;;  %v6097_v35 = vsel %vm341_vm2, %v413_v20, %v415_v3  ;;  %v378_v3 = vrot.slane %v6103_v50, 1  ;;  %v283_v20 = vld [vmem:[%s8505_s1 + $0x20] sm:$0xf] }
  0x77   : > { %8637 = vst [vmem:[#allocation34_spill] sm:$0xff] %v6097_v35  ;;  %5298 = vmatpush.msk.msra.mxu0 %vm489_vm0, %v283_v20  ;;  %v380_v20 = vrot.slane %v6134_v12, 1 }
  0x78   : > { %v6126_v13 = vsel %vm341_vm2, %v377_v61, %v378_v3  ;;  %v420_v61 = vrot.slane %v6137_v63, 1 }
  0x79   : > { %8640 = vst [vmem:[#allocation37_spill] sm:$0xff] %v6126_v13 }
  0x7a   : > { %5097 = vmatmul.msk.f32.gmra.mxu3 %vm424_vm1, %v6052_v18  ;;  %v418_v18 = vrot.slane %v6109_v27, 1 }
  0x7b   : > { %5081 = vmatmul.msk.f32.gmra.mxu1 %vm424_vm1, %v6046_v60 }
  0x7e   : > { %5048 = vmatmul.msk.f32.gmra.mxu0 %vm424_vm1, %v6092_v29  ;;  %5064 = vmatmul.msk.f32.gmra.mxu2 %vm424_vm1, %v6097_v35  ;;  %v6131_v35 = vsel %vm341_vm2, %v417_v59, %v418_v18  ;;  %v6148_v59 = vsel %vm341_vm2, %v378_v3, %v380_v20  ;;  %v785_v3 = vrot.slane %v5744_v7, 2  ;;  %v786_v20 = vrot.slane %v5747_v8, 2 }
  0x7f   : > { %8641 = vst [vmem:[#allocation38_spill] sm:$0xff] %v6131_v35  ;;  %v788_v7 = vrot.slane %v5761_v14, 2  ;;  %v796_v14 = vrot.slane %v5838_v39, 2 }
  0x80   : > { %8643 = vst [vmem:[#allocation40_spill] sm:$0xff] %v6148_v59 }
  0x82   : > { %5098 = vmatmul.msk.f32.gmra.mxu3 %vm424_vm1, %v6106_v19  ;;  %v6153_v19 = vsel %vm341_vm2, %v418_v18, %v420_v61 }
  0x83   : > { %5082 = vmatmul.msk.f32.gmra.mxu1 %vm424_vm1, %v6100_v5  ;;  %8644 = vst [vmem:[#allocation41_spill] sm:$0xff] %v6153_v19 }
  0x86   : > { %5049 = vmatmul.msk.f32.gmra.mxu0 %vm424_vm1, %v6126_v13  ;;  %5065 = vmatmul.msk.f32.gmra.mxu2 %vm424_vm1, %v6131_v35  ;;  %v791_v35 = vrot.slane %v5787_v23, 2 }
  0x88   : > { %v792_v18 = vsel %vm784_vm3, %v790_v1, %v791_v35 }
  0x8a   : > { %5099 = vmatmul.msk.f32.gmra.mxu3 %vm424_vm1, %v6109_v27  ;;  %v787_v27 = vsel %vm784_vm3, %v785_v3, %v786_v20 }
  0x8b   : > { %5083 = vmatmul.msk.f32.gmra.mxu1 %vm424_vm1, %v6103_v50 }
  0x8e   : > { %5050 = vmatmul.msk.f32.gmra.mxu0 %vm424_vm1, %v6148_v59  ;;  %5066 = vmatmul.msk.f32.gmra.mxu2 %vm424_vm1, %v6153_v19  ;;  %v793_v19 = vrot.slane %v5813_v32, 2  ;;  %v795_v32 = vrot.slane %v5835_v38, 2 }
  0x90   : > { %v6163_v63 = vpop.f32.mrf.mxu1  ;;  %v794_v1 = vsel %vm784_vm3, %v791_v35, %v793_v19 }
  0x92   : > { %5134 = vmatmul.msk.f32.vlgmr.msrb.gmra.mxu3 %vm424_vm1, %v5784_v22 }
  0x93   : > { %v6166_v61 = vpop.f32.mrf.mxu0  ;;  %5200 = vmatmul.msk.f32.vlgmr.msrb.gmra.mxu1 %vm424_vm1, %v792_v18 }
  0x95   : > { %v736_v53 = vpop.f32.mrf.mxu3 }
  0x96   : > { %5167 = vmatmul.msk.f32.vlgmr.msrb.gmra.mxu0 %vm424_vm1, %v5805_v30  ;;  %5101 = vmatmul.msk.f32.vlgmr.msrb.gmra.mxu2 %vm424_vm1, %v787_v27  ;;  %v789_v30 = vsel %vm784_vm3, %v786_v20, %v788_v7 }
  0x98   : > { %v6177_v8 = vpop.f32.mrf.mxu1 }
  0x99   : > { %v557_v57 = vpop.f32.mrf.mxu2 }
  0x9a   : > { %v6180_v22 = vadd.f32 %v736_v53, %v557_v57  ;;  %5135 = vmatmul.msk.f32.gmra.mxu3 %vm424_vm1, %v5787_v23  ;;  %v6196_v57 = vsel %vm784_vm3, %v795_v32, %v796_v14 }
  0x9b   : > { %v6182_v56 = vpop.f32.mrf.mxu0  ;;  %5201 = vmatmul.msk.f32.gmra.mxu1 %vm424_vm1, %v794_v1 }
  0x9d   : > { %v739_v27 = vpop.f32.mrf.mxu3 }
  0x9e   : > { %5168 = vmatmul.msk.f32.gmra.mxu0 %vm424_vm1, %v5827_v36  ;;  %5102 = vmatmul.msk.f32.gmra.mxu2 %vm424_vm1, %v789_v30  ;;  %v798_v36 = vrot.slane %v5865_v48, 2  ;;  %v800_v48 = vrot.slane %v5887_v54, 2 }
  0xa0   : > { %v6193_v53 = vpop.f32.mrf.mxu1  ;;  %v6213_v7 = vsel %vm784_vm3, %v796_v14, %v798_v36 }
  0xa1   : > { %v560_v23 = vpop.f32.mrf.mxu2 }
  0xa2   : > { %v6198_v35 = vadd.f32 %v739_v27, %v560_v23  ;;  %5136 = vmatmul.msk.f32.gmra.mxu3 %vm424_vm1, %v5835_v38 }
  0xa3   : > { %v6200_v19 = vpop.f32.mrf.mxu0  ;;  %5202 = vmatmul.msk.f32.gmra.mxu1 %vm424_vm1, %v6196_v57 }
  0xa5   : > { %v742_v3 = vpop.f32.mrf.mxu3 }
  0xa6   : > { %5169 = vmatmul.msk.f32.gmra.mxu0 %vm424_vm1, %v5857_v46  ;;  %5103 = vmatmul.msk.f32.gmra.mxu2 %vm424_vm1, %v792_v18  ;;  %v801_v18 = vrot.slane %v5890_v55, 2 }
  0xa8   : > { %v6210_v20 = vpop.f32.mrf.mxu1  ;;  %v6231_v23 = vsel %vm784_vm3, %v800_v48, %v801_v18 }
  0xa9   : > { %v563_v30 = vpop.f32.mrf.mxu2  ;;  %8646 = vst [vmem:[#allocation43_spill] sm:$0xff] %v6231_v23 }
  0xaa   : > { %v6215_v32 = vadd.f32 %v742_v3, %v563_v30  ;;  %5137 = vmatmul.msk.f32.gmra.mxu3 %vm424_vm1, %v5838_v39  ;;  %v803_v30 = vrot.slane %v5917_v0, 2  ;;  %v805_v0 = vrot.slane %v5939_v9, 2 }
  0xab   : > { %v6217_v38 = vpop.f32.mrf.mxu0  ;;  %5203 = vmatmul.msk.f32.gmra.mxu1 %vm424_vm1, %v6213_v7 }
  0xac   : > { %8645 = vst [vmem:[#allocation42_spill] sm:$0xff] %v6215_v32  ;;  %v6249_v48 = vsel %vm784_vm3, %v801_v18, %v803_v30 }
  0xad   : > { %v745_v27 = vpop.f32.mrf.mxu3 }
  0xae   : > { %5170 = vmatmul.msk.f32.gmra.mxu0 %vm424_vm1, %v5879_v52  ;;  %5104 = vmatmul.msk.f32.gmra.mxu2 %vm424_vm1, %v794_v1 }
  0xb0   : > { %v6228_v14 = vpop.f32.mrf.mxu1 }
  0xb1   : > { %v566_v36 = vpop.f32.mrf.mxu2 }
  0xb2   : > { %v6233_v39 = vadd.f32 %v745_v27, %v566_v36  ;;  %5138 = vmatmul.msk.f32.gmra.mxu3 %vm424_vm1, %v5887_v54 }
  0xb3   : > { %v6235_v3 = vpop.f32.mrf.mxu0  ;;  %5204 = vmatmul.msk.f32.gmra.mxu1 %vm424_vm1, %v6231_v23 }
  0xb4   : > { %8647 = vst [vmem:[#allocation44_spill] sm:$0xff] %v6233_v39  ;;  %v806_v39 = vrot.slane %v5942_v10, 2 }
  0xb5   : > { %v748_v32 = vpop.f32.mrf.mxu3 }
  0xb6   : > { %5171 = vmatmul.msk.f32.gmra.mxu0 %vm424_vm1, %v5909_v62  ;;  %5105 = vmatmul.msk.f32.gmra.mxu2 %vm424_vm1, %v6196_v57  ;;  %v6268_v18 = vsel %vm784_vm3, %v805_v0, %v806_v39 }
  0xb7   : > { %8649 = vst [vmem:[#allocation46_spill] sm:$0xff] %v6268_v18 }
  0xb8   : > { %v6246_v1 = vpop.f32.mrf.mxu1 }
  0xb9   : > { %v569_v27 = vpop.f32.mrf.mxu2 }
  0xba   : > { %v6251_v36 = vadd.f32 %v748_v32, %v569_v27  ;;  %5139 = vmatmul.msk.f32.gmra.mxu3 %vm424_vm1, %v5890_v55 }
  0xbb   : > { %v6253_v54 = vpop.f32.mrf.mxu0  ;;  %5205 = vmatmul.msk.f32.gmra.mxu1 %vm424_vm1, %v6249_v48 }
  0xbc   : > { %8648 = vst [vmem:[#allocation45_spill] sm:$0xff] %v6251_v36  ;;  %v808_v36 = vrot.slane %v5969_v28, 2  ;;  %v810_v28 = vrot.slane %v5991_v44, 2 }
  0xbd   : > { %v751_v62 = vpop.f32.mrf.mxu3 }
  0xbe   : > { %5172 = vmatmul.msk.f32.gmra.mxu0 %vm424_vm1, %v5931_v4  ;;  %5106 = vmatmul.msk.f32.gmra.mxu2 %vm424_vm1, %v6213_v7 }
  0xc0   : > { %v6265_v32 = vpop.f32.mrf.mxu1 }
  0xc1   : > { %v572_v55 = vpop.f32.mrf.mxu2 }
  0xc2   : > { %v6270_v30 = vadd.f32 %v751_v62, %v572_v55  ;;  %5140 = vmatmul.msk.f32.gmra.mxu3 %vm424_vm1, %v5939_v9  ;;  %v6286_v62 = vsel %vm784_vm3, %v806_v39, %v808_v36 }
  0xc3   : > { %v6272_v27 = vpop.f32.mrf.mxu0  ;;  %5206 = vmatmul.msk.f32.gmra.mxu1 %vm424_vm1, %v6268_v18 }
  0xc4   : > { %8650 = vst [vmem:[#allocation47_spill] sm:$0xff] %v6270_v30 }
  0xc5   : > { %v754_v4 = vpop.f32.mrf.mxu3 }
  0xc6   : > { %5173 = vmatmul.msk.f32.gmra.mxu0 %vm424_vm1, %v5961_v26  ;;  %5107 = vmatmul.msk.f32.gmra.mxu2 %vm424_vm1, %v6231_v23  ;;  %v811_v26 = vrot.slane %v5994_v45, 2 }
  0xc8   : > { %v6283_v0 = vpop.f32.mrf.mxu1  ;;  %v6305_v39 = vsel %vm784_vm3, %v810_v28, %v811_v26 }
  0xc9   : > { %v575_v55 = vpop.f32.mrf.mxu2  ;;  %8652 = vst [vmem:[#allocation49_spill] sm:$0xff] %v6305_v39 }
  0xca   : > { %v6288_v30 = vadd.f32 %v754_v4, %v575_v55  ;;  %5141 = vmatmul.msk.f32.gmra.mxu3 %vm424_vm1, %v5942_v10 }
  0xcb   : > { %v6290_v9 = vpop.f32.mrf.mxu0  ;;  %5207 = vmatmul.msk.f32.gmra.mxu1 %vm424_vm1, %v6286_v62 }
  0xcc   : > { %8651 = vst [vmem:[#allocation48_spill] sm:$0xff] %v6288_v30  ;;  %v813_v30 = vrot.slane %v6021_v15, 2  ;;  %v815_v15 = vrot.slane %v6043_v58, 2 }
  0xcd   : > { %v757_v23 = vpop.f32.mrf.mxu3 }
  0xce   : > { %5174 = vmatmul.msk.f32.gmra.mxu0 %vm424_vm1, %v5983_v42  ;;  %5108 = vmatmul.msk.f32.gmra.mxu2 %vm424_vm1, %v6249_v48 }
  0xd0   : > { %v6302_v4 = vpop.f32.mrf.mxu1 }
  0xd1   : > { %v578_v10 = vpop.f32.mrf.mxu2 }
  0xd2   : > { %v6307_v36 = vadd.f32 %v757_v23, %v578_v10  ;;  %5142 = vmatmul.msk.f32.gmra.mxu3 %vm424_vm1, %v5991_v44  ;;  %v6323_v23 = vsel %vm784_vm3, %v811_v26, %v813_v30 }
  0xd3   : > { %v6309_v55 = vpop.f32.mrf.mxu0  ;;  %5208 = vmatmul.msk.f32.gmra.mxu1 %vm424_vm1, %v6305_v39 }
  0xd4   : > { %8653 = vst [vmem:[#allocation50_spill] sm:$0xff] %v6307_v36 }
  0xd5   : > { %v760_v42 = vpop.f32.mrf.mxu3 }
  0xd6   : > { %5175 = vmatmul.msk.f32.gmra.mxu0 %vm424_vm1, %v6013_v2  ;;  %5109 = vmatmul.msk.f32.gmra.mxu2 %vm424_vm1, %v6268_v18  ;;  %v816_v2 = vrot.slane %v6046_v60, 2 }
  0xd8   : > { %v6320_v28 = vpop.f32.mrf.mxu1 }
  0xd9   : > { %v581_v10 = vpop.f32.mrf.mxu2 }
  0xda   : > { %v6325_v36 = vadd.f32 %v760_v42, %v581_v10  ;;  %5143 = vmatmul.msk.f32.gmra.mxu3 %vm424_vm1, %v5994_v45  ;;  %v6342_v42 = vsel %vm784_vm3, %v815_v15, %v816_v2 }
  0xdb   : > { %v6327_v44 = vpop.f32.mrf.mxu0  ;;  %5209 = vmatmul.msk.f32.gmra.mxu1 %vm424_vm1, %v6323_v23  ;;  %8655 = vst [vmem:[#allocation52_spill] sm:$0xff] %v6342_v42 }
  0xdc   : > { %8654 = vst [vmem:[#allocation51_spill] sm:$0xff] %v6325_v36  ;;  %v818_v36 = vrot.slane %v6073_v51, 2  ;;  %v820_v51 = vrot.slane %v6100_v5, 2 }
  0xdd   : > { %v763_v18 = vpop.f32.mrf.mxu3 }
  0xde   : > { %5176 = vmatmul.msk.f32.gmra.mxu0 %vm424_vm1, %v6035_v34  ;;  %5110 = vmatmul.msk.f32.gmra.mxu2 %vm424_vm1, %v6286_v62 }
  0xe0   : > { %v6339_v26 = vpop.f32.mrf.mxu1 }
  0xe1   : > { %v584_v45 = vpop.f32.mrf.mxu2 }
  0xe2   : > { %v6344_v30 = vadd.f32 %v763_v18, %v584_v45  ;;  %5144 = vmatmul.msk.f32.gmra.mxu3 %vm424_vm1, %v6043_v58  ;;  %v6360_v18 = vsel %vm784_vm3, %v816_v2, %v818_v36 }
  0xe3   : > { %v6346_v10 = vpop.f32.mrf.mxu0  ;;  %5210 = vmatmul.msk.f32.gmra.mxu1 %vm424_vm1, %v6342_v42 }
  0xe4   : > { %8656 = vst [vmem:[#allocation53_spill] sm:$0xff] %v6344_v30 }
  0xe5   : > { %v766_v34 = vpop.f32.mrf.mxu3 }
  0xe6   : > { %5177 = vmatmul.msk.f32.gmra.mxu0 %vm424_vm1, %v6065_v43  ;;  %5111 = vmatmul.msk.f32.gmra.mxu2 %vm424_vm1, %v6305_v39  ;;  %v821_v43 = vrot.slane %v6103_v50, 2 }
  0xe8   : > { %v6357_v15 = vpop.f32.mrf.mxu1 }
  0xe9   : > { %v587_v45 = vpop.f32.mrf.mxu2 }
  0xea   : > { %v6362_v30 = vadd.f32 %v766_v34, %v587_v45  ;;  %5145 = vmatmul.msk.f32.gmra.mxu3 %vm424_vm1, %v6046_v60  ;;  %v6379_v34 = vsel %vm784_vm3, %v820_v51, %v821_v43 }
  0xeb   : > { %v6364_v58 = vpop.f32.mrf.mxu0  ;;  %5211 = vmatmul.msk.f32.gmra.mxu1 %vm424_vm1, %v6360_v18  ;;  %8658 = vst [vmem:[#allocation55_spill] sm:$0xff] %v6379_v34 }
  0xec   : > { %8657 = vst [vmem:[#allocation54_spill] sm:$0xff] %v6362_v30  ;;  %v823_v30 = vrot.slane %v6134_v12, 2  ;;  %v825_v12 = vrot.slane %v5741_v6, 2 }
  0xed   : > { %v769_v39 = vpop.f32.mrf.mxu3 }
  0xee   : > { %5178 = vmatmul.msk.f32.gmra.mxu0 %vm424_vm1, %v6092_v29  ;;  %5112 = vmatmul.msk.f32.gmra.mxu2 %vm424_vm1, %v6323_v23 }
  0xf0   : > { %v6376_v2 = vpop.f32.mrf.mxu1 }
  0xf1   : > { %v590_v60 = vpop.f32.mrf.mxu2 }
  0xf2   : > { %v6381_v36 = vadd.f32 %v769_v39, %v590_v60  ;;  %5146 = vmatmul.msk.f32.gmra.mxu3 %vm424_vm1, %v6100_v5  ;;  %v6397_v39 = vsel %vm784_vm3, %v821_v43, %v823_v30  ;;  %v285_v43 = vld [vmem:[%s8507_s3 + $0x8] sm:$0xff] }
  0xf3   : > { %v6383_v45 = vpop.f32.mrf.mxu0  ;;  %5212 = vmatmul.msk.f32.gmra.mxu1 %vm424_vm1, %v6379_v34  ;;  %8660 = vst [vmem:[#allocation57_spill] sm:$0xff] %v6397_v39 }
  0xf4   : > { %8659 = vst [vmem:[#allocation56_spill] sm:$0xff] %v6381_v36  ;;  %2428 = vmatpush.msra.mxu1 %v285_v43  ;;  %v828_v43 = vrot.slane %v5765_v16, 2  ;;  %v830_v16 = vrot.slane %v5790_v24, 2 }
  0xf5   : > { %v772_v29 = vpop.f32.mrf.mxu3 }
  0xf6   : > { %5179 = vmatmul.msk.f32.gmra.mxu0 %vm424_vm1, %v6126_v13  ;;  %5113 = vmatmul.msk.f32.gmra.mxu2 %vm424_vm1, %v6342_v42  ;;  %v826_v13 = vrot.slane %v5754_v11, 2 }
  0xf8   : > { %v6394_v51 = vpop.f32.mrf.mxu1 }
  0xf9   : > { %v593_v60 = vpop.f32.mrf.mxu2 }
  0xfa   : > { %v6399_v36 = vadd.f32 %v772_v29, %v593_v60  ;;  %5147 = vmatmul.msk.f32.gmra.mxu3 %vm424_vm1, %v6103_v50  ;;  %v6419_v50 = vsel %vm784_vm3, %v825_v12, %v826_v13 }
  0xfb   : > { %v6401_v5 = vpop.f32.mrf.mxu0  ;;  %5213 = vmatmul.msk.f32.gmra.mxu1 %vm424_vm1, %v6397_v39  ;;  %8662 = vst [vmem:[#allocation59_spill] sm:$0xff] %v6419_v50 }
  0xfc   : > { %8661 = vst [vmem:[#allocation58_spill] sm:$0xff] %v6399_v36 }
  0xfd   : > { %v775_v30 = vpop.f32.mrf.mxu3 }
  0xfe   : > { %5180 = vmatmul.msk.f32.gmra.mxu0 %vm424_vm1, %v6148_v59  ;;  %5114 = vmatmul.msk.f32.gmra.mxu2 %vm424_vm1, %v6360_v18 }
 0x100   : > { %v6416_v29 = vpop.f32.mrf.mxu1 }
 0x101   : > { %v596_v60 = vpop.f32.mrf.mxu2 }
 0x102   : > { %v6421_v36 = vadd.f32 %v775_v30, %v596_v60  ;;  %5148 = vmatmul.msk.f32.gmra.mxu3 %vm424_vm1, %v5741_v6  ;;  %v6437_v30 = vsel %vm784_vm3, %v826_v13, %v828_v43 }
 0x103   : > { %v6423_v42 = vpop.f32.mrf.mxu0  ;;  %5214 = vmatmul.msk.f32.gmra.mxu1 %vm424_vm1, %v6419_v50 }
 0x104   : > { %8663 = vst [vmem:[#allocation60_spill] sm:$0xff] %v6421_v36 }
 0x105   : > { %v778_v59 = vpop.f32.mrf.mxu3 }
 0x106   : > { %5181 = vmatmul.msk.f32.gmra.mxu0 %vm424_vm1, %v5769_v17  ;;  %5115 = vmatmul.msk.f32.gmra.mxu2 %vm424_vm1, %v6379_v34  ;;  %v831_v17 = vrot.slane %v5793_v25, 2 }
 0x108   : > { %v6434_v12 = vpop.f32.mrf.mxu1 }
 0x109   : > { %v599_v60 = vpop.f32.mrf.mxu2 }
 0x10a   : > { %v6439_v36 = vadd.f32 %v778_v59, %v599_v60  ;;  %5149 = vmatmul.msk.f32.gmra.mxu3 %vm424_vm1, %v5754_v11  ;;  %v6454_v59 = vsel %vm784_vm3, %v830_v16, %v831_v17 }
 0x10b   : > { %v6441_v6 = vpop.f32.mrf.mxu0  ;;  %5215 = vmatmul.msk.f32.gmra.mxu1 %vm424_vm1, %v6437_v30 }
 0x10c   : > { %8664 = vst [vmem:[#allocation61_spill] sm:$0xff] %v6439_v36  ;;  %v833_v36 = vrot.slane %v5816_v33, 2 }
 0x10d   : > { %v781_v34 = vpop.f32.mrf.mxu3 }
 0x10e   : > { %5182 = vmatmul.msk.f32.gmra.mxu0 %vm424_vm1, %v5781_v21  ;;  %5116 = vmatmul.msk.f32.gmra.mxu2 %vm424_vm1, %v6397_v39  ;;  %v6468_v16 = vsel %vm784_vm3, %v831_v17, %v833_v36 }
 0x110   : > { %v1418_v13 = vpop.f32.mrf.mxu1 }
 0x111   : > { %v602_v43 = vpop.f32.mrf.mxu2 }
 0x112   : > { %v6456_v11 = vadd.f32 %v781_v34, %v602_v43  ;;  %5150 = vmatmul.msk.f32.gmra.mxu3 %vm424_vm1, %v5790_v24  ;;  %v689_v34 = vadd.f32 %v6163_v63, %v6166_v61 }
 0x113   : > { %v1261_v60 = vpop.f32.mrf.mxu0  ;;  %5216 = vmatmul.msk.f32.gmra.mxu1 %vm424_vm1, %v6454_v59 }
 0x114   : > { %8665 = vst [vmem:[#allocation62_spill] sm:$0xff] %v6456_v11 }
 0x115   : > { %v1103_v21 = vpop.f32.mrf.mxu3 }
 0x116   : > { %5183 = vmatmul.msk.f32.gmra.mxu0 %vm424_vm1, %v5810_v31  ;;  %5117 = vmatmul.msk.f32.gmra.mxu2 %vm424_vm1, %v6419_v50  ;;  %v835_v31 = vrot.slane %v5841_v40, 2  ;;  %v836_v50 = vrot.slane %v5844_v41, 2 }
 0x118   : > { %v1421_v43 = vpop.f32.mrf.mxu1  ;;  %v6483_v61 = vsel %vm784_vm3, %v835_v31, %v836_v50 }
 0x119   : > { %v949_v24 = vpop.f32.mrf.mxu2 }
 0x11a   : > { %v1045_v11 = vadd.f32 %v949_v24, %v689_v34  ;;  %5151 = vmatmul.msk.f32.gmra.mxu3 %vm424_vm1, %v5793_v25  ;;  %v692_v25 = vadd.f32 %v6177_v8, %v6182_v56 }
 0x11b   : > { %v1264_v33 = vpop.f32.mrf.mxu0  ;;  %5217 = vmatmul.msk.f32.gmra.mxu1 %vm424_vm1, %v6468_v16 }
 0x11c   : > { %v1199_v39 = vadd.f32 %v1103_v21, %v1045_v11 }
 0x11d   : > { %v1106_v17 = vpop.f32.mrf.mxu3 }
 0x11e   : > { %5184 = vmatmul.msk.f32.gmra.mxu0 %vm424_vm1, %v5832_v37  ;;  %5118 = vmatmul.msk.f32.gmra.mxu2 %vm424_vm1, %v6437_v30  ;;  %v1357_v63 = vadd.f32 %v1261_v60, %v1199_v39  ;;  %v838_v39 = vrot.slane %v5868_v49, 2 }
 0x120   : > { %v6487_v36 = vadd.f32 %v1418_v13, %v1357_v63  ;;  %v1424_v11 = vpop.f32.mrf.mxu1  ;;  %v6499_v8 = vsel %vm784_vm3, %v836_v50, %v838_v39 }
 0x121   : > { %v952_v34 = vpop.f32.mrf.mxu2 }
 0x122   : > { %v1046_v24 = vadd.f32 %v952_v34, %v692_v25  ;;  %5152 = vmatmul.msk.f32.gmra.mxu3 %vm424_vm1, %v5841_v40  ;;  %v695_v40 = vadd.f32 %v6193_v53, %v6200_v19 }
 0x123   : > { %v1267_v21 = vpop.f32.mrf.mxu0  ;;  %5218 = vmatmul.msk.f32.gmra.mxu1 %vm424_vm1, %v6483_v61 }
 0x124   : > { %v1200_v60 = vadd.f32 %v1106_v17, %v1046_v24  ;;  %v8667_v17 = vld [vmem:[#allocation7_spill] sm:$0xff] }
 0x125   : > { %v1109_v31 = vpop.f32.mrf.mxu3  ;;  %v840_v34 = vrot.slane %v8667_v17, 2 }
 0x126   : > { %5185 = vmatmul.msk.f32.gmra.mxu0 %vm424_vm1, %v5862_v47  ;;  %5119 = vmatmul.msk.f32.gmra.mxu2 %vm424_vm1, %v6454_v59  ;;  %v1358_v56 = vadd.f32 %v1264_v33, %v1200_v60  ;;  %v8668_v33 = vld [vmem:[#allocation8_spill] sm:$0xff]  ;;  %v8669_v60 = vld [vmem:[#allocation6_spill] sm:$0xff] }
 0x127   : > { %v841_v24 = vrot.slane %v8668_v33, 2 }
 0x128   : > { %v6503_v13 = vadd.f32 %v1421_v43, %v1358_v56  ;;  %v1427_v53 = vpop.f32.mrf.mxu1  ;;  %v698_v43 = vadd.f32 %v6210_v20, %v6217_v38 }
 0x129   : > { %v955_v63 = vpop.f32.mrf.mxu2 }
 0x12a   : > { %8666 = vst [vmem:[#allocation63_spill] sm:$0xff] %v6503_v13  ;;  %v1047_v25 = vadd.f32 %v955_v63, %v695_v40  ;;  %5153 = vmatmul.msk.f32.gmra.mxu3 %vm424_vm1, %v5844_v41  ;;  %v6516_v41 = vsel %vm784_vm3, %v840_v34, %v841_v24  ;;  %v8672_v34 = vld [vmem:[#allocation10_spill] sm:$0xff] }
 0x12b   : > { %v1270_v49 = vpop.f32.mrf.mxu0  ;;  %5219 = vmatmul.msk.f32.gmra.mxu1 %vm424_vm1, %v6499_v8 }
 0x12c   : > { %v1201_v50 = vadd.f32 %v1109_v31, %v1047_v25  ;;  %v8671_v25 = vld [vmem:[#allocation11_spill] sm:$0xff] }
 0x12d   : > { %v1112_v39 = vpop.f32.mrf.mxu3  ;;  %v843_v13 = vrot.slane %v8671_v25, 2  ;;  %v8675_v25 = vld [vmem:[#allocation15_spill] sm:$0xff] }
 0x12e   : > { %5186 = vmatmul.msk.f32.gmra.mxu0 %vm424_vm1, %v8669_v60  ;;  %5120 = vmatmul.msk.f32.gmra.mxu2 %vm424_vm1, %v6468_v16  ;;  %v1359_v19 = vadd.f32 %v1267_v21, %v1201_v50 }
 0x130   : > { %v6520_v56 = vadd.f32 %v1424_v11, %v1359_v19  ;;  %v1430_v38 = vpop.f32.mrf.mxu1  ;;  %v6532_v11 = vsel %vm784_vm3, %v841_v24, %v843_v13 }
 0x131   : > { %v958_v40 = vpop.f32.mrf.mxu2 }
 0x132   : > { %8670 = vst [vmem:[#allocation7_spill] sm:$0xff] %v6520_v56  ;;  %v1048_v63 = vadd.f32 %v958_v40, %v698_v43  ;;  %5154 = vmatmul.msk.f32.gmra.mxu3 %vm424_vm1, %v8667_v17  ;;  %v701_v17 = vadd.f32 %v6228_v14, %v6235_v3  ;;  %v8676_v56 = vld [vmem:[#allocation13_spill] sm:$0xff] }
 0x133   : > { %v1273_v31 = vpop.f32.mrf.mxu0  ;;  %5220 = vmatmul.msk.f32.gmra.mxu1 %vm424_vm1, %v6516_v41 }
 0x134   : > { %v1202_v21 = vadd.f32 %v1112_v39, %v1048_v63  ;;  %v8674_v63 = vld [vmem:[#allocation14_spill] sm:$0xff] }
 0x135   : > { %v1115_v50 = vpop.f32.mrf.mxu3 }
 0x136   : > { %5187 = vmatmul.msk.f32.gmra.mxu0 %vm424_vm1, %v8672_v34  ;;  %5121 = vmatmul.msk.f32.gmra.mxu2 %vm424_vm1, %v6483_v61  ;;  %v1360_v20 = vadd.f32 %v1270_v49, %v1202_v21  ;;  %v845_v49 = vrot.slane %v8674_v63, 2  ;;  %v846_v21 = vrot.slane %v8675_v25, 2 }
 0x138   : > { %v6536_v19 = vadd.f32 %v1427_v53, %v1360_v20  ;;  %v6549_v3 = vsel %vm784_vm3, %v845_v49, %v846_v21 }
 0x139   : > { %v961_v43 = vpop.f32.mrf.mxu2 }
 0x13a   : > { %8673 = vst [vmem:[#allocation8_spill] sm:$0xff] %v6536_v19  ;;  %v1049_v40 = vadd.f32 %v961_v43, %v701_v17  ;;  %5155 = vmatmul.msk.f32.gmra.mxu3 %vm424_vm1, %v8668_v33  ;;  %v704_v33 = vadd.f32 %v6246_v1, %v6253_v54  ;;  %v1433_v17 = vpop.f32.mrf.mxu1  ;;  %v8679_v19 = vld [vmem:[#allocation17_spill] sm:$0xff] }
 0x13b   : > { %v1276_v39 = vpop.f32.mrf.mxu0  ;;  %5221 = vmatmul.msk.f32.gmra.mxu1 %vm424_vm1, %v6532_v11 }
 0x13c   : > { %v1203_v13 = vadd.f32 %v1115_v50, %v1049_v40  ;;  %v8678_v40 = vld [vmem:[#allocation18_spill] sm:$0xff] }
 0x13d   : > { %v1118_v24 = vpop.f32.mrf.mxu3 }
 0x13e   : > { %5188 = vmatmul.msk.f32.gmra.mxu0 %vm424_vm1, %v8676_v56  ;;  %5122 = vmatmul.msk.f32.gmra.mxu2 %vm424_vm1, %v6499_v8  ;;  %v1361_v14 = vadd.f32 %v1273_v31, %v1203_v13  ;;  %v848_v31 = vrot.slane %v8678_v40, 2  ;;  %v8682_v40 = vld [vmem:[#allocation22_spill] sm:$0xff] }
 0x140   : > { %v6553_v53 = vadd.f32 %v1430_v38, %v1361_v14  ;;  %v6565_v54 = vsel %vm784_vm3, %v846_v21, %v848_v31  ;;  %v707_v38 = vadd.f32 %v6265_v32, %v6272_v27  ;;  %v851_v21 = vrot.slane %v8682_v40, 2 }
 0x141   : > { %v964_v20 = vpop.f32.mrf.mxu2 }
 0x142   : > { %8677 = vst [vmem:[#allocation6_spill] sm:$0xff] %v6553_v53  ;;  %v1050_v43 = vadd.f32 %v964_v20, %v704_v33  ;;  %5156 = vmatmul.msk.f32.gmra.mxu3 %vm424_vm1, %v8674_v63  ;;  %v1436_v20 = vpop.f32.mrf.mxu1  ;;  %v8683_v53 = vld [vmem:[#allocation20_spill] sm:$0xff] }
 0x143   : > { %v1279_v50 = vpop.f32.mrf.mxu0  ;;  %5222 = vmatmul.msk.f32.gmra.mxu1 %vm424_vm1, %v6549_v3 }
 0x144   : > { %v1204_v13 = vadd.f32 %v1118_v24, %v1050_v43  ;;  %v8681_v43 = vld [vmem:[#allocation21_spill] sm:$0xff] }
 0x145   : > { %v1121_v49 = vpop.f32.mrf.mxu3 }
 0x146   : > { %5189 = vmatmul.msk.f32.gmra.mxu0 %vm424_vm1, %v8679_v19  ;;  %5123 = vmatmul.msk.f32.gmra.mxu2 %vm424_vm1, %v6516_v41  ;;  %v1362_v1 = vadd.f32 %v1276_v39, %v1204_v13  ;;  %v850_v39 = vrot.slane %v8681_v43, 2 }
 0x148   : > { %v6569_v63 = vadd.f32 %v1433_v17, %v1362_v1  ;;  %v6582_v27 = vsel %vm784_vm3, %v850_v39, %v851_v21  ;;  %v8685_v39 = vld [vmem:[#allocation24_spill] sm:$0xff] }
 0x149   : > { %v967_v14 = vpop.f32.mrf.mxu2 }
 0x14a   : > { %8680 = vst [vmem:[#allocation11_spill] sm:$0xff] %v6569_v63  ;;  %v1051_v33 = vadd.f32 %v967_v14, %v707_v38  ;;  %5157 = vmatmul.msk.f32.gmra.mxu3 %vm424_vm1, %v8675_v25  ;;  %v710_v25 = vadd.f32 %v6283_v0, %v6290_v9  ;;  %v8684_v14 = vld [vmem:[#allocation25_spill] sm:$0xff]  ;;  %v1439_v63 = vpop.f32.mrf.mxu1 }
 0x14b   : > { %v1282_v24 = vpop.f32.mrf.mxu0  ;;  %5223 = vmatmul.msk.f32.gmra.mxu1 %vm424_vm1, %v6565_v54 }
 0x14c   : > { %v1205_v31 = vadd.f32 %v1121_v49, %v1051_v33  ;;  %v853_v33 = vrot.slane %v8684_v14, 2 }
 0x14d   : > { %v1124_v13 = vpop.f32.mrf.mxu3 }
 0x14e   : > { %5190 = vmatmul.msk.f32.gmra.mxu0 %vm424_vm1, %v8683_v53  ;;  %5124 = vmatmul.msk.f32.gmra.mxu2 %vm424_vm1, %v6532_v11  ;;  %v1363_v32 = vadd.f32 %v1279_v50, %v1205_v31  ;;  %v6598_v9 = vsel %vm784_vm3, %v851_v21, %v853_v33 }
 0x150   : > { %v6586_v17 = vadd.f32 %v1436_v20, %v1363_v32  ;;  %v713_v20 = vadd.f32 %v6302_v4, %v6309_v55 }
 0x151   : > { %v970_v1 = vpop.f32.mrf.mxu2 }
 0x152   : > { %v1052_v38 = vadd.f32 %v970_v1, %v710_v25  ;;  %5158 = vmatmul.msk.f32.gmra.mxu3 %vm424_vm1, %v8681_v43  ;;  %v8686_v1 = vld [vmem:[#allocation28_spill] sm:$0xff] }
 0x153   : > { %v1285_v49 = vpop.f32.mrf.mxu0  ;;  %5224 = vmatmul.msk.f32.gmra.mxu1 %vm424_vm1, %v6582_v27 }
 0x154   : > { %v1206_v50 = vadd.f32 %v1124_v13, %v1052_v38  ;;  %v855_v38 = vrot.slane %v8686_v1, 2 }
 0x155   : > { %v1127_v31 = vpop.f32.mrf.mxu3 }
 0x156   : > { %5191 = vmatmul.msk.f32.gmra.mxu0 %vm424_vm1, %v8685_v39  ;;  %5125 = vmatmul.msk.f32.gmra.mxu2 %vm424_vm1, %v6549_v3  ;;  %v1364_v0 = vadd.f32 %v1282_v24, %v1206_v50  ;;  %v8687_v24 = vld [vmem:[#allocation29_spill] sm:$0xff]  ;;  %v8688_v50 = vld [vmem:[#allocation27_spill] sm:$0xff] }
 0x157   : > { %v856_v14 = vrot.slane %v8687_v24, 2 }
 0x158   : > { %v6602_v43 = vadd.f32 %v1439_v63, %v1364_v0  ;;  %v716_v63 = vadd.f32 %v6320_v28, %v6327_v44 }
 0x159   : > { %v973_v32 = vpop.f32.mrf.mxu2  ;;  %v6617_v55 = vsel %vm784_vm3, %v855_v38, %v856_v14 }
 0x15a   : > { %v1053_v25 = vadd.f32 %v973_v32, %v713_v20  ;;  %5159 = vmatmul.msk.f32.gmra.mxu3 %vm424_vm1, %v8682_v40  ;;  %v8689_v20 = vld [vmem:[#allocation32_spill] sm:$0xff] }
 0x15b   : > { %v1288_v13 = vpop.f32.mrf.mxu0  ;;  %5225 = vmatmul.msk.f32.gmra.mxu1 %vm424_vm1, %v6598_v9  ;;  %v858_v32 = vrot.slane %v8689_v20, 2  ;;  %v8693_v20 = vld [vmem:[#allocation36_spill] sm:$0xff] }
 0x15c   : > { %v1207_v21 = vadd.f32 %v1127_v31, %v1053_v25 }
 0x15d   : > { %v1130_v33 = vpop.f32.mrf.mxu3  ;;  %v6633_v44 = vsel %vm784_vm3, %v856_v14, %v858_v32  ;;  %v8694_v14 = vld [vmem:[#allocation34_spill] sm:$0xff] }
 0x15e   : > { %5192 = vmatmul.msk.f32.gmra.mxu0 %vm424_vm1, %v8688_v50  ;;  %5126 = vmatmul.msk.f32.gmra.mxu2 %vm424_vm1, %v6565_v54  ;;  %v6614_v4 = vadd.f32 %v1285_v49, %v1207_v21  ;;  %v8690_v21 = vld [vmem:[#allocation31_spill] sm:$0xff] }
 0x161   : > { %v976_v40 = vpop.f32.mrf.mxu2 }
 0x162   : > { %v1054_v0 = vadd.f32 %v976_v40, %v716_v63  ;;  %5160 = vmatmul.msk.f32.gmra.mxu3 %vm424_vm1, %v8686_v1  ;;  %v719_v1 = vadd.f32 %v6339_v26, %v6346_v10  ;;  %v8692_v40 = vld [vmem:[#allocation35_spill] sm:$0xff] }
 0x163   : > { %v1291_v31 = vpop.f32.mrf.mxu0  ;;  %5226 = vmatmul.msk.f32.gmra.mxu1 %vm424_vm1, %v6617_v55 }
 0x164   : > { %v1208_v25 = vadd.f32 %v1130_v33, %v1054_v0  ;;  %v860_v0 = vrot.slane %v8692_v40, 2 }
 0x165   : > { %v1133_v49 = vpop.f32.mrf.mxu3 }
 0x166   : > { %5193 = vmatmul.msk.f32.gmra.mxu0 %vm424_vm1, %v8690_v21  ;;  %5127 = vmatmul.msk.f32.gmra.mxu2 %vm424_vm1, %v6582_v27  ;;  %v6630_v28 = vadd.f32 %v1288_v13, %v1208_v25  ;;  %v861_v13 = vrot.slane %v8693_v20, 2 }
 0x168   : > { %8691 = vst [vmem:[#allocation10_spill] sm:$0xff] %v6630_v28  ;;  %v6650_v10 = vsel %vm784_vm3, %v860_v0, %v861_v13  ;;  %v8697_v0 = vld [vmem:[#allocation38_spill] sm:$0xff] }
 0x169   : > { %v979_v38 = vpop.f32.mrf.mxu2 }
 0x16a   : > { %v1055_v63 = vadd.f32 %v979_v38, %v719_v1  ;;  %5161 = vmatmul.msk.f32.gmra.mxu3 %vm424_vm1, %v8687_v24  ;;  %v722_v24 = vadd.f32 %v6357_v15, %v6364_v58  ;;  %v8696_v38 = vld [vmem:[#allocation39_spill] sm:$0xff] }
 0x16b   : > { %v1294_v33 = vpop.f32.mrf.mxu0  ;;  %5227 = vmatmul.msk.f32.gmra.mxu1 %vm424_vm1, %v6633_v44 }
 0x16c   : > { %v1209_v25 = vadd.f32 %v1133_v49, %v1055_v63 }
 0x16d   : > { %v1136_v28 = vpop.f32.mrf.mxu3 }
 0x16e   : > { %5194 = vmatmul.msk.f32.gmra.mxu0 %vm424_vm1, %v8694_v14  ;;  %5128 = vmatmul.msk.f32.gmra.mxu2 %vm424_vm1, %v6598_v9  ;;  %v6647_v26 = vadd.f32 %v1291_v31, %v1209_v25  ;;  %v863_v31 = vrot.slane %v8696_v38, 2  ;;  %v274_v38 = vld [vmem:[%s5738_s29 + $0x188] sm:$0xff] }
 0x170   : > { %8695 = vst [vmem:[#allocation14_spill] sm:$0xff] %v6647_v26  ;;  %v6666_v58 = vsel %vm784_vm3, %v861_v13, %v863_v31  ;;  %v1390_v13 = vrot.slane %v274_v38, 2 }
 0x171   : > { %v982_v32 = vpop.f32.mrf.mxu2 }
 0x172   : > { %v1056_v1 = vadd.f32 %v982_v32, %v722_v24  ;;  %5162 = vmatmul.msk.f32.gmra.mxu3 %vm424_vm1, %v8692_v40  ;;  %v725_v40 = vadd.f32 %v6376_v2, %v6383_v45 }
 0x173   : > { %v1297_v49 = vpop.f32.mrf.mxu0  ;;  %5228 = vmatmul.msk.f32.gmra.mxu1 %vm424_vm1, %v6650_v10 }
 0x174   : > { %v1210_v63 = vadd.f32 %v1136_v28, %v1056_v1  ;;  %v6673_v1 = vld [vmem:[%s5738_s29 + $0x180] sm:$0xff] }
 0x175   : > { %v1139_v25 = vpop.f32.mrf.mxu3  ;;  %v1232_v45 = vrot.slane %v6673_v1, 1 }
 0x176   : > { %5195 = vmatmul.msk.f32.gmra.mxu0 %vm424_vm1, %v8697_v0  ;;  %5129 = vmatmul.msk.f32.gmra.mxu2 %vm424_vm1, %v6617_v55  ;;  %v6663_v15 = vadd.f32 %v1294_v33, %v1210_v63  ;;  %v1389_v33 = vrot.slane %v6673_v1, 2 }
 0x178   : > { %8698 = vst [vmem:[#allocation15_spill] sm:$0xff] %v6663_v15  ;;  %v8699_v15 = vld [vmem:[#allocation41_spill] sm:$0xff] }
 0x179   : > { %v985_v24 = vpop.f32.mrf.mxu2 }
 0x17a   : > { %v1057_v32 = vadd.f32 %v985_v24, %v725_v40  ;;  %5163 = vmatmul.msk.f32.gmra.mxu3 %vm424_vm1, %v8693_v20  ;;  %v1233_v20 = vrot.slane %v274_v38, 1  ;;  %v6687_v40 = vsel %vm784_vm3, %v1389_v33, %v1390_v13  ;;  %v728_v24 = vadd.f32 %v6394_v51, %v6401_v5 }
 0x17b   : > { %v1300_v28 = vpop.f32.mrf.mxu0  ;;  %5229 = vmatmul.msk.f32.gmra.mxu1 %vm424_vm1, %v6666_v58  ;;  %8701 = vst [vmem:[#allocation18_spill] sm:$0xff] %v6687_v40 }
 0x17c   : > { %v1211_v31 = vadd.f32 %v1139_v25, %v1057_v32 }
 0x17d   : > { %v1142_v63 = vpop.f32.mrf.mxu3 }
 0x17e   : > { %5196 = vmatmul.msk.f32.gmra.mxu0 %vm424_vm1, %v8699_v15  ;;  %5130 = vmatmul.msk.f32.gmra.mxu2 %vm424_vm1, %v6633_v44  ;;  %v6683_v2 = vadd.f32 %v1297_v49, %v1211_v31  ;;  %v6694_v15 = vsel %vm341_vm2, %v1232_v45, %v1233_v20  ;;  %v275_v49 = vld [vmem:[%s5738_s29 + $0x190] sm:$0x3]  ;;  %v731_v45 = vadd.f32 %v6416_v29, %v6423_v42 }
 0x17f   : > { %v1392_v31 = vrot.slane %v275_v49, 2  ;;  %v1235_v5 = vrot.slane %v275_v49, 1  ;;  %v734_v29 = vadd.f32 %v6434_v12, %v6441_v6 }
 0x180   : > { %8700 = vst [vmem:[#allocation13_spill] sm:$0xff] %v6683_v2 }
 0x181   : > { %v988_v26 = vpop.f32.mrf.mxu2 }
 0x182   : > { %v1058_v25 = vadd.f32 %v988_v26, %v728_v24  ;;  %5164 = vmatmul.msk.f32.gmra.mxu3 %vm424_vm1, %v6673_v1  ;;  %v6706_v26 = vsel %vm784_vm3, %v1390_v13, %v1392_v31  ;;  %v5637_v31 = vld [vmem:[%s5738_s29 + $0x30] sm:$0xff] }
 0x183   : > { %v1303_v32 = vpop.f32.mrf.mxu0  ;;  %5230 = vmatmul.msk.f32.gmra.mxu1 %vm424_vm1, %v6687_v40 }
 0x184   : > { %v1212_v2 = vadd.f32 %v1142_v63, %v1058_v25  ;;  %v6712_v25 = vsel %vm341_vm2, %v1233_v20, %v1235_v5 }
 0x185   : > { %v1145_v33 = vpop.f32.mrf.mxu3 }
 0x186   : > { %5197 = vmatmul.msk.f32.gmra.mxu0 %vm424_vm1, %v6694_v15  ;;  %5131 = vmatmul.msk.f32.gmra.mxu2 %vm424_vm1, %v6650_v10  ;;  %v6703_v51 = vadd.f32 %v1300_v28, %v1212_v2 }
 0x189   : > { %v991_v24 = vpop.f32.mrf.mxu2 }
 0x18a   : > { %v1059_v40 = vadd.f32 %v991_v24, %v731_v45  ;;  %5165 = vmatmul.msk.f32.gmra.mxu3 %vm424_vm1, %v274_v38  ;;  %v5638_v45 = vld [vmem:[%s5738_s29 + $0x38] sm:$0xff] }
 0x18b   : > { %v1306_v63 = vpop.f32.mrf.mxu0  ;;  %5231 = vmatmul.msk.f32.gmra.mxu1 %vm424_vm1, %v6706_v26 }
 0x18c   : > { %v1213_v28 = vadd.f32 %v1145_v33, %v1059_v40 }
 0x18d   : > { %v1148_v2 = vpop.f32.mrf.mxu3 }
 0x18e   : > { %5198 = vmatmul.msk.f32.gmra.mxu0 %vm424_vm1, %v6712_v25  ;;  %5132 = vmatmul.msk.f32.gmra.mxu2 %vm424_vm1, %v6666_v58  ;;  %v6720_v42 = vadd.f32 %v1303_v32, %v1213_v28  ;;  %v8702_v28 = vld [vmem:[#allocation9_spill] sm:$0xff] }
 0x191   : > { %v994_v38 = vpop.f32.mrf.mxu2 }
 0x192   : > { %v1060_v13 = vadd.f32 %v994_v38, %v734_v29  ;;  %5266 = vmatmul.msk.f32.vlgmr.msra.gmra.mxu3 %vm424_vm1, %v5857_v46  ;;  %v8703_v29 = vld [vmem:[#allocation43_spill] sm:$0xff]  ;;  %v5639_v38 = vld [vmem:[%s5738_s29 + $0x48] sm:$0xff] }
 0x193   : > { %v1309_v20 = vpop.f32.mrf.mxu0 }
 0x194   : > { %v1214_v40 = vadd.f32 %v1148_v2, %v1060_v13 }
 0x195   : > { %v1151_v49 = vpop.f32.mrf.mxu3 }
 0x196   : > { %5299 = vmatmul.msk.f32.vlgmr.msra.gmra.mxu0 %vm424_vm1, %v6196_v57  ;;  %5233 = vmatmul.msk.f32.vlgmr.msra.gmra.mxu2 %vm424_vm1, %v5637_v31  ;;  %v6730_v32 = vadd.f32 %v1306_v63, %v1214_v40 }
 0x199   : > { %v997_v33 = vpop.f32.mrf.mxu2 }
 0x19a   : > { %v1061_v12 = vadd.f32 %v997_v33, %v6180_v22  ;;  %5267 = vmatmul.msk.f32.gmra.mxu3 %vm424_vm1, %v5879_v52 }
 0x19b   : > { %v1312_v6 = vpop.f32.mrf.mxu0 }
 0x19c   : > { %v1215_v5 = vadd.f32 %v1151_v49, %v1061_v12  ;;  %v8705_v49 = vld [vmem:[#allocation12_spill] sm:$0xff]  ;;  %v5640_v12 = vld [vmem:[%s5738_s29 + $0x50] sm:$0xff] }
 0x19d   : > { %v1154_v46 = vpop.f32.mrf.mxu3 }
 0x19e   : > { %5300 = vmatmul.msk.f32.gmra.mxu0 %vm424_vm1, %v6213_v7  ;;  %5234 = vmatmul.msk.f32.gmra.mxu2 %vm424_vm1, %v5638_v45  ;;  %v6739_v57 = vadd.f32 %v1309_v20, %v1215_v5  ;;  %v8704_v20 = vld [vmem:[#allocation42_spill] sm:$0xff] }
 0x1a1   : > { %v1000_v24 = vpop.f32.mrf.mxu2 }
 0x1a2   : > { %v1062_v63 = vadd.f32 %v1000_v24, %v6198_v35  ;;  %5268 = vmatmul.msk.f32.gmra.mxu3 %vm424_vm1, %v8702_v28 }
 0x1a3   : > { %v1315_v22 = vpop.f32.mrf.mxu0 }
 0x1a4   : > { %v1216_v2 = vadd.f32 %v1154_v46, %v1062_v63  ;;  %v8706_v46 = vld [vmem:[#allocation44_spill] sm:$0xff] }
 0x1a5   : > { %v1157_v52 = vpop.f32.mrf.mxu3  ;;  %v8707_v63 = vld [vmem:[#allocation16_spill] sm:$0xff] }
 0x1a6   : > { %5301 = vmatmul.msk.f32.gmra.mxu0 %vm424_vm1, %v8703_v29  ;;  %5235 = vmatmul.msk.f32.gmra.mxu2 %vm424_vm1, %v5639_v38  ;;  %v6748_v7 = vadd.f32 %v1312_v6, %v1216_v2  ;;  %v5641_v29 = vld [vmem:[%s5738_s29 + $0x60] sm:$0xff]  ;;  %v8709_v38 = vld [vmem:[#allocation45_spill] sm:$0xff] }
 0x1a9   : > { %v1003_v13 = vpop.f32.mrf.mxu2 }
 0x1aa   : > { %v1063_v40 = vadd.f32 %v1003_v13, %v8704_v20  ;;  %5269 = vmatmul.msk.f32.gmra.mxu3 %vm424_vm1, %v8705_v49 }
 0x1ab   : > { %v1318_v35 = vpop.f32.mrf.mxu0 }
 0x1ac   : > { %v1217_v31 = vadd.f32 %v1157_v52, %v1063_v40  ;;  %v8708_v52 = vld [vmem:[#allocation46_spill] sm:$0xff]  ;;  %v8710_v40 = vld [vmem:[#allocation19_spill] sm:$0xff] }
 0x1ad   : > { %v1160_v33 = vpop.f32.mrf.mxu3 }
 0x1ae   : > { %5302 = vmatmul.msk.f32.gmra.mxu0 %vm424_vm1, %v6249_v48  ;;  %5236 = vmatmul.msk.f32.gmra.mxu2 %vm424_vm1, %v5640_v12  ;;  %v6757_v5 = vadd.f32 %v1315_v22, %v1217_v31 }
 0x1b1   : > { %v1006_v6 = vpop.f32.mrf.mxu2 }
 0x1b2   : > { %v1064_v45 = vadd.f32 %v1006_v6, %v8706_v46  ;;  %5270 = vmatmul.msk.f32.gmra.mxu3 %vm424_vm1, %v8707_v63  ;;  %v8711_v46 = vld [vmem:[#allocation47_spill] sm:$0xff] }
 0x1b3   : > { %v1321_v24 = vpop.f32.mrf.mxu0 }
 0x1b4   : > { %v1218_v28 = vadd.f32 %v1160_v33, %v1064_v45  ;;  %v5642_v33 = vld [vmem:[%s5738_s29 + $0x68] sm:$0xff] }
 0x1b5   : > { %v1163_v2 = vpop.f32.mrf.mxu3 }
 0x1b6   : > { %5303 = vmatmul.msk.f32.gmra.mxu0 %vm424_vm1, %v8708_v52  ;;  %5237 = vmatmul.msk.f32.gmra.mxu2 %vm424_vm1, %v5641_v29  ;;  %v6766_v48 = vadd.f32 %v1318_v35, %v1218_v28  ;;  %v6777_v35 = vpop.f32.mrf.mxu1  ;;  %v8712_v28 = vld [vmem:[#allocation23_spill] sm:$0xff]  ;;  %v8713_v29 = vld [vmem:[#allocation49_spill] sm:$0xff] }
 0x1b9   : > { %v1009_v22 = vpop.f32.mrf.mxu2 }
 0x1ba   : > { %v1065_v13 = vadd.f32 %v1009_v22, %v8709_v38  ;;  %5271 = vmatmul.msk.f32.gmra.mxu3 %vm424_vm1, %v8710_v40 }
 0x1bb   : > { %v1324_v20 = vpop.f32.mrf.mxu0 }
 0x1bc   : > { %v1219_v49 = vadd.f32 %v1163_v2, %v1065_v13  ;;  %v8715_v13 = vld [vmem:[#allocation48_spill] sm:$0xff] }
 0x1bd   : > { %v1166_v31 = vpop.f32.mrf.mxu3 }
 0x1be   : > { %5304 = vmatmul.msk.f32.gmra.mxu0 %vm424_vm1, %v6286_v62  ;;  %5238 = vmatmul.msk.f32.gmra.mxu2 %vm424_vm1, %v5642_v33  ;;  %v6775_v12 = vadd.f32 %v1321_v24, %v1219_v49  ;;  %v5643_v62 = vld [vmem:[%s5738_s29 + $0x78] sm:$0xff]  ;;  %v6788_v38 = vpop.f32.mrf.mxu1 }
 0x1bf   : > { %v8716_v33 = vld [vmem:[#allocation26_spill] sm:$0xff] }
 0x1c1   : > { %v1012_v6 = vpop.f32.mrf.mxu2 }
 0x1c2   : > { %v1066_v45 = vadd.f32 %v1012_v6, %v8711_v46  ;;  %5272 = vmatmul.msk.f32.gmra.mxu3 %vm424_vm1, %v8712_v28  ;;  %v5644_v46 = vld [vmem:[%s5738_s29 + $0x80] sm:$0xff]  ;;  %v8718_v28 = vld [vmem:[#allocation50_spill] sm:$0xff] }
 0x1c3   : > { %v1327_v63 = vpop.f32.mrf.mxu0 }
 0x1c4   : > { %v1220_v2 = vadd.f32 %v1166_v31, %v1066_v45 }
 0x1c5   : > { %v1169_v52 = vpop.f32.mrf.mxu3 }
 0x1c6   : > { %5305 = vmatmul.msk.f32.gmra.mxu0 %vm424_vm1, %v8713_v29  ;;  %5239 = vmatmul.msk.f32.gmra.mxu2 %vm424_vm1, %v5643_v62  ;;  %v6786_v24 = vadd.f32 %v1324_v20, %v1220_v2  ;;  %v8719_v62 = vld [vmem:[#allocation30_spill] sm:$0xff] }
 0x1c8   : > { %8714 = vst [vmem:[#allocation17_spill] sm:$0xff] %v6786_v24  ;;  %v8733_v24 = vld [vmem:[#allocation3_spill] sm:$0xff] }
 0x1c9   : > { %v1015_v22 = vpop.f32.mrf.mxu2 }
 0x1ca   : > { %v1067_v40 = vadd.f32 %v1015_v22, %v8715_v13  ;;  %5273 = vmatmul.msk.f32.gmra.mxu3 %vm424_vm1, %v8716_v33  ;;  %v6802_v22 = vpop.f32.mrf.mxu1 }
 0x1cb   : > { %v1330_v49 = vpop.f32.mrf.mxu0 }
 0x1cc   : > { %v1221_v31 = vadd.f32 %v1169_v52, %v1067_v40  ;;  %v8720_v40 = vld [vmem:[#allocation52_spill] sm:$0xff] }
 0x1cd   : > { %v1172_v6 = vpop.f32.mrf.mxu3 }
 0x1ce   : > { %5306 = vmatmul.msk.f32.gmra.mxu0 %vm424_vm1, %v6323_v23  ;;  %5240 = vmatmul.msk.f32.gmra.mxu2 %vm424_vm1, %v5644_v46  ;;  %v6797_v20 = vadd.f32 %v1327_v63, %v1221_v31  ;;  %v5645_v23 = vld [vmem:[%s5738_s29 + $0x90] sm:$0xff]  ;;  %v8722_v31 = vld [vmem:[#allocation51_spill] sm:$0xff] }
 0x1d0   : > { %8717 = vst [vmem:[#allocation21_spill] sm:$0xff] %v6797_v20 }
 0x1d1   : > { %v1018_v45 = vpop.f32.mrf.mxu2 }
 0x1d2   : > { %v1068_v2 = vadd.f32 %v1018_v45, %v8718_v28  ;;  %5274 = vmatmul.msk.f32.gmra.mxu3 %vm424_vm1, %v8719_v62  ;;  %v8723_v28 = vld [vmem:[#allocation33_spill] sm:$0xff] }
 0x1d3   : > { %v1333_v29 = vpop.f32.mrf.mxu0 }
 0x1d4   : > { %v1222_v52 = vadd.f32 %v1172_v6, %v1068_v2  ;;  %v6815_v6 = vpop.f32.mrf.mxu1  ;;  %v5646_v2 = vld [vmem:[%s5738_s29 + $0x98] sm:$0xff] }
 0x1d5   : > { %v1175_v13 = vpop.f32.mrf.mxu3 }
 0x1d6   : > { %5307 = vmatmul.msk.f32.gmra.mxu0 %vm424_vm1, %v8720_v40  ;;  %5241 = vmatmul.msk.f32.gmra.mxu2 %vm424_vm1, %v5645_v23  ;;  %v6808_v63 = vadd.f32 %v1330_v49, %v1222_v52  ;;  %v8725_v40 = vld [vmem:[#allocation53_spill] sm:$0xff] }
 0x1d8   : > { %8721 = vst [vmem:[#allocation22_spill] sm:$0xff] %v6808_v63 }
 0x1d9   : > { %v1021_v33 = vpop.f32.mrf.mxu2 }
 0x1da   : > { %v1069_v46 = vadd.f32 %v1021_v33, %v8722_v31  ;;  %5275 = vmatmul.msk.f32.gmra.mxu3 %vm424_vm1, %v8723_v28  ;;  %v8726_v31 = vld [vmem:[#allocation37_spill] sm:$0xff]  ;;  %v8727_v28 = vld [vmem:[#allocation55_spill] sm:$0xff] }
 0x1db   : > { %v1336_v45 = vpop.f32.mrf.mxu0 }
 0x1dc   : > { %v1223_v62 = vadd.f32 %v1175_v13, %v1069_v46 }
 0x1dd   : > { %v1178_v20 = vpop.f32.mrf.mxu3 }
 0x1de   : > { %5308 = vmatmul.msk.f32.gmra.mxu0 %vm424_vm1, %v6360_v18  ;;  %5242 = vmatmul.msk.f32.gmra.mxu2 %vm424_vm1, %v5646_v2  ;;  %v6819_v49 = vadd.f32 %v1333_v29, %v1223_v62  ;;  %v5647_v18 = vld [vmem:[%s5738_s29 + $0xa8] sm:$0xff]  ;;  %v6830_v29 = vpop.f32.mrf.mxu1  ;;  %v8729_v2 = vld [vmem:[#allocation54_spill] sm:$0xff] }
 0x1e0   : > { %8724 = vst [vmem:[#allocation20_spill] sm:$0xff] %v6819_v49  ;;  %v8730_v49 = vld [vmem:[#allocation40_spill] sm:$0xff] }
 0x1e1   : > { %v1024_v52 = vpop.f32.mrf.mxu2 }
 0x1e2   : > { %v1070_v23 = vadd.f32 %v1024_v52, %v8725_v40  ;;  %5276 = vmatmul.msk.f32.gmra.mxu3 %vm424_vm1, %v8726_v31 }
 0x1e3   : > { %v1339_v33 = vpop.f32.mrf.mxu0 }
 0x1e4   : > { %v1224_v13 = vadd.f32 %v1178_v20, %v1070_v23  ;;  %v8731_v23 = vld [vmem:[#allocation57_spill] sm:$0xff] }
 0x1e5   : > { %v1181_v46 = vpop.f32.mrf.mxu3 }
 0x1e6   : > { %5309 = vmatmul.msk.f32.gmra.mxu0 %vm424_vm1, %v8727_v28  ;;  %5243 = vmatmul.msk.f32.gmra.mxu2 %vm424_vm1, %v5647_v18  ;;  %v6828_v63 = vadd.f32 %v1336_v45, %v1224_v13  ;;  %v5648_v28 = vld [vmem:[%s5738_s29 + $0xb0] sm:$0xff]  ;;  %v6841_v18 = vpop.f32.mrf.mxu1 }
 0x1e8   : > { %8728 = vst [vmem:[#allocation25_spill] sm:$0xff] %v6828_v63  ;;  %v8732_v63 = vld [vmem:[#allocation56_spill] sm:$0xff] }
 0x1e9   : > { %v1027_v62 = vpop.f32.mrf.mxu2 }
 0x1ea   : > { %v1071_v52 = vadd.f32 %v1027_v62, %v8729_v2  ;;  %5277 = vmatmul.msk.f32.gmra.mxu3 %vm424_vm1, %v8730_v49 }
 0x1eb   : > { %v1342_v40 = vpop.f32.mrf.mxu0 }
 0x1ec   : > { %v1225_v31 = vadd.f32 %v1181_v46, %v1071_v52  ;;  %v284_v46 = vld [vmem:[%s8507_s3] sm:$0xff]  ;;  %v286_v52 = vld [vmem:[%s8507_s3 + $0x10] sm:$0xff] }
 0x1ed   : > { %v1184_v20 = vpop.f32.mrf.mxu3  ;;  %2637 = vmatpush.msrb.mxu2 %v284_v46  ;;  %2878 = vmatpush.msrb.mxu3 %v286_v52 }
 0x1ee   : > { %5310 = vmatmul.msk.f32.gmra.mxu0 %vm424_vm1, %v8731_v23  ;;  %5244 = vmatmul.msk.f32.gmra.mxu2 %vm424_vm1, %v5648_v28  ;;  %v6839_v45 = vadd.f32 %v1339_v33, %v1225_v31  ;;  %v8734_v31 = vld [vmem:[#allocation59_spill] sm:$0xff]  ;;  %v8735_v28 = vld [vmem:[#allocation58_spill] sm:$0xff] }
 0x1f1   : > { %v1030_v13 = vpop.f32.mrf.mxu2 }
 0x1f2   : > { %v1072_v62 = vadd.f32 %v1030_v13, %v8732_v63  ;;  %5278 = vmatmul.msk.f32.gmra.mxu3 %vm424_vm1, %v8733_v24  ;;  %v5675_v63 = vmov 0.0   ;;  %v5649_v24 = vld [vmem:[%s5738_s29 + $0xc0] sm:$0xff] }
 0x1f3   : > { %v1345_v2 = vpop.f32.mrf.mxu0  ;;  %2149 = vst.msk [vmem:[#allocation2 + $0x8] sm:$0xff] %vm2147_vm4, %v5675_v63 }
 0x1f4   : > { %v1226_v49 = vadd.f32 %v1184_v20, %v1072_v62  ;;  %2148 = vst.msk [vmem:[#allocation2] sm:$0xff] %vm2147_vm4, %v5675_v63 }
 0x1f5   : > { %v1187_v33 = vpop.f32.mrf.mxu3  ;;  %2150 = vst.msk [vmem:[#allocation2 + $0x10] sm:$0xff] %vm2147_vm4, %v5675_v63 }
 0x1f6   : > { %5311 = vmatmul.msk.f32.gmra.mxu0 %vm424_vm1, %v8734_v31  ;;  %5245 = vmatmul.msk.f32.gmra.mxu2 %vm424_vm1, %v5649_v24  ;;  %v6858_v20 = vadd.f32 %v1342_v40, %v1226_v49  ;;  %2151 = vst.msk [vmem:[#allocation2 + $0x18] sm:$0xff] %vm2147_vm4, %v5675_v63  ;;  %v8736_v40 = vld [vmem:[#allocation4_spill] sm:$0xff]  ;;  %v6875_v49 = vpop.f32.mrf.mxu1 }
 0x1f7   : > { %2152 = vst.msk [vmem:[#allocation2 + $0x20] sm:$0xff] %vm2147_vm4, %v5675_v63  ;;  %v5650_v24 = vld [vmem:[%s5738_s29 + $0xc8] sm:$0xff] }
 0x1f8   : > { %2153 = vst.msk [vmem:[#allocation2 + $0x28] sm:$0xff] %vm2147_vm4, %v5675_v63 }
 0x1f9   : > { %v1033_v23 = vpop.f32.mrf.mxu2  ;;  %2154 = vst.msk [vmem:[#allocation2 + $0x30] sm:$0xff] %vm2147_vm4, %v5675_v63 }
 0x1fa   : > { %v1073_v13 = vadd.f32 %v1033_v23, %v8735_v28  ;;  %5279 = vmatmul.msk.f32.gmra.mxu3 %vm424_vm1, %v8736_v40  ;;  %v2285_v52 = vld [vmem:[#allocation2 + $0x8] sm:$0xff]  ;;  %2155 = vst.msk [vmem:[#allocation2 + $0x38] sm:$0xff] %vm2147_vm4, %v5675_v63  ;;  %v8738_v40 = vld [vmem:[#allocation5_spill] sm:$0xff] }
 0x1fb   : > { %v1348_v62 = vpop.f32.mrf.mxu0  ;;  %5331 = vmatmul.msk.f32.vlgmr.msra.gmra.mxu1 %vm2147_vm4, %v2285_v52  ;;  %2156 = vst.msk [vmem:[#allocation2 + $0x40] sm:$0xff] %vm2147_vm4, %v5675_v63 }
 0x1fc   : > { %v1227_v46 = vadd.f32 %v1187_v33, %v1073_v13  ;;  %v287_v33 = vld [vmem:[%s8507_s3 + $0x18] sm:$0xff]  ;;  %2157 = vst.msk [vmem:[#allocation2 + $0x48] sm:$0xff] %vm2147_vm4, %v5675_v63  ;;  %v2286_v52 = vld [vmem:[#allocation2 + $0x10] sm:$0xff] }
 0x1fd   : > { %v1190_v31 = vpop.f32.mrf.mxu3  ;;  %3151 = vmatpush.msrb.mxu0 %v287_v33  ;;  %2158 = vst.msk [vmem:[#allocation2 + $0x50] sm:$0xff] %vm2147_vm4, %v5675_v63 }
 0x1fe   : > { %5312 = vmatmul.msk.f32.gmra.mxu0 %vm424_vm1, %v6437_v30  ;;  %5246 = vmatmul.msk.f32.gmra.mxu2 %vm424_vm1, %v5650_v24  ;;  %v6886_v23 = vadd.f32 %v1345_v2, %v1227_v46  ;;  %2159 = vst.msk [vmem:[#allocation2 + $0x58] sm:$0xff] %vm2147_vm4, %v5675_v63  ;;  %v8737_v2 = vld [vmem:[#allocation60_spill] sm:$0xff]  ;;  %v6913_v33 = vpop.f32.mrf.mxu1 }
 0x1ff   : > { %2160 = vst.msk [vmem:[#allocation2 + $0x60] sm:$0xff] %vm2147_vm4, %v5675_v63 }
 0x200   : > { %2161 = vst.msk [vmem:[#allocation2 + $0x68] sm:$0xff] %vm2147_vm4, %v5675_v63 }
 0x201   : > { %v1036_v30 = vpop.f32.mrf.mxu2  ;;  %2162 = vst.msk [vmem:[#allocation2 + $0x70] sm:$0xff] %vm2147_vm4, %v5675_v63 }
 0x202   : > { %v1074_v28 = vadd.f32 %v1036_v30, %v8737_v2  ;;  %5280 = vmatmul.msk.f32.gmra.mxu3 %vm424_vm1, %v8738_v40  ;;  %2163 = vst.msk [vmem:[#allocation2 + $0x78] sm:$0xff] %vm2147_vm4, %v5675_v63  ;;  %v5651_v30 = vld [vmem:[%s5738_s29 + $0xd8] sm:$0xff] }
 0x203   : > { %v1351_v13 = vpop.f32.mrf.mxu0  ;;  %2164 = vst.msk [vmem:[#allocation2 + $0x80] sm:$0xff] %vm2147_vm4, %v5675_v63  ;;  %5332 = vmatmul.msk.f32.gmra.mxu1 %vm2147_vm4, %v2286_v52  ;;  %v5652_v52 = vld [vmem:[%s5738_s29 + $0xe0] sm:$0xff] }
 0x204   : > { %v1228_v46 = vadd.f32 %v1190_v31, %v1074_v28  ;;  %2165 = vst.msk [vmem:[#allocation2 + $0x88] sm:$0xff] %vm2147_vm4, %v5675_v63  ;;  %v8739_v31 = vld [vmem:[#allocation61_spill] sm:$0xff] }
 0x205   : > { %v1193_v24 = vpop.f32.mrf.mxu3  ;;  %2166 = vst.msk [vmem:[#allocation2 + $0x90] sm:$0xff] %vm2147_vm4, %v5675_v63 }
 0x206   : > { %5313 = vmatmul.msk.f32.gmra.mxu0 %vm424_vm1, %v6454_v59  ;;  %5247 = vmatmul.msk.f32.gmra.mxu2 %vm424_vm1, %v5651_v30  ;;  %v6917_v2 = vadd.f32 %v1348_v62, %v1228_v46  ;;  %2167 = vst.msk [vmem:[#allocation2 + $0x98] sm:$0xff] %vm2147_vm4, %v5675_v63  ;;  %v8740_v30 = vld [vmem:[#allocation62_spill] sm:$0xff] }
 0x207   : > { %2168 = vst.msk [vmem:[#allocation2 + $0xa0] sm:$0xff] %vm2147_vm4, %v5675_v63 }
 0x208   : > { %2169 = vst.msk [vmem:[#allocation2 + $0xa8] sm:$0xff] %vm2147_vm4, %v5675_v63 }
 0x209   : > { %v1039_v59 = vpop.f32.mrf.mxu2  ;;  %2170 = vst.msk [vmem:[#allocation2 + $0xb0] sm:$0xff] %vm2147_vm4, %v5675_v63 }
 0x20a   : > { %v1075_v28 = vadd.f32 %v1039_v59, %v8739_v31  ;;  %5281 = vmatmul.msk.f32.gmra.mxu3 %vm424_vm1, %v5832_v37  ;;  %2171 = vst.msk [vmem:[#allocation2 + $0xb8] sm:$0xff] %vm2147_vm4, %v5675_v63 }
 0x20b   : > { %v1354_v40 = vpop.f32.mrf.mxu0  ;;  %2172 = vst.msk [vmem:[#allocation2 + $0xc0] sm:$0xff] %vm2147_vm4, %v5675_v63 }
 0x20c   : > { %v1229_v62 = vadd.f32 %v1193_v24, %v1075_v28  ;;  %2173 = vst.msk [vmem:[#allocation2 + $0xc8] sm:$0xff] %vm2147_vm4, %v5675_v63  ;;  %v6948_v24 = vpop.f32.mrf.mxu1 }
 0x20d   : > { %v1196_v46 = vpop.f32.mrf.mxu3  ;;  %2174 = vst.msk [vmem:[#allocation2 + $0xd0] sm:$0xff] %vm2147_vm4, %v5675_v63 }
 0x20e   : > { %5314 = vmatmul.msk.f32.gmra.mxu0 %vm424_vm1, %v6468_v16  ;;  %5248 = vmatmul.msk.f32.gmra.mxu2 %vm424_vm1, %v5652_v52  ;;  %v6942_v37 = vadd.f32 %v1351_v13, %v1229_v62  ;;  %2175 = vst.msk [vmem:[#allocation2 + $0xd8] sm:$0xff] %vm2147_vm4, %v5675_v63  ;;  %v5653_v62 = vld [vmem:[%s5738_s29 + $0xf0] sm:$0xff] }
 0x20f   : > { %2176 = vst.msk [vmem:[#allocation2 + $0xe0] sm:$0xff] %vm2147_vm4, %v5675_v63 }
 0x210   : > { %2177 = vst.msk [vmem:[#allocation2 + $0xe8] sm:$0xff] %vm2147_vm4, %v5675_v63 }
 0x211   : > { %v1042_v16 = vpop.f32.mrf.mxu2  ;;  %2178 = vst.msk [vmem:[#allocation2 + $0xf0] sm:$0xff] %vm2147_vm4, %v5675_v63 }
 0x212   : > { %v1076_v59 = vadd.f32 %v1042_v16, %v8740_v30  ;;  %5282 = vmatmul.msk.f32.gmra.mxu3 %vm424_vm1, %v5862_v47  ;;  %2179 = vst.msk [vmem:[#allocation2 + $0xf8] sm:$0xff] %vm2147_vm4, %v5675_v63  ;;  %v288_v30 = vld [vmem:[%s8507_s3 + $0x20] sm:$0xff] }
 0x213   : > { %v1887_v13 = vpop.f32.mrf.mxu0  ;;  %2180 = vst.msk [vmem:[#allocation2 + $0x100] sm:$0xff] %vm2147_vm4, %v5675_v63  ;;  %3424 = vmatpush.msrb.mxu1 %v288_v30 }
 0x214   : > { %v1230_v31 = vadd.f32 %v1196_v46, %v1076_v59  ;;  %2181 = vst.msk [vmem:[#allocation2 + $0x108] sm:$0xff] %vm2147_vm4, %v5675_v63 }
 0x215   : > { %v1730_v28 = vpop.f32.mrf.mxu3  ;;  %2182 = vst.msk [vmem:[#allocation2 + $0x110] sm:$0xff] %vm2147_vm4, %v5675_v63 }
 0x216   : > { %5315 = vmatmul.msk.f32.gmra.mxu0 %vm424_vm1, %v6483_v61  ;;  %5249 = vmatmul.msk.f32.gmra.mxu2 %vm424_vm1, %v5653_v62  ;;  %v6969_v47 = vadd.f32 %v1354_v40, %v1230_v31  ;;  %2183 = vst.msk [vmem:[#allocation2 + $0x118] sm:$0xff] %vm2147_vm4, %v5675_v63  ;;  %v6979_v61 = vpop.f32.mrf.mxu1  ;;  %v5654_v31 = vld [vmem:[%s5738_s29 + $0xf8] sm:$0xff] }
 0x217   : > { %2184 = vst.msk [vmem:[#allocation2 + $0x120] sm:$0xff] %vm2147_vm4, %v5675_v63 }
 0x218   : > { %2185 = vst.msk [vmem:[#allocation2 + $0x128] sm:$0xff] %vm2147_vm4, %v5675_v63 }
 0x219   : > { %v1572_v46 = vpop.f32.mrf.mxu2  ;;  %2186 = vst.msk [vmem:[#allocation2 + $0x130] sm:$0xff] %vm2147_vm4, %v5675_v63 }
 0x21a   : > { %v1668_v52 = vadd.f32 %v1572_v46, %v6487_v36  ;;  %5283 = vmatmul.msk.f32.gmra.mxu3 %vm424_vm1, %v8669_v60  ;;  %2187 = vst.msk [vmem:[#allocation2 + $0x138] sm:$0xff] %vm2147_vm4, %v5675_v63  ;;  %v6996_v36 = vld [vmem:[%s8506_s2] ss:$0 sm:$0xff] }
 0x21b   : > { %v1890_v40 = vpop.f32.mrf.mxu0  ;;  %2188 = vst.msk [vmem:[#allocation2 + $0x140] sm:$0xff] %vm2147_vm4, %v5675_v63 }
 0x21c   : > { %v1826_v16 = vadd.f32 %v1730_v28, %v1668_v52  ;;  %2189 = vst.msk [vmem:[#allocation2 + $0x148] sm:$0xff] %vm2147_vm4, %v5675_v63 }
 0x21d   : > { %v1733_v60 = vpop.f32.mrf.mxu3  ;;  %2190 = vst.msk [vmem:[#allocation2 + $0x150] sm:$0xff] %vm2147_vm4, %v5675_v63 }
 0x21e   : > { %5316 = vmatmul.msk.f32.gmra.mxu0 %vm424_vm1, %v6499_v8  ;;  %v1983_v59 = vadd.f32 %v1887_v13, %v1826_v16  ;;  %5250 = vmatmul.msk.f32.gmra.mxu2 %vm424_vm1, %v5654_v31  ;;  %2191 = vst.msk [vmem:[#allocation2 + $0x158] sm:$0xff] %vm2147_vm4, %v5675_v63  ;;  %v8741_v8 = vld [vmem:[#allocation63_spill] sm:$0xff]  ;;  %v7020_v16 = vpop.f32.mrf.mxu1 }
 0x21f   : > { %2192 = vst.msk [vmem:[#allocation2 + $0x160] sm:$0xff] %vm2147_vm4, %v5675_v63 }
 0x220   : > { %v2019_v28 = vadd.f32 %v6996_v36, %v1983_v59  ;;  %2193 = vst.msk [vmem:[#allocation2 + $0x168] sm:$0xff] %vm2147_vm4, %v5675_v63 }
 0x221   : > { %v1575_v62 = vpop.f32.mrf.mxu2  ;;  %2194 = vst.msk [vmem:[#allocation2 + $0x170] sm:$0xff] %vm2147_vm4, %v5675_v63 }
 0x222   : > { %v1669_v13 = vadd.f32 %v1575_v62, %v8741_v8  ;;  %5284 = vmatmul.msk.f32.gmra.mxu3 %vm424_vm1, %v8672_v34  ;;  %vm2051_vm5 = vcmp.ge.f32.partialorder %v2019_v28, 0.0  ;;  %v2083_v52 = vmul.f32 0.1, %v2019_v28  ;;  %2195 = vst.msk [vmem:[#allocation2 + $0x178] sm:$0xff] %vm2147_vm4, %v5675_v63  ;;  %v5655_v62 = vld [vmem:[%s5738_s29 + $0x108] sm:$0xff] }
 0x223   : > { %v1893_v46 = vpop.f32.mrf.mxu0  ;;  %2196 = vst.msk [vmem:[#allocation2 + $0x180] sm:$0xff] %vm2147_vm4, %v5675_v63 }
 0x224   : > { %v1827_v30 = vadd.f32 %v1733_v60, %v1669_v13  ;;  %v7024_v59 = vsel %vm2051_vm5, %v2019_v28, %v2083_v52  ;;  %2197 = vst.msk [vmem:[#allocation2 + $0x188] sm:$0xff] %vm2147_vm4, %v5675_v63 }
 0x225   : > { %4811 = vrot.lane.b32.xlu0 %v7024_v59, %s5676_s23  ;;  %v1736_v34 = vpop.f32.mrf.mxu3  ;;  %2198 = vst.msk [vmem:[#allocation2 + $0x190] sm:$0xff] %vm2147_vm4, %v5675_v63 }
 0x226   : > { %5317 = vmatmul.msk.f32.gmra.mxu0 %vm424_vm1, %v6516_v41  ;;  %v1984_v31 = vadd.f32 %v1890_v40, %v1827_v30  ;;  %5251 = vmatmul.msk.f32.gmra.mxu2 %vm424_vm1, %v5655_v62  ;;  %2199 = vst.msk [vmem:[#allocation2 + $0x198] sm:$0xff] %vm2147_vm4, %v5675_v63  ;;  %v8742_v41 = vld [vmem:[#allocation7_spill] sm:$0xff] }
 0x227   : > { %2200 = vst.msk [vmem:[#allocation2 + $0x1a0] sm:$0xff] %vm2147_vm4, %v5675_v63 }
 0x228   : > { %v2020_v60 = vadd.f32 %v6996_v36, %v1984_v31  ;;  %2201 = vst.msk [vmem:[#allocation2 + $0x1a8] sm:$0xff] %vm2147_vm4, %v5675_v63 }
 0x229   : > { %v1578_v28 = vpop.f32.mrf.mxu2  ;;  %2202 = vst.msk [vmem:[#allocation2 + $0x1b0] sm:$0xff] %vm2147_vm4, %v5675_v63 }
 0x22a   : > { %v1670_v40 = vadd.f32 %v1578_v28, %v8742_v41  ;;  %5285 = vmatmul.msk.f32.gmra.mxu3 %vm424_vm1, %v8676_v56  ;;  %vm2052_vm6 = vcmp.ge.f32.partialorder %v2020_v60, 0.0  ;;  %v2084_v13 = vmul.f32 0.1, %v2020_v60  ;;  %2203 = vst.msk [vmem:[#allocation2 + $0x1b8] sm:$0xff] %vm2147_vm4, %v5675_v63  ;;  %v7057_v56 = vpop.f32.mrf.mxu1  ;;  %v5656_v28 = vld [vmem:[%s5738_s29 + $0x110] sm:$0xff] }
 0x22b   : > { %v1896_v8 = vpop.f32.mrf.mxu0  ;;  %2204 = vst.msk [vmem:[#allocation2 + $0x1c0] sm:$0xff] %vm2147_vm4, %v5675_v63 }
 0x22c   : > { %v1828_v52 = vadd.f32 %v1736_v34, %v1670_v40  ;;  %v2116_v30 = vsel %vm2052_vm6, %v2020_v60, %v2084_v13  ;;  %2205 = vst.msk [vmem:[#allocation2 + $0x1c8] sm:$0xff] %vm2147_vm4, %v5675_v63  ;;  %v8743_v60 = vld [vmem:[#allocation8_spill] sm:$0xff] }
 0x22d   : > { %4813 = vrot.lane.b32.xlu0 %v2116_v30, %s5676_s23  ;;  %v1739_v31 = vpop.f32.mrf.mxu3  ;;  %2206 = vst.msk [vmem:[#allocation2 + $0x1d0] sm:$0xff] %vm2147_vm4, %v5675_v63 }
 0x22e   : > { %5318 = vmatmul.msk.f32.gmra.mxu0 %vm424_vm1, %v6532_v11  ;;  %v1985_v62 = vadd.f32 %v1893_v46, %v1828_v52  ;;  %5252 = vmatmul.msk.f32.gmra.mxu2 %vm424_vm1, %v5656_v28  ;;  %2207 = vst.msk [vmem:[#allocation2 + $0x1d8] sm:$0xff] %vm2147_vm4, %v5675_v63  ;;  %v5657_v28 = vld [vmem:[%s5738_s29 + $0x120] sm:$0xff] }
 0x22f   : > { %2208 = vst.msk [vmem:[#allocation2 + $0x1e0] sm:$0xff] %vm2147_vm4, %v5675_v63 }
 0x230   : > { %v2021_v34 = vadd.f32 %v6996_v36, %v1985_v62  ;;  %2209 = vst.msk [vmem:[#allocation2 + $0x1e8] sm:$0xff] %vm2147_vm4, %v5675_v63 }
 0x231   : > { %v1581_v11 = vpop.f32.mrf.mxu2  ;;  %2210 = vst.msk [vmem:[#allocation2 + $0x1f0] sm:$0xff] %vm2147_vm4, %v5675_v63 }
 0x232   : > { %v1671_v46 = vadd.f32 %v1581_v11, %v8743_v60  ;;  %5286 = vmatmul.msk.f32.gmra.mxu3 %vm424_vm1, %v8679_v19  ;;  %vm2053_vm7 = vcmp.ge.f32.partialorder %v2021_v34, 0.0  ;;  %v2085_v40 = vmul.f32 0.1, %v2021_v34  ;;  %2211 = vst.msk [vmem:[#allocation2 + $0x1f8] sm:$0xff] %vm2147_vm4, %v5675_v63 }
 0x233   : > { %v1899_v41 = vpop.f32.mrf.mxu0  ;;  %2212 = vst.msk [vmem:[#allocation2 + $0x200] sm:$0xff] %vm2147_vm4, %v5675_v63 }
 0x234   : > { %v1829_v13 = vadd.f32 %v1739_v31, %v1671_v46  ;;  %v2117_v52 = vsel %vm2053_vm7, %v2021_v34, %v2085_v40  ;;  %2213 = vst.msk [vmem:[#allocation2 + $0x208] sm:$0xff] %vm2147_vm4, %v5675_v63  ;;  %v7090_v31 = vpop.f32.mrf.mxu1 }
 0x235   : > { %4815 = vrot.lane.b32.xlu1 %v2117_v52, %s5676_s23  ;;  %v1742_v62 = vpop.f32.mrf.mxu3  ;;  %2214 = vst.msk [vmem:[#allocation2 + $0x210] sm:$0xff] %vm2147_vm4, %v5675_v63 }
 0x236   : > { %5319 = vmatmul.msk.f32.gmra.mxu0 %vm424_vm1, %v6549_v3  ;;  %v1986_v19 = vadd.f32 %v1896_v8, %v1829_v13  ;;  %5253 = vmatmul.msk.f32.gmra.mxu2 %vm424_vm1, %v5657_v28  ;;  %2215 = vst.msk [vmem:[#allocation2 + $0x218] sm:$0xff] %vm2147_vm4, %v5675_v63  ;;  %v8744_v8 = vld [vmem:[#allocation6_spill] sm:$0xff]  ;;  %v5658_v28 = vld [vmem:[%s5738_s29 + $0x128] sm:$0xff] }
 0x237   : > { %2216 = vst.msk [vmem:[#allocation2 + $0x220] sm:$0xff] %vm2147_vm4, %v5675_v63 }
 0x238   : > { %v2022_v34 = vadd.f32 %v6996_v36, %v1986_v19  ;;  %2217 = vst.msk [vmem:[#allocation2 + $0x228] sm:$0xff] %vm2147_vm4, %v5675_v63 }
 0x239   : > { %v1584_v3 = vpop.f32.mrf.mxu2  ;;  %2218 = vst.msk [vmem:[#allocation2 + $0x230] sm:$0xff] %vm2147_vm4, %v5675_v63 }
 0x23a   : > { %v1672_v11 = vadd.f32 %v1584_v3, %v8744_v8  ;;  %5287 = vmatmul.msk.f32.gmra.mxu3 %vm424_vm1, %v8683_v53  ;;  %vm2054_vm8 = vcmp.ge.f32.partialorder %v2022_v34, 0.0  ;;  %v2086_v46 = vmul.f32 0.1, %v2022_v34  ;;  %2219 = vst.msk [vmem:[#allocation2 + $0x238] sm:$0xff] %vm2147_vm4, %v5675_v63 }
 0x23b   : > { %v1902_v60 = vpop.f32.mrf.mxu0  ;;  %2221 = vst.msk [vmem:[#allocation2 + $0x28] sm:$0xff] %vm2147_vm4, %v7024_v59 }
 0x23c   : > { %v1830_v40 = vadd.f32 %v1742_v62, %v1672_v11  ;;  %v2118_v13 = vsel %vm2054_vm8, %v2022_v34, %v2086_v46  ;;  %2222 = vst.msk [vmem:[#allocation2 + $0x30] sm:$0xff] %vm2147_vm4, %v2116_v30  ;;  %v7117_v62 = vpop.f32.mrf.mxu1  ;;  %v8745_v34 = vld [vmem:[#allocation11_spill] sm:$0xff] }
 0x23d   : > { %4817 = vrot.lane.b32.xlu1 %v2118_v13, %s5676_s23  ;;  %v1745_v19 = vpop.f32.mrf.mxu3  ;;  %2223 = vst.msk [vmem:[#allocation2 + $0x48] sm:$0xff] %vm2147_vm4, %v2117_v52 }
 0x23e   : > { %5320 = vmatmul.msk.f32.gmra.mxu0 %vm424_vm1, %v6565_v54  ;;  %v1987_v53 = vadd.f32 %v1899_v41, %v1830_v40  ;;  %5254 = vmatmul.msk.f32.gmra.mxu2 %vm424_vm1, %v5658_v28  ;;  %2224 = vst.msk [vmem:[#allocation2 + $0x50] sm:$0xff] %vm2147_vm4, %v2118_v13  ;;  %v5659_v40 = vld [vmem:[%s5738_s29 + $0x138] sm:$0xff] }
 0x240   : > { %v2023_v63 = vadd.f32 %v6996_v36, %v1987_v53 }
 0x241   : > { %v1587_v59 = vpop.f32.mrf.mxu2 }
 0x242   : > { %v1673_v3 = vadd.f32 %v1587_v59, %v8745_v34  ;;  %5288 = vmatmul.msk.f32.gmra.mxu3 %vm424_vm1, %v8685_v39  ;;  %vm2055_vm9 = vcmp.ge.f32.partialorder %v2023_v63, 0.0  ;;  %v2087_v30 = vmul.f32 0.1, %v2023_v63  ;;  %v2287_v41 = vld [vmem:[#allocation2 + $0x28] sm:$0xff] }
 0x243   : > { %v1905_v54 = vpop.f32.mrf.mxu0  ;;  %5333 = vmatmul.msk.f32.gmra.mxu1 %vm2147_vm4, %v2287_v41 }
 0x244   : > { %v1831_v8 = vadd.f32 %v1745_v19, %v1673_v3  ;;  %v2119_v11 = vsel %vm2055_vm9, %v2023_v63, %v2087_v30  ;;  %v2288_v19 = vld [vmem:[#allocation2 + $0x30] sm:$0xff]  ;;  %v5660_v30 = vld [vmem:[%s5738_s29 + $0x140] sm:$0xff]  ;;  %v2289_v41 = vld [vmem:[#allocation2 + $0x48] sm:$0xff] }
 0x245   : > { %4819 = vrot.lane.b32.xlu2 %v2119_v11, %s5676_s23  ;;  %2225 = vst.msk [vmem:[#allocation2 + $0x68] sm:$0xff] %vm2147_vm4, %v2119_v11  ;;  %v1748_v52 = vpop.f32.mrf.mxu3 }
 0x246   : > { %v1988_v46 = vadd.f32 %v1902_v60, %v1831_v8  ;;  %5255 = vmatmul.msk.f32.gmra.mxu2 %vm424_vm1, %v5659_v40  ;;  %5321 = vmatmul.msk.f32.gmra.mxu0 %vm424_vm1, %v6582_v27  ;;  %v7133_v60 = vpop.f32.mrf.mxu1 }
 0x248   : > { %v2024_v39 = vadd.f32 %v6996_v36, %v1988_v46 }
 0x249   : > { %v1590_v13 = vpop.f32.mrf.mxu2 }
 0x24a   : > { %v1674_v53 = vadd.f32 %v1590_v13, %v6586_v17  ;;  %5289 = vmatmul.msk.f32.gmra.mxu3 %vm424_vm1, %v8688_v50  ;;  %vm2056_vm10 = vcmp.ge.f32.partialorder %v2024_v39, 0.0  ;;  %v2088_v63 = vmul.f32 0.1, %v2024_v39  ;;  %v5661_v13 = vld [vmem:[%s5738_s29 + $0x150] sm:$0xff] }
 0x24b   : > { %v1908_v28 = vpop.f32.mrf.mxu0  ;;  %5334 = vmatmul.msk.f32.gmra.mxu1 %vm2147_vm4, %v2288_v19 }
 0x24c   : > { %v1832_v59 = vadd.f32 %v1748_v52, %v1674_v53  ;;  %v2120_v34 = vsel %vm2056_vm10, %v2024_v39, %v2088_v63  ;;  %v2290_v53 = vld [vmem:[#allocation2 + $0x50] sm:$0xff] }
 0x24d   : > { %4821 = vrot.lane.b32.xlu2 %v2120_v34, %s5676_s23  ;;  %2226 = vst.msk [vmem:[#allocation2 + $0x70] sm:$0xff] %vm2147_vm4, %v2120_v34  ;;  %v1751_v27 = vpop.f32.mrf.mxu3 }
 0x24e   : > { %v1989_v3 = vadd.f32 %v1905_v54, %v1832_v59  ;;  %5256 = vmatmul.msk.f32.gmra.mxu2 %vm424_vm1, %v5660_v30  ;;  %5322 = vmatmul.msk.f32.gmra.mxu0 %vm424_vm1, %v6598_v9  ;;  %v7149_v40 = vpop.f32.mrf.mxu1 }
 0x250   : > { %v2025_v17 = vadd.f32 %v6996_v36, %v1989_v3 }
 0x251   : > { %v1593_v50 = vpop.f32.mrf.mxu2 }
 0x252   : > { %v1675_v8 = vadd.f32 %v1593_v50, %v6602_v43  ;;  %5290 = vmatmul.msk.f32.gmra.mxu3 %vm424_vm1, %v8690_v21  ;;  %vm2057_vm11 = vcmp.ge.f32.partialorder %v2025_v17, 0.0  ;;  %v2089_v52 = vmul.f32 0.1, %v2025_v17  ;;  %v1522_v43 = vadd.f32 %v6777_v35, %v6614_v4  ;;  %v5662_v35 = vld [vmem:[%s5738_s29 + $0x158] sm:$0xff] }
 0x253   : > { %v1911_v11 = vpop.f32.mrf.mxu0  ;;  %5335 = vmatmul.msk.f32.gmra.mxu1 %vm2147_vm4, %v2289_v41  ;;  %v2291_v41 = vld [vmem:[#allocation2 + $0x68] sm:$0xff] }
 0x254   : > { %v1833_v54 = vadd.f32 %v1751_v27, %v1675_v8  ;;  %v2121_v46 = vsel %vm2057_vm11, %v2025_v17, %v2089_v52 }
 0x255   : > { %4823 = vrot.lane.b32.xlu0 %v2121_v46, %s5676_s23  ;;  %2227 = vst.msk [vmem:[#allocation2 + $0x88] sm:$0xff] %vm2147_vm4, %v2121_v46  ;;  %v1754_v9 = vpop.f32.mrf.mxu3 }
 0x256   : > { %v1990_v39 = vadd.f32 %v1908_v28, %v1833_v54  ;;  %5257 = vmatmul.msk.f32.gmra.mxu2 %vm424_vm1, %v5661_v13  ;;  %5323 = vmatmul.msk.f32.gmra.mxu0 %vm424_vm1, %v6617_v55  ;;  %v7169_v30 = vpop.f32.mrf.mxu1 }
 0x258   : > { %v2026_v21 = vadd.f32 %v6996_v36, %v1990_v39 }
 0x259   : > { %v1596_v19 = vpop.f32.mrf.mxu2 }
 0x25a   : > { %v1676_v63 = vadd.f32 %v1596_v19, %v1522_v43  ;;  %5291 = vmatmul.msk.f32.gmra.mxu3 %vm424_vm1, %v8694_v14  ;;  %vm2058_vm12 = vcmp.ge.f32.partialorder %v2026_v21, 0.0  ;;  %v2090_v28 = vmul.f32 0.1, %v2026_v21  ;;  %v8746_v14 = vld [vmem:[#allocation10_spill] sm:$0xff]  ;;  %v2292_v19 = vld [vmem:[#allocation2 + $0x70] sm:$0xff] }
 0x25b   : > { %v1914_v59 = vpop.f32.mrf.mxu0  ;;  %5336 = vmatmul.msk.f32.gmra.mxu1 %vm2147_vm4, %v2290_v53  ;;  %v1523_v3 = vadd.f32 %v6788_v38, %v8746_v14 }
 0x25c   : > { %v1834_v34 = vadd.f32 %v1754_v9, %v1676_v63  ;;  %v2122_v27 = vsel %vm2058_vm12, %v2026_v21, %v2090_v28  ;;  %v5663_v9 = vld [vmem:[%s5738_s29 + $0x168] sm:$0xff]  ;;  %v8748_v63 = vld [vmem:[#allocation41_spill] sm:$0xff] }
 0x25d   : > { %4825 = vrot.lane.b32.xlu1 %v2122_v27, %s5676_s23  ;;  %2228 = vst.msk [vmem:[#allocation2 + $0x90] sm:$0xff] %vm2147_vm4, %v2122_v27  ;;  %v1757_v4 = vpop.f32.mrf.mxu3 }
 0x25e   : > { %v1991_v55 = vadd.f32 %v1911_v11, %v1834_v34  ;;  %5258 = vmatmul.msk.f32.gmra.mxu2 %vm424_vm1, %v5662_v35  ;;  %5324 = vmatmul.msk.f32.gmra.mxu0 %vm424_vm1, %v6633_v44  ;;  %v7184_v21 = vpop.f32.mrf.mxu1 }
 0x260   : > { %v2027_v17 = vadd.f32 %v6996_v36, %v1991_v55  ;;  %v8749_v55 = vld [vmem:[#allocation15_spill] sm:$0xff] }
 0x261   : > { %v1599_v50 = vpop.f32.mrf.mxu2  ;;  %v1525_v35 = vadd.f32 %v6815_v6, %v8749_v55  ;;  %v1527_v55 = vadd.f32 %v6841_v18, %v6703_v51 }
 0x262   : > { %v1677_v8 = vadd.f32 %v1599_v50, %v1523_v3  ;;  %5292 = vmatmul.msk.f32.gmra.mxu3 %vm424_vm1, %v8697_v0  ;;  %vm2059_vm13 = vcmp.ge.f32.partialorder %v2027_v17, 0.0  ;;  %v2091_v52 = vmul.f32 0.1, %v2027_v17  ;;  %v8747_v0 = vld [vmem:[#allocation14_spill] sm:$0xff] }
 0x263   : > { %v1917_v11 = vpop.f32.mrf.mxu0  ;;  %5337 = vmatmul.msk.f32.gmra.mxu1 %vm2147_vm4, %v2291_v41  ;;  %v1524_v39 = vadd.f32 %v6802_v22, %v8747_v0  ;;  %v7214_v0 = vld [vmem:[%s5738_s29 + $0x1a0] sm:$0xff] }
 0x264   : > { %v1835_v54 = vadd.f32 %v1757_v4, %v1677_v8  ;;  %v2123_v46 = vsel %vm2059_vm13, %v2027_v17, %v2091_v52  ;;  %v5664_v4 = vld [vmem:[%s5738_s29 + $0x170] sm:$0xff]  ;;  %v2293_v17 = vld [vmem:[#allocation2 + $0x88] sm:$0xff] }
 0x265   : > { %4827 = vrot.lane.b32.xlu2 %v2123_v46, %s5676_s23  ;;  %2229 = vst.msk [vmem:[#allocation2 + $0xa8] sm:$0xff] %vm2147_vm4, %v2123_v46  ;;  %v1760_v44 = vpop.f32.mrf.mxu3  ;;  %v8751_v46 = vld [vmem:[#allocation13_spill] sm:$0xff] }
 0x266   : > { %v1992_v38 = vadd.f32 %v1914_v59, %v1835_v54  ;;  %5259 = vmatmul.msk.f32.gmra.mxu2 %vm424_vm1, %v5663_v9  ;;  %5325 = vmatmul.msk.f32.gmra.mxu0 %vm424_vm1, %v6650_v10  ;;  %v276_v9 = vld [vmem:[%s5738_s29 + $0x198] sm:$0xff] }
 0x268   : > { %v2028_v13 = vadd.f32 %v6996_v36, %v1992_v38 }
 0x269   : > { %v1602_v43 = vpop.f32.mrf.mxu2 }
 0x26a   : > { %v1678_v53 = vadd.f32 %v1602_v43, %v1524_v39  ;;  %5293 = vmatmul.msk.f32.gmra.mxu3 %vm424_vm1, %v8748_v63  ;;  %vm2060_vm14 = vcmp.ge.f32.partialorder %v2028_v13, 0.0  ;;  %v2092_v28 = vmul.f32 0.1, %v2028_v13  ;;  %v1702_v63 = vrot.slane %v7214_v0, 1 }
 0x26b   : > { %v1920_v59 = vpop.f32.mrf.mxu0  ;;  %5338 = vmatmul.msk.f32.gmra.mxu1 %vm2147_vm4, %v2292_v19 }
 0x26c   : > { %v1836_v34 = vadd.f32 %v1760_v44, %v1678_v53  ;;  %v2124_v27 = vsel %vm2060_vm14, %v2028_v13, %v2092_v28  ;;  %v1526_v44 = vadd.f32 %v6830_v29, %v8751_v46  ;;  %v2294_v13 = vld [vmem:[#allocation2 + $0x90] sm:$0xff]  ;;  %v1701_v53 = vrot.slane %v276_v9, 1 }
 0x26d   : > { %4829 = vrot.lane.b32.xlu0 %v2124_v27, %s5676_s23  ;;  %2230 = vst.msk [vmem:[#allocation2 + $0xb0] sm:$0xff] %vm2147_vm4, %v2124_v27  ;;  %v1763_v10 = vpop.f32.mrf.mxu3  ;;  %v1528_v46 = vadd.f32 %v6875_v49, %v6720_v42 }
 0x26e   : > { %v1993_v22 = vadd.f32 %v1917_v11, %v1836_v34  ;;  %5260 = vmatmul.msk.f32.gmra.mxu2 %vm424_vm1, %v5664_v4  ;;  %5326 = vmatmul.msk.f32.gmra.mxu0 %vm424_vm1, %v6666_v58  ;;  %v7200_v11 = vpop.f32.mrf.mxu1  ;;  %v1859_v4 = vrot.slane %v7214_v0, 2 }
 0x270   : > { %v2029_v14 = vadd.f32 %v6996_v36, %v1993_v22  ;;  %v1858_v22 = vrot.slane %v276_v9, 2 }
 0x271   : > { %v1605_v3 = vpop.f32.mrf.mxu2 }
 0x272   : > { %v1679_v50 = vadd.f32 %v1605_v3, %v1525_v35  ;;  %5294 = vmatmul.msk.f32.gmra.mxu3 %vm424_vm1, %v6694_v15  ;;  %vm2061_vm15 = vcmp.ge.f32.partialorder %v2029_v14, 0.0  ;;  %v2093_v8 = vmul.f32 0.1, %v2029_v14  ;;  %v8750_v15 = vld [vmem:[#allocation18_spill] sm:$0xff] }
 0x273   : > { %v1923_v41 = vpop.f32.mrf.mxu0  ;;  %5339 = vmatmul.msk.f32.gmra.mxu1 %vm2147_vm4, %v2293_v17  ;;  %v2295_v17 = vld [vmem:[#allocation2 + $0xa8] sm:$0xff] }
 0x274   : > { %v1837_v52 = vadd.f32 %v1763_v10, %v1679_v50  ;;  %v2125_v58 = vsel %vm2061_vm15, %v2029_v14, %v2093_v8  ;;  %v1703_v10 = vsel %vm341_vm2, %v1701_v53, %v1702_v63  ;;  %v278_v14 = vld [vmem:[%s5738_s29 + $0x1a8] sm:$0x3] }
 0x275   : > { %4831 = vrot.lane.b32.xlu1 %v2125_v58, %s5676_s23  ;;  %2231 = vst.msk [vmem:[#allocation2 + $0xc8] sm:$0xff] %vm2147_vm4, %v2125_v58  ;;  %v1766_v6 = vpop.f32.mrf.mxu3 }
 0x276   : > { %v1994_v54 = vadd.f32 %v1920_v59, %v1837_v52  ;;  %5261 = vmatmul.msk.f32.gmra.mxu2 %vm424_vm1, %v6673_v1  ;;  %5327 = vmatmul.msk.f32.gmra.mxu0 %vm424_vm1, %v8750_v15  ;;  %v7222_v34 = vpop.f32.mrf.mxu1  ;;  %v1704_v52 = vrot.slane %v278_v14, 1  ;;  %v1861_v15 = vrot.slane %v278_v14, 2 }
 0x278   : > { %v2030_v38 = vadd.f32 %v6996_v36, %v1994_v54  ;;  %v1705_v54 = vsel %vm341_vm2, %v1702_v63, %v1704_v52 }
 0x279   : > { %v1608_v39 = vpop.f32.mrf.mxu2 }
 0x27a   : > { %v1680_v43 = vadd.f32 %v1608_v39, %v1526_v44  ;;  %5295 = vmatmul.msk.f32.gmra.mxu3 %vm424_vm1, %v6712_v25  ;;  %vm2062_vm0 = vcmp.ge.f32.partialorder %v2030_v38, 0.0  ;;  %v2094_v1 = vmul.f32 0.1, %v2030_v38  ;;  %v5665_v25 = vld [vmem:[%s5738_s29 + $0x188] sm:$0xff] }
 0x27b   : > { %v1926_v19 = vpop.f32.mrf.mxu0  ;;  %5340 = vmatmul.msk.f32.gmra.mxu1 %vm2147_vm4, %v2294_v13  ;;  %v2296_v13 = vld [vmem:[#allocation2 + $0xb0] sm:$0xff] }
 0x27c   : > { %v1838_v59 = vadd.f32 %v1766_v6, %v1680_v43  ;;  %v2126_v29 = vsel %vm2062_vm0, %v2030_v38, %v2094_v1  ;;  %v1862_v1 = vsel %vm784_vm3, %v1859_v4, %v1861_v15 }
 0x27d   : > { %4833 = vrot.lane.b32.xlu2 %v2126_v29, %s5676_s23  ;;  %2232 = vst.msk [vmem:[#allocation2 + $0xd0] sm:$0xff] %vm2147_vm4, %v2126_v29  ;;  %v1769_v28 = vpop.f32.mrf.mxu3  ;;  %v1529_v29 = vadd.f32 %v6913_v33, %v6730_v32  ;;  %v3008_v33 = vld [vmem:[#allocation2 + $0x27] sm:$0xff] }
 0x27e   : > { %v1995_v27 = vadd.f32 %v1923_v41, %v1838_v59  ;;  %5262 = vmatmul.msk.f32.gmra.mxu2 %vm424_vm1, %v5665_v25  ;;  %5328 = vmatmul.msk.f32.gmra.mxu0 %vm424_vm1, %v6706_v26  ;;  %v1860_v26 = vsel %vm784_vm3, %v1858_v22, %v1859_v4  ;;  %v7244_v44 = vpop.f32.mrf.mxu1  ;;  %v2735_v59 = vld [vmem:[#allocation2 + $0x9] sm:$0xff] }
 0x280   : > { %v2031_v35 = vadd.f32 %v6996_v36, %v1995_v27 }
 0x281   : > { %v1611_v3 = vpop.f32.mrf.mxu2 }
 0x282   : > { %v1681_v50 = vadd.f32 %v1611_v3, %v1527_v55  ;;  %5296 = vmatmul.msk.f32.gmra.mxu3 %vm424_vm1, %v1703_v10  ;;  %vm2063_vm5 = vcmp.ge.f32.partialorder %v2031_v35, 0.0  ;;  %v2095_v8 = vmul.f32 0.1, %v2031_v35  ;;  %v2297_v10 = vld [vmem:[#allocation2 + $0xc8] sm:$0xff] }
 0x283   : > { %v1929_v41 = vpop.f32.mrf.mxu0  ;;  %5341 = vmatmul.msk.f32.gmra.mxu1 %vm2147_vm4, %v2295_v17  ;;  %v2736_v17 = vld [vmem:[#allocation2 + $0x11] sm:$0xff] }
 0x284   : > { %v1839_v58 = vadd.f32 %v1769_v28, %v1681_v50  ;;  %v2127_v6 = vsel %vm2063_vm5, %v2031_v35, %v2095_v8  ;;  %v2253_v35 = vld [vmem:[#allocation2 + $0x7] sm:$0xff]  ;;  %v1530_v50 = vadd.f32 %v6948_v24, %v6739_v57  ;;  %v3009_v24 = vld [vmem:[#allocation2 + $0x2f] sm:$0xff] }
 0x285   : > { %4835 = vrot.lane.b32.xlu0 %v2127_v6, %s5676_s23  ;;  %2233 = vst.msk [vmem:[#allocation2 + $0xe8] sm:$0xff] %vm2147_vm4, %v2127_v6  ;;  %v1772_v51 = vpop.f32.mrf.mxu3 }
 0x286   : > { %v1996_v18 = vadd.f32 %v1926_v19, %v1839_v58  ;;  %5263 = vmatmul.msk.f32.gmra.mxu2 %vm424_vm1, %v276_v9  ;;  %5329 = vmatmul.msk.f32.gmra.mxu0 %vm424_vm1, %v1860_v26  ;;  %v7258_v25 = vpop.f32.mrf.mxu1  ;;  %v2298_v26 = vld [vmem:[#allocation2 + $0xd0] sm:$0xff] }
 0x288   : > { %v2032_v38 = vadd.f32 %v6996_v36, %v1996_v18 }
 0x289   : > { %v1614_v39 = vpop.f32.mrf.mxu2 }
 0x28a   : > { %v1682_v43 = vadd.f32 %v1614_v39, %v1528_v46  ;;  %5297 = vmatmul.msk.f32.gmra.mxu3 %vm424_vm1, %v1705_v54  ;;  %vm2064_vm6 = vcmp.ge.f32.partialorder %v2032_v38, 0.0  ;;  %v2096_v9 = vmul.f32 0.1, %v2032_v38 }
 0x28b   : > { %v1932_v19 = vpop.f32.mrf.mxu0  ;;  %5342 = vmatmul.msk.f32.gmra.mxu1 %vm2147_vm4, %v2296_v13 }
 0x28c   : > { %v1840_v53 = vadd.f32 %v1772_v51, %v1682_v43  ;;  %v2128_v63 = vsel %vm2064_vm6, %v2032_v38, %v2096_v9  ;;  %v2254_v51 = vld [vmem:[#allocation2 + $0xf] sm:$0xff]  ;;  %v1531_v38 = vadd.f32 %v6979_v61, %v6748_v7  ;;  %v3010_v61 = vld [vmem:[#allocation2 + $0x47] sm:$0xff] }
 0x28d   : > { %4837 = vrot.lane.b32.xlu1 %v2128_v63, %s5676_s23  ;;  %2234 = vst.msk [vmem:[#allocation2 + $0xf0] sm:$0xff] %vm2147_vm4, %v2128_v63  ;;  %v1775_v42 = vpop.f32.mrf.mxu3  ;;  %v2737_v43 = vld [vmem:[#allocation2 + $0x29] sm:$0xff] }
 0x28e   : > { %v1997_v49 = vadd.f32 %v1929_v41, %v1840_v53  ;;  %5264 = vmatmul.msk.f32.gmra.mxu2 %vm424_vm1, %v7214_v0  ;;  %5330 = vmatmul.msk.f32.gmra.mxu0 %vm424_vm1, %v1862_v1  ;;  %v7270_v18 = vpop.f32.mrf.mxu1 }
 0x290   : > { %v2033_v28 = vadd.f32 %v6996_v36, %v1997_v49 }
 0x291   : > { %v1617_v27 = vpop.f32.mrf.mxu2 }
 0x292   : > { %v1683_v22 = vadd.f32 %v1617_v27, %v1529_v29  ;;  %5395 = vmatmul.msk.f32.vlgmr.msrb.gmra.mxu3 %vm2147_vm4, %v2735_v59  ;;  %vm2065_vm2 = vcmp.ge.f32.partialorder %v2033_v28, 0.0  ;;  %v2097_v55 = vmul.f32 0.1, %v2033_v28  ;;  %v1532_v29 = vadd.f32 %v7020_v16, %v6757_v5  ;;  %v3011_v16 = vld [vmem:[#allocation2 + $0x4f] sm:$0xff] }
 0x293   : > { %v1935_v4 = vpop.f32.mrf.mxu0  ;;  %5343 = vmatmul.msk.f32.gmra.mxu1 %vm2147_vm4, %v2297_v10  ;;  %v2738_v10 = vld [vmem:[#allocation2 + $0x31] sm:$0xff] }
 0x294   : > { %v1841_v0 = vadd.f32 %v1775_v42, %v1683_v22  ;;  %v2129_v14 = vsel %vm2065_vm2, %v2033_v28, %v2097_v55  ;;  %v2300_v22 = vld [vmem:[#allocation2 + $0xf0] sm:$0xff] }
 0x295   : > { %4839 = vrot.lane.b32.xlu2 %v2129_v14, %s5676_s23  ;;  %2235 = vst.msk [vmem:[#allocation2 + $0x108] sm:$0xff] %vm2147_vm4, %v2129_v14  ;;  %v1778_v32 = vpop.f32.mrf.mxu3 }
 0x296   : > { %v1998_v3 = vadd.f32 %v1932_v19, %v1841_v0  ;;  %5363 = vmatmul.msk.f32.vlgmr.msrb.gmra.mxu2 %vm2147_vm4, %v2253_v35  ;;  %5427 = vmatmul.msk.f32.vlgmr.msrb.gmra.mxu0 %vm2147_vm4, %v3008_v33  ;;  %v2299_v19 = vld [vmem:[#allocation2 + $0xe8] sm:$0xff]  ;;  %v7284_v49 = vpop.f32.mrf.mxu1 }
 0x298   : > { %v2034_v41 = vadd.f32 %v6996_v36, %v1998_v3  ;;  %v1533_v3 = vadd.f32 %v7057_v56, %v6766_v48  ;;  %v3012_v56 = vld [vmem:[#allocation2 + $0x67] sm:$0xff] }
 0x299   : > { %v1620_v8 = vpop.f32.mrf.mxu2 }
 0x29a   : > { %v1684_v52 = vadd.f32 %v1620_v8, %v1530_v50  ;;  %5396 = vmatmul.msk.f32.gmra.mxu3 %vm2147_vm4, %v2736_v17  ;;  %vm2066_vm1 = vcmp.ge.f32.partialorder %v2034_v41, 0.0  ;;  %v2098_v6 = vmul.f32 0.1, %v2034_v41 }
 0x29b   : > { %v1938_v58 = vpop.f32.mrf.mxu0  ;;  %5344 = vmatmul.msk.f32.gmra.mxu1 %vm2147_vm4, %v2298_v26 }
 0x29c   : > { %v1842_v54 = vadd.f32 %v1778_v32, %v1684_v52  ;;  %v2130_v15 = vsel %vm2066_vm1, %v2034_v41, %v2098_v6  ;;  %v2739_v41 = vld [vmem:[#allocation2 + $0x49] sm:$0xff] }
 0x29d   : > { %4841 = vrot.lane.b32.xlu0 %v2130_v15, %s5676_s23  ;;  %2236 = vst.msk [vmem:[#allocation2 + $0x110] sm:$0xff] %vm2147_vm4, %v2130_v15  ;;  %v1781_v57 = vpop.f32.mrf.mxu3  ;;  %v2301_v8 = vld [vmem:[#allocation2 + $0x108] sm:$0xff]  ;;  %v1534_v15 = vadd.f32 %v7090_v31, %v6775_v12 }
 0x29e   : > { %v1999_v46 = vadd.f32 %v1935_v4, %v1842_v54  ;;  %5364 = vmatmul.msk.f32.gmra.mxu2 %vm2147_vm4, %v2254_v51  ;;  %5428 = vmatmul.msk.f32.gmra.mxu0 %vm2147_vm4, %v3009_v24  ;;  %v7295_v32 = vpop.f32.mrf.mxu1  ;;  %v3013_v31 = vld [vmem:[#allocation2 + $0x6f] sm:$0xff] }
 0x2a0   : > { %v2035_v39 = vadd.f32 %v6996_v36, %v1999_v46 }
 0x2a1   : > { %v1623_v13 = vpop.f32.mrf.mxu2 }
 0x2a2   : > { %v1685_v9 = vadd.f32 %v1623_v13, %v1531_v38  ;;  %5397 = vmatmul.msk.f32.gmra.mxu3 %vm2147_vm4, %v2737_v43  ;;  %vm2067_vm3 = vcmp.ge.f32.partialorder %v2035_v39, 0.0  ;;  %v2099_v53 = vmul.f32 0.1, %v2035_v39  ;;  %v2740_v38 = vld [vmem:[#allocation2 + $0x51] sm:$0xff] }
 0x2a3   : > { %v1941_v1 = vpop.f32.mrf.mxu0  ;;  %5345 = vmatmul.msk.f32.gmra.mxu1 %vm2147_vm4, %v2299_v19 }
 0x2a4   : > { %v1843_v63 = vadd.f32 %v1781_v57, %v1685_v9  ;;  %v2131_v42 = vsel %vm2067_vm3, %v2035_v39, %v2099_v53  ;;  %v2302_v39 = vld [vmem:[#allocation2 + $0x110] sm:$0xff] }
 0x2a5   : > { %4843 = vrot.lane.b32.xlu1 %v2131_v42, %s5676_s23  ;;  %2237 = vst.msk [vmem:[#allocation2 + $0x128] sm:$0xff] %vm2147_vm4, %v2131_v42  ;;  %v1784_v7 = vpop.f32.mrf.mxu3 }
 0x2a6   : > { %v2000_v59 = vadd.f32 %v1938_v58, %v1843_v63  ;;  %5365 = vmatmul.msk.f32.gmra.mxu2 %vm2147_vm4, %v3008_v33  ;;  %5429 = vmatmul.msk.f32.gmra.mxu0 %vm2147_vm4, %v3010_v61  ;;  %v7310_v57 = vpop.f32.mrf.mxu1  ;;  %v8752_v63 = vld [vmem:[#allocation17_spill] sm:$0xff] }
 0x2a7   : > { %v1535_v42 = vadd.f32 %v7117_v62, %v8752_v63 }
 0x2a8   : > { %v2036_v28 = vadd.f32 %v6996_v36, %v2000_v59  ;;  %v2741_v59 = vld [vmem:[#allocation2 + $0x69] sm:$0xff] }
 0x2a9   : > { %v1626_v27 = vpop.f32.mrf.mxu2 }
 0x2aa   : > { %v1686_v4 = vadd.f32 %v1626_v27, %v1532_v29  ;;  %5398 = vmatmul.msk.f32.gmra.mxu3 %vm2147_vm4, %v2738_v10  ;;  %vm2068_vm7 = vcmp.ge.f32.partialorder %v2036_v28, 0.0  ;;  %v2100_v35 = vmul.f32 0.1, %v2036_v28 }
 0x2ab   : > { %v1944_v55 = vpop.f32.mrf.mxu0  ;;  %5346 = vmatmul.msk.f32.gmra.mxu1 %vm2147_vm4, %v2300_v22 }
 0x2ac   : > { %v1844_v0 = vadd.f32 %v1784_v7, %v1686_v4  ;;  %v2132_v14 = vsel %vm2068_vm7, %v2036_v28, %v2100_v35  ;;  %v2303_v28 = vld [vmem:[#allocation2 + $0x128] sm:$0xff] }
 0x2ad   : > { %4845 = vrot.lane.b32.xlu2 %v2132_v14, %s5676_s23  ;;  %2238 = vst.msk [vmem:[#allocation2 + $0x130] sm:$0xff] %vm2147_vm4, %v2132_v14  ;;  %v1787_v5 = vpop.f32.mrf.mxu3  ;;  %v3014_v35 = vld [vmem:[#allocation2 + $0x87] sm:$0xff]  ;;  %v8753_v14 = vld [vmem:[#allocation21_spill] sm:$0xff] }
 0x2ae   : > { %v2001_v33 = vadd.f32 %v1941_v1, %v1844_v0  ;;  %5366 = vmatmul.msk.f32.gmra.mxu2 %vm2147_vm4, %v3009_v24  ;;  %5430 = vmatmul.msk.f32.gmra.mxu0 %vm2147_vm4, %v3011_v16 }
 0x2b0   : > { %v2037_v17 = vadd.f32 %v6996_v36, %v2001_v33 }
 0x2b1   : > { %v1629_v50 = vpop.f32.mrf.mxu2 }
 0x2b2   : > { %v1687_v26 = vadd.f32 %v1629_v50, %v1533_v3  ;;  %5399 = vmatmul.msk.f32.gmra.mxu3 %vm2147_vm4, %v2739_v41  ;;  %vm2069_vm8 = vcmp.ge.f32.partialorder %v2037_v17, 0.0  ;;  %v2101_v58 = vmul.f32 0.1, %v2037_v17  ;;  %v2742_v3 = vld [vmem:[#allocation2 + $0x71] sm:$0xff] }
 0x2b3   : > { %v1947_v52 = vpop.f32.mrf.mxu0  ;;  %5347 = vmatmul.msk.f32.gmra.mxu1 %vm2147_vm4, %v2301_v8 }
 0x2b4   : > { %v1845_v6 = vadd.f32 %v1787_v5, %v1687_v26  ;;  %v2133_v51 = vsel %vm2069_vm8, %v2037_v17, %v2101_v58  ;;  %v1536_v5 = vadd.f32 %v7133_v60, %v8753_v14  ;;  %v2304_v50 = vld [vmem:[#allocation2 + $0x130] sm:$0xff] }
 0x2b5   : > { %2239 = vst.msk [vmem:[#allocation2 + $0x148] sm:$0xff] %vm2147_vm4, %v2133_v51  ;;  %4847 = vrot.lane.b32.xlu0 %v2133_v51, %s5676_s23  ;;  %v1790_v48 = vpop.f32.mrf.mxu3 }
 0x2b6   : > { %v2002_v54 = vadd.f32 %v1944_v55, %v1845_v6  ;;  %5367 = vmatmul.msk.f32.gmra.mxu2 %vm2147_vm4, %v3010_v61  ;;  %5431 = vmatmul.msk.f32.gmra.mxu0 %vm2147_vm4, %v3012_v56  ;;  %v3015_v6 = vld [vmem:[#allocation2 + $0x8f] sm:$0xff] }
 0x2b8   : > { %v2038_v24 = vadd.f32 %v6996_v36, %v2002_v54 }
 0x2b9   : > { %v1632_v46 = vpop.f32.mrf.mxu2 }
 0x2ba   : > { %v1688_v13 = vadd.f32 %v1632_v46, %v1534_v15  ;;  %5400 = vmatmul.msk.f32.gmra.mxu3 %vm2147_vm4, %v2740_v38  ;;  %vm2070_vm9 = vcmp.ge.f32.partialorder %v2038_v24, 0.0  ;;  %v2102_v19 = vmul.f32 0.1, %v2038_v24 }
 0x2bb   : > { %v1950_v43 = vpop.f32.mrf.mxu0  ;;  %5348 = vmatmul.msk.f32.gmra.mxu1 %vm2147_vm4, %v2302_v39 }
 0x2bc   : > { %v1846_v9 = vadd.f32 %v1790_v48, %v1688_v13  ;;  %v2134_v1 = vsel %vm2070_vm9, %v2038_v24, %v2102_v19  ;;  %v8754_v48 = vld [vmem:[#allocation22_spill] sm:$0xff]  ;;  %v2743_v24 = vld [vmem:[#allocation2 + $0x89] sm:$0xff] }
 0x2bd   : > { %4849 = vrot.lane.b32.xlu1 %v2134_v1, %s5676_s23  ;;  %2240 = vst.msk [vmem:[#allocation2 + $0x150] sm:$0xff] %vm2147_vm4, %v2134_v1  ;;  %v1793_v12 = vpop.f32.mrf.mxu3  ;;  %v2305_v38 = vld [vmem:[#allocation2 + $0x148] sm:$0xff] }
 0x2be   : > { %v2003_v53 = vadd.f32 %v1947_v52, %v1846_v9  ;;  %5368 = vmatmul.msk.f32.gmra.mxu2 %vm2147_vm4, %v3011_v16  ;;  %5432 = vmatmul.msk.f32.gmra.mxu0 %vm2147_vm4, %v3013_v31  ;;  %v3016_v1 = vld [vmem:[#allocation2 + $0xa7] sm:$0xff] }
 0x2c0   : > { %v2039_v7 = vadd.f32 %v6996_v36, %v2003_v53  ;;  %v7322_v29 = vpop.f32.mrf.mxu1 }
 0x2c1   : > { %v1635_v61 = vpop.f32.mrf.mxu2 }
 0x2c2   : > { %v1689_v27 = vadd.f32 %v1635_v61, %v1535_v42  ;;  %5401 = vmatmul.msk.f32.gmra.mxu3 %vm2147_vm4, %v2741_v59  ;;  %vm2071_vm10 = vcmp.ge.f32.partialorder %v2039_v7, 0.0  ;;  %v2103_v10 = vmul.f32 0.1, %v2039_v7 }
 0x2c3   : > { %v1953_v22 = vpop.f32.mrf.mxu0  ;;  %5349 = vmatmul.msk.f32.gmra.mxu1 %vm2147_vm4, %v2303_v28 }
 0x2c4   : > { %v1847_v4 = vadd.f32 %v1793_v12, %v1689_v27  ;;  %v2135_v55 = vsel %vm2071_vm10, %v2039_v7, %v2103_v10  ;;  %v2744_v7 = vld [vmem:[#allocation2 + $0x91] sm:$0xff] }
 0x2c5   : > { %4851 = vrot.lane.b32.xlu2 %v2135_v55, %s5676_s23  ;;  %2241 = vst.msk [vmem:[#allocation2 + $0x168] sm:$0xff] %vm2147_vm4, %v2135_v55  ;;  %v1796_v62 = vpop.f32.mrf.mxu3  ;;  %v2306_v59 = vld [vmem:[#allocation2 + $0x150] sm:$0xff] }
 0x2c6   : > { %v2004_v0 = vadd.f32 %v1950_v43, %v1847_v4  ;;  %5369 = vmatmul.msk.f32.gmra.mxu2 %vm2147_vm4, %v3012_v56  ;;  %5433 = vmatmul.msk.f32.gmra.mxu0 %vm2147_vm4, %v3014_v35  ;;  %v1537_v56 = vadd.f32 %v7149_v40, %v8754_v48 }
 0x2c8   : > { %v2040_v16 = vadd.f32 %v6996_v36, %v2004_v0  ;;  %v7333_v17 = vpop.f32.mrf.mxu1  ;;  %v7371_v0 = vld [vmem:[%s8506_s2] ss:$0 sm:$0xff] }
 0x2c9   : > { %v1638_v33 = vpop.f32.mrf.mxu2 }
 0x2ca   : > { %v1690_v41 = vadd.f32 %v1638_v33, %v1536_v5  ;;  %5402 = vmatmul.msk.f32.gmra.mxu3 %vm2147_vm4, %v2742_v3  ;;  %vm2072_vm11 = vcmp.ge.f32.partialorder %v2040_v16, 0.0  ;;  %v2104_v8 = vmul.f32 0.1, %v2040_v16 }
 0x2cb   : > { %v1956_v26 = vpop.f32.mrf.mxu0  ;;  %5350 = vmatmul.msk.f32.gmra.mxu1 %vm2147_vm4, %v2304_v50 }
 0x2cc   : > { %v1848_v52 = vadd.f32 %v1796_v62, %v1690_v41  ;;  %v2136_v58 = vsel %vm2072_vm11, %v2040_v16, %v2104_v8  ;;  %v8756_v62 = vld [vmem:[#allocation25_spill] sm:$0xff]  ;;  %v2307_v3 = vld [vmem:[#allocation2 + $0x168] sm:$0xff] }
 0x2cd   : > { %2242 = vst.msk [vmem:[#allocation2 + $0x170] sm:$0xff] %vm2147_vm4, %v2136_v58  ;;  %4853 = vrot.lane.b32.xlu0 %v2136_v58, %s5676_s23  ;;  %v1799_v60 = vpop.f32.mrf.mxu3  ;;  %v2745_v16 = vld [vmem:[#allocation2 + $0xa9] sm:$0xff] }
 0x2ce   : > { %v2005_v51 = vadd.f32 %v1953_v22, %v1848_v52  ;;  %5370 = vmatmul.msk.f32.gmra.mxu2 %vm2147_vm4, %v3013_v31  ;;  %5434 = vmatmul.msk.f32.gmra.mxu0 %vm2147_vm4, %v3015_v6  ;;  %v8755_v31 = vld [vmem:[#allocation20_spill] sm:$0xff] }
 0x2cf   : > { %v1538_v53 = vadd.f32 %v7169_v30, %v8755_v31  ;;  %v7361_v30 = vld [vmem:[#allocation2 + $0xaf] sm:$0xff]  ;;  %v7380_v58 = vld [vmem:[#allocation2 + $0xc7] sm:$0xff] }
 0x2d0   : > { %v2041_v54 = vadd.f32 %v6996_v36, %v2005_v51  ;;  %v7344_v46 = vpop.f32.mrf.mxu1 }
 0x2d1   : > { %v1641_v15 = vpop.f32.mrf.mxu2 }
 0x2d2   : > { %v1691_v39 = vadd.f32 %v1641_v15, %v1537_v56  ;;  %5403 = vmatmul.msk.f32.gmra.mxu3 %vm2147_vm4, %v2743_v24  ;;  %vm2073_vm12 = vcmp.ge.f32.partialorder %v2041_v54, 0.0  ;;  %v2105_v13 = vmul.f32 0.1, %v2041_v54  ;;  %v2746_v56 = vld [vmem:[#allocation2 + $0xb1] sm:$0xff] }
 0x2d3   : > { %v1959_v43 = vpop.f32.mrf.mxu0  ;;  %5351 = vmatmul.msk.f32.gmra.mxu1 %vm2147_vm4, %v2305_v38 }
 0x2d4   : > { %v1849_v19 = vadd.f32 %v1799_v60, %v1691_v39  ;;  %v2137_v9 = vsel %vm2073_vm12, %v2041_v54, %v2105_v13  ;;  %v2308_v15 = vld [vmem:[#allocation2 + $0x170] sm:$0xff] }
 0x2d5   : > { %4855 = vrot.lane.b32.xlu1 %v2137_v9, %s5676_s23  ;;  %2243 = vst.msk [vmem:[#allocation2 + $0x188] sm:$0xff] %vm2147_vm4, %v2137_v9  ;;  %v1802_v40 = vpop.f32.mrf.mxu3  ;;  %v1541_v9 = vadd.f32 %v7222_v34, %v6858_v20  ;;  %v7412_v34 = vld [vmem:[#allocation2 + $0xe7] sm:$0xff] }
 0x2d6   : > { %v2006_v12 = vadd.f32 %v1956_v26, %v1849_v19  ;;  %5371 = vmatmul.msk.f32.gmra.mxu2 %vm2147_vm4, %v3014_v35  ;;  %5435 = vmatmul.msk.f32.gmra.mxu0 %vm2147_vm4, %v3016_v1  ;;  %v1539_v35 = vadd.f32 %v7184_v21, %v8756_v62 }
 0x2d8   : > { %v2042_v63 = vadd.f32 %v6996_v36, %v2006_v12  ;;  %v7355_v61 = vpop.f32.mrf.mxu1  ;;  %v7403_v12 = vld [vmem:[#allocation2 + $0xc9] sm:$0xff] }
 0x2d9   : > { %v1644_v42 = vpop.f32.mrf.mxu2 }
 0x2da   : > { %v1692_v28 = vadd.f32 %v1644_v42, %v1538_v53  ;;  %5404 = vmatmul.msk.f32.gmra.mxu3 %vm2147_vm4, %v2744_v7  ;;  %vm2074_vm13 = vcmp.ge.f32.partialorder %v2042_v63, 0.0  ;;  %v2106_v27 = vmul.f32 0.1, %v2042_v63 }
 0x2db   : > { %v1962_v10 = vpop.f32.mrf.mxu0  ;;  %5352 = vmatmul.msk.f32.gmra.mxu1 %vm2147_vm4, %v2306_v59 }
 0x2dc   : > { %v1850_v22 = vadd.f32 %v1802_v40, %v1692_v28  ;;  %v2138_v4 = vsel %vm2074_vm13, %v2042_v63, %v2106_v27  ;;  %v2309_v53 = vld [vmem:[#allocation2 + $0x188] sm:$0xff] }
 0x2dd   : > { %4857 = vrot.lane.b32.xlu2 %v2138_v4, %s5676_s23  ;;  %2244 = vst.msk [vmem:[#allocation2 + $0x190] sm:$0xff] %vm2147_vm4, %v2138_v4  ;;  %v1805_v36 = vpop.f32.mrf.mxu3 }
 0x2de   : > { %v2007_v55 = vadd.f32 %v1959_v43, %v1850_v22  ;;  %5372 = vmatmul.msk.f32.gmra.mxu2 %vm2147_vm4, %v3015_v6  ;;  %5436 = vmatmul.msk.f32.gmra.mxu0 %vm2147_vm4, %v7361_v30  ;;  %v1540_v6 = vadd.f32 %v7200_v11, %v6839_v45  ;;  %v7394_v11 = vld [vmem:[#allocation2 + $0xcf] sm:$0xff] }
 0x2e0   : > { %v2043_v14 = vadd.f32 %v7371_v0, %v2007_v55  ;;  %v7374_v33 = vpop.f32.mrf.mxu1 }
 0x2e1   : > { %v1647_v5 = vpop.f32.mrf.mxu2 }
 0x2e2   : > { %v1693_v50 = vadd.f32 %v1647_v5, %v1539_v35  ;;  %5405 = vmatmul.msk.f32.gmra.mxu3 %vm2147_vm4, %v2745_v16  ;;  %vm2075_vm14 = vcmp.ge.f32.partialorder %v2043_v14, 0.0  ;;  %v2107_v41 = vmul.f32 0.1, %v2043_v14 }
 0x2e3   : > { %v1965_v8 = vpop.f32.mrf.mxu0  ;;  %5353 = vmatmul.msk.f32.gmra.mxu1 %vm2147_vm4, %v2307_v3 }
 0x2e4   : > { %v1851_v26 = vadd.f32 %v1805_v36, %v1693_v50  ;;  %v2139_v21 = vsel %vm2075_vm14, %v2043_v14, %v2107_v41  ;;  %v7421_v36 = vld [vmem:[#allocation2 + $0xd1] sm:$0xff]  ;;  %v1543_v41 = vadd.f32 %v7258_v25, %v6917_v2  ;;  %v7451_v25 = vld [vmem:[#allocation2 + $0x107] sm:$0xff] }
 0x2e5   : > { %2245 = vst.msk [vmem:[#allocation2 + $0x1a8] sm:$0xff] %vm2147_vm4, %v2139_v21  ;;  %4859 = vrot.lane.b32.xlu0 %v2139_v21, %s5676_s23  ;;  %v1808_v52 = vpop.f32.mrf.mxu3  ;;  %v2310_v62 = vld [vmem:[#allocation2 + $0x190] sm:$0xff] }
 0x2e6   : > { %v2008_v60 = vadd.f32 %v1962_v10, %v1851_v26  ;;  %5373 = vmatmul.msk.f32.gmra.mxu2 %vm2147_vm4, %v3016_v1  ;;  %5437 = vmatmul.msk.f32.gmra.mxu0 %vm2147_vm4, %v7380_v58  ;;  %v1542_v10 = vadd.f32 %v7244_v44, %v6886_v23  ;;  %v7430_v44 = vld [vmem:[#allocation2 + $0xef] sm:$0xff] }
 0x2e7   : > { %v7439_v21 = vld [vmem:[#allocation2 + $0xe9] sm:$0xff] }
 0x2e8   : > { %v2044_v51 = vadd.f32 %v7371_v0, %v2008_v60  ;;  %v7388_v54 = vpop.f32.mrf.mxu1 }
 0x2e9   : > { %v1650_v48 = vpop.f32.mrf.mxu2 }
 0x2ea   : > { %v1694_v24 = vadd.f32 %v1650_v48, %v1540_v6  ;;  %5406 = vmatmul.msk.f32.gmra.mxu3 %vm2147_vm4, %v2746_v56  ;;  %vm2076_vm15 = vcmp.ge.f32.partialorder %v2044_v51, 0.0  ;;  %v2108_v38 = vmul.f32 0.1, %v2044_v51 }
 0x2eb   : > { %v1968_v39 = vpop.f32.mrf.mxu0  ;;  %5354 = vmatmul.msk.f32.gmra.mxu1 %vm2147_vm4, %v2308_v15 }
 0x2ec   : > { %v1852_v13 = vadd.f32 %v1808_v52, %v1694_v24  ;;  %v2140_v43 = vsel %vm2076_vm15, %v2044_v51, %v2108_v38  ;;  %v7443_v60 = vld [vmem:[#allocation2 + $0x1a8] sm:$0xff] }
 0x2ed   : > { %4861 = vrot.lane.b32.xlu1 %v2140_v43, %s5676_s23  ;;  %2246 = vst.msk [vmem:[#allocation2 + $0x1b0] sm:$0xff] %vm2147_vm4, %v2140_v43  ;;  %v1811_v45 = vpop.f32.mrf.mxu3  ;;  %v289_v24 = vld [vmem:[%s8507_s3 + $0x28] sm:$0xff] }
 0x2ee   : > { %v2009_v19 = vadd.f32 %v1965_v8, %v1852_v13  ;;  %5374 = vmatmul.msk.f32.gmra.mxu2 %vm2147_vm4, %v7361_v30  ;;  %5438 = vmatmul.msk.f32.gmra.mxu0 %vm2147_vm4, %v7394_v11 }
 0x2ef   : > { %3697 = vmatpush.msra.mxu2 %v289_v24 }
 0x2f0   : > { %v2045_v40 = vadd.f32 %v7371_v0, %v2009_v19  ;;  %v7405_v31 = vpop.f32.mrf.mxu1 }
 0x2f1   : > { %v1653_v1 = vpop.f32.mrf.mxu2 }
 0x2f2   : > { %v1695_v63 = vadd.f32 %v1653_v1, %v1541_v9  ;;  %5407 = vmatmul.msk.f32.gmra.mxu3 %vm2147_vm4, %v7403_v12  ;;  %vm2077_vm0 = vcmp.ge.f32.partialorder %v2045_v40, 0.0  ;;  %v2109_v42 = vmul.f32 0.1, %v2045_v40 }
 0x2f3   : > { %v1971_v7 = vpop.f32.mrf.mxu0  ;;  %5355 = vmatmul.msk.f32.gmra.mxu1 %vm2147_vm4, %v2309_v53  ;;  %v290_v53 = vld [vmem:[%s8507_s3 + $0x30] sm:$0xff] }
 0x2f4   : > { %v1853_v59 = vadd.f32 %v1811_v45, %v1695_v63  ;;  %v2141_v28 = vsel %vm2077_vm0, %v2045_v40, %v2109_v42  ;;  %v7463_v45 = vld [vmem:[#allocation2 + $0xf1] sm:$0xff]  ;;  %3971 = vmatpush.msra.mxu3 %v290_v53 }
 0x2f5   : > { %4863 = vrot.lane.b32.xlu2 %v2141_v28, %s5676_s23  ;;  %2247 = vst.msk [vmem:[#allocation2 + $0x1c8] sm:$0xff] %vm2147_vm4, %v2141_v28  ;;  %v1814_v20 = vpop.f32.mrf.mxu3  ;;  %v7467_v9 = vld [vmem:[#allocation2 + $0x1b0] sm:$0xff]  ;;  %v1545_v28 = vadd.f32 %v7284_v49, %v6969_v47  ;;  %v292_v47 = vld [vmem:[%s8507_s3 + $0x40] sm:$0xff] }
 0x2f6   : > { %v2010_v27 = vadd.f32 %v1968_v39, %v1853_v59  ;;  %5375 = vmatmul.msk.f32.gmra.mxu2 %vm2147_vm4, %v7380_v58  ;;  %5439 = vmatmul.msk.f32.gmra.mxu0 %vm2147_vm4, %v7412_v34  ;;  %v1544_v39 = vadd.f32 %v7270_v18, %v6942_v37 }
 0x2f7   : > { %4517 = vmatpush.msra.mxu1 %v292_v47  ;;  %v7563_v47 = vld [vmem:[#allocation2 + $0x14f] sm:$0xff] }
 0x2f8   : > { %v2046_v22 = vadd.f32 %v7371_v0, %v2010_v27  ;;  %v7423_v55 = vpop.f32.mrf.mxu1 }
 0x2f9   : > { %v1656_v4 = vpop.f32.mrf.mxu2 }
 0x2fa   : > { %v1696_v35 = vadd.f32 %v1656_v4, %v1542_v10  ;;  %5408 = vmatmul.msk.f32.gmra.mxu3 %vm2147_vm4, %v7421_v36  ;;  %vm2078_vm5 = vcmp.ge.f32.partialorder %v2046_v22, 0.0  ;;  %v2110_v14 = vmul.f32 0.1, %v2046_v22  ;;  %v7487_v10 = vld [vmem:[#allocation2 + $0x109] sm:$0xff] }
 0x2fb   : > { %v1974_v5 = vpop.f32.mrf.mxu0  ;;  %5356 = vmatmul.msk.f32.gmra.mxu1 %vm2147_vm4, %v2310_v62 }
 0x2fc   : > { %v1854_v16 = vadd.f32 %v1814_v20, %v1696_v35  ;;  %v2142_v3 = vsel %vm2078_vm5, %v2046_v22, %v2110_v14  ;;  %v7491_v4 = vld [vmem:[#allocation2 + $0x1c8] sm:$0xff]  ;;  %v291_v14 = vld [vmem:[%s8507_s3 + $0x38] sm:$0xff] }
 0x2fd   : > { %2248 = vst.msk [vmem:[#allocation2 + $0x1d0] sm:$0xff] %vm2147_vm4, %v2142_v3  ;;  %4865 = vrot.lane.b32.xlu0 %v2142_v3, %s5676_s23  ;;  %v1817_v23 = vpop.f32.mrf.mxu3  ;;  %4244 = vmatpush.msra.mxu0 %v291_v14 }
 0x2fe   : > { %v2011_v50 = vadd.f32 %v1971_v7, %v1854_v16  ;;  %5376 = vmatmul.msk.f32.gmra.mxu2 %vm2147_vm4, %v7394_v11  ;;  %5440 = vmatmul.msk.f32.gmra.mxu0 %vm2147_vm4, %v7430_v44  ;;  %v7478_v7 = vld [vmem:[#allocation2 + $0x10f] sm:$0xff] }
 0x300   : > { %v2047_v8 = vadd.f32 %v7371_v0, %v2011_v50  ;;  %v7441_v52 = vpop.f32.mrf.mxu1 }
 0x301   : > { %v1659_v26 = vpop.f32.mrf.mxu2 }
 0x302   : > { %v1697_v6 = vadd.f32 %v1659_v26, %v1543_v41  ;;  %5409 = vmatmul.msk.f32.gmra.mxu3 %vm2147_vm4, %v7439_v21  ;;  %vm2079_vm6 = vcmp.ge.f32.partialorder %v2047_v8, 0.0  ;;  %v2111_v51 = vmul.f32 0.1, %v2047_v8  ;;  %v7512_v26 = vld [vmem:[#allocation2 + $0x111] sm:$0xff] }
 0x303   : > { %v1977_v48 = vpop.f32.mrf.mxu0  ;;  %5357 = vmatmul.msk.f32.gmra.mxu1 %vm2147_vm4, %v7443_v60 }
 0x304   : > { %v1855_v56 = vadd.f32 %v1817_v23, %v1697_v6  ;;  %v2143_v15 = vsel %vm2079_vm6, %v2047_v8, %v2111_v51  ;;  %v7505_v23 = vld [vmem:[#allocation2 + $0x127] sm:$0xff]  ;;  %v7516_v51 = vld [vmem:[#allocation2 + $0x1d0] sm:$0xff] }
 0x305   : > { %4867 = vrot.lane.b32.xlu1 %v2143_v15, %s5676_s23  ;;  %2249 = vst.msk [vmem:[#allocation2 + $0x1e8] sm:$0xff] %vm2147_vm4, %v2143_v15  ;;  %v1820_v2 = vpop.f32.mrf.mxu3 }
 0x306   : > { %v2012_v38 = vadd.f32 %v1974_v5, %v1855_v56  ;;  %5377 = vmatmul.msk.f32.gmra.mxu2 %vm2147_vm4, %v7412_v34  ;;  %5441 = vmatmul.msk.f32.gmra.mxu0 %vm2147_vm4, %v7451_v25 }
 0x308   : > { %v2048_v13 = vadd.f32 %v7371_v0, %v2012_v38  ;;  %v7465_v19 = vpop.f32.mrf.mxu1  ;;  %v7525_v38 = vld [vmem:[#allocation2 + $0x12f] sm:$0xff] }
 0x309   : > { %v1662_v43 = vpop.f32.mrf.mxu2 }
 0x30a   : > { %v1698_v40 = vadd.f32 %v1662_v43, %v1544_v39  ;;  %5410 = vmatmul.msk.f32.gmra.mxu3 %vm2147_vm4, %v7463_v45  ;;  %vm2080_vm2 = vcmp.ge.f32.partialorder %v2048_v13, 0.0  ;;  %v2112_v1 = vmul.f32 0.1, %v2048_v13 }
 0x30b   : > { %v1980_v37 = vpop.f32.mrf.mxu0  ;;  %5358 = vmatmul.msk.f32.gmra.mxu1 %vm2147_vm4, %v7467_v9 }
 0x30c   : > { %v1856_v18 = vadd.f32 %v1820_v2, %v1698_v40  ;;  %v2144_v63 = vsel %vm2080_vm2, %v2048_v13, %v2112_v1  ;;  %v7533_v13 = vld [vmem:[#allocation2 + $0x129] sm:$0xff] }
 0x30d   : > { %4869 = vrot.lane.b32.xlu2 %v2144_v63, %s5676_s23  ;;  %2250 = vst.msk [vmem:[#allocation2 + $0x1f0] sm:$0xff] %vm2147_vm4, %v2144_v63  ;;  %v1823_v42 = vpop.f32.mrf.mxu3  ;;  %v7537_v40 = vld [vmem:[#allocation2 + $0x1e8] sm:$0xff] }
 0x30e   : > { %v2013_v59 = vadd.f32 %v1977_v48, %v1856_v18  ;;  %5378 = vmatmul.msk.f32.gmra.mxu2 %vm2147_vm4, %v7430_v44  ;;  %5442 = vmatmul.msk.f32.gmra.mxu0 %vm2147_vm4, %v7478_v7  ;;  %v7544_v63 = vld [vmem:[#allocation2 + $0x147] sm:$0xff] }
 0x310   : > { %v2049_v20 = vadd.f32 %v7371_v0, %v2013_v59  ;;  %v7489_v22 = vpop.f32.mrf.mxu1  ;;  %v7552_v59 = vld [vmem:[#allocation2 + $0x131] sm:$0xff] }
 0x311   : > { %v1665_v27 = vpop.f32.mrf.mxu2 }
 0x312   : > { %v1699_v62 = vadd.f32 %v1665_v27, %v1545_v28  ;;  %5411 = vmatmul.msk.f32.gmra.mxu3 %vm2147_vm4, %v7487_v10  ;;  %vm2081_vm1 = vcmp.ge.f32.partialorder %v2049_v20, 0.0  ;;  %v2113_v35 = vmul.f32 0.1, %v2049_v20 }
 0x313   : > { %v3153_v49 = vpop.f32.mrf.mxu0  ;;  %5359 = vmatmul.msk.f32.gmra.mxu1 %vm2147_vm4, %v7491_v4 }
 0x314   : > { %v1857_v5 = vadd.f32 %v1823_v42, %v1699_v62  ;;  %v2145_v16 = vsel %vm2081_vm1, %v2049_v20, %v2113_v35  ;;  %v7556_v20 = vld [vmem:[#allocation2 + $0x1f0] sm:$0xff] }
 0x315   : > { %2251 = vst.msk [vmem:[#allocation2 + $0x208] sm:$0xff] %vm2147_vm4, %v2145_v16  ;;  %4871 = vrot.lane.b32.xlu0 %v2145_v16, %s5676_s23  ;;  %v2880_v3 = vpop.f32.mrf.mxu3 }
 0x316   : > { %v2014_v50 = vadd.f32 %v1980_v37, %v1857_v5  ;;  %5379 = vmatmul.msk.f32.gmra.mxu2 %vm2147_vm4, %v7451_v25  ;;  %5443 = vmatmul.msk.f32.gmra.mxu0 %vm2147_vm4, %v7505_v23  ;;  %v7571_v5 = vld [vmem:[#allocation2 + $0x149] sm:$0xff] }
 0x317   : > { %8759 = vst [vmem:[#allocation29_spill] sm:$0xff] %v7571_v5 }
 0x318   : > { %v2050_v41 = vadd.f32 %v7371_v0, %v2014_v50  ;;  %v7514_v6 = vpop.f32.mrf.mxu1 }
 0x319   : > { %v2639_v8 = vpop.f32.mrf.mxu2 }
 0x31a   : > { %v2640_v48 = vadd.f32 %v2639_v8, %v7295_v32  ;;  %5412 = vmatmul.msk.f32.gmra.mxu3 %vm2147_vm4, %v7512_v26  ;;  %vm2082_vm3 = vcmp.ge.f32.partialorder %v2050_v41, 0.0  ;;  %v2114_v56 = vmul.f32 0.1, %v2050_v41 }
 0x31b   : > { %v3156_v15 = vpop.f32.mrf.mxu0  ;;  %5360 = vmatmul.msk.f32.gmra.mxu1 %vm2147_vm4, %v7516_v51 }
 0x31c   : > { %v2976_v2 = vadd.f32 %v2880_v3, %v2640_v48  ;;  %v2146_v24 = vsel %vm2082_vm3, %v2050_v41, %v2114_v56  ;;  %v3281_v41 = vld [vmem:[#allocation2 + $0x28] sm:$0xff] }
 0x31d   : > { %4873 = vrot.lane.b32.xlu1 %v2146_v24, %s5676_s23  ;;  %2252 = vst.msk [vmem:[#allocation2 + $0x210] sm:$0xff] %vm2147_vm4, %v2146_v24  ;;  %v2883_v0 = vpop.f32.mrf.mxu3  ;;  %v7579_v56 = vld [vmem:[#allocation2 + $0x167] sm:$0xff] }
 0x31e   : > { %5380 = vmatmul.msk.f32.gmra.mxu2 %vm2147_vm4, %v7478_v7  ;;  %5444 = vmatmul.msk.f32.gmra.mxu0 %vm2147_vm4, %v7525_v38  ;;  %v7531_v32 = vadd.f32 %v3153_v49, %v2976_v2  ;;  %8760 = vst [vmem:[#allocation27_spill] sm:$0xff] %v7579_v56  ;;  %v7587_v2 = vld [vmem:[#allocation2 + $0x151] sm:$0xff] }
 0x31f   : > { %8762 = vst [vmem:[#allocation31_spill] sm:$0xff] %v7587_v2 }
 0x320   : > { %v7535_v43 = vpop.f32.mrf.mxu1 }
 0x321   : > { %v2642_v39 = vpop.f32.mrf.mxu2 }
 0x322   : > { %v2643_v1 = vadd.f32 %v2642_v39, %v7310_v57  ;;  %5413 = vmatmul.msk.f32.gmra.mxu3 %vm2147_vm4, %v7533_v13 }
 0x323   : > { %v3159_v53 = vpop.f32.mrf.mxu0  ;;  %5361 = vmatmul.msk.f32.gmra.mxu1 %vm2147_vm4, %v7537_v40 }
 0x324   : > { %v2977_v37 = vadd.f32 %v2883_v0, %v2643_v1  ;;  %v3282_v1 = vld [vmem:[#allocation2 + $0x30] sm:$0xff] }
 0x325   : > { %v2886_v18 = vpop.f32.mrf.mxu3 }
 0x326   : > { %5381 = vmatmul.msk.f32.gmra.mxu2 %vm2147_vm4, %v7505_v23  ;;  %5445 = vmatmul.msk.f32.gmra.mxu0 %vm2147_vm4, %v7544_v63  ;;  %v7550_v42 = vadd.f32 %v3156_v15, %v2977_v37 }
 0x328   : > { %8757 = vst [vmem:[#allocation24_spill] sm:$0xff] %v7550_v42  ;;  %v7554_v28 = vpop.f32.mrf.mxu1  ;;  %v3554_v42 = vld [vmem:[#allocation2 + $0x29] sm:$0xff] }
 0x329   : > { %v2645_v57 = vpop.f32.mrf.mxu2 }
 0x32a   : > { %v2646_v27 = vadd.f32 %v2645_v57, %v7322_v29  ;;  %5414 = vmatmul.msk.f32.gmra.mxu3 %vm2147_vm4, %v7552_v59 }
 0x32b   : > { %v3162_v62 = vpop.f32.mrf.mxu0  ;;  %5362 = vmatmul.msk.f32.gmra.mxu1 %vm2147_vm4, %v7556_v20 }
 0x32c   : > { %v2978_v35 = vadd.f32 %v2886_v18, %v2646_v27  ;;  %v7595_v18 = vld [vmem:[#allocation2 + $0x16f] sm:$0xff] }
 0x32d   : > { %v2889_v14 = vpop.f32.mrf.mxu3  ;;  %8763 = vst [vmem:[#allocation35_spill] sm:$0xff] %v7595_v18  ;;  %v7603_v27 = vld [vmem:[#allocation2 + $0x169] sm:$0xff] }
 0x32e   : > { %5382 = vmatmul.msk.f32.gmra.mxu2 %vm2147_vm4, %v7525_v38  ;;  %5446 = vmatmul.msk.f32.gmra.mxu0 %vm2147_vm4, %v7563_v47  ;;  %v7569_v49 = vadd.f32 %v3159_v53, %v2978_v35  ;;  %8765 = vst [vmem:[#allocation34_spill] sm:$0xff] %v7603_v27 }
 0x330   : > { %8758 = vst [vmem:[#allocation28_spill] sm:$0xff] %v7569_v49  ;;  %v7573_v16 = vpop.f32.mrf.mxu1 }
 0x331   : > { %v2648_v29 = vpop.f32.mrf.mxu2 }
 0x332   : > { %v2649_v3 = vadd.f32 %v2648_v29, %v7333_v17  ;;  %5415 = vmatmul.msk.f32.gmra.mxu3 %vm2147_vm4, %v7571_v5  ;;  %v7610_v29 = vld [vmem:[#allocation2 + $0x48] sm:$0xff] }
 0x333   : > { %v3165_v50 = vpop.f32.mrf.mxu0  ;;  %5459 = vmatmul.msk.f32.vlgmr.msrb.gmra.mxu1 %vm2147_vm4, %v3281_v41 }
 0x334   : > { %v2979_v8 = vadd.f32 %v2889_v14, %v2649_v3 }
 0x335   : > { %v2892_v48 = vpop.f32.mrf.mxu3 }
 0x336   : > { %5383 = vmatmul.msk.f32.gmra.mxu2 %vm2147_vm4, %v7544_v63  ;;  %5447 = vmatmul.msk.f32.gmra.mxu0 %vm2147_vm4, %v7579_v56  ;;  %v7585_v15 = vadd.f32 %v3162_v62, %v2979_v8 }
 0x338   : > { %8761 = vst [vmem:[#allocation32_spill] sm:$0xff] %v7585_v15  ;;  %v7589_v24 = vpop.f32.mrf.mxu1 }
 0x339   : > { %v2651_v17 = vpop.f32.mrf.mxu2 }
 0x33a   : > { %v2652_v0 = vadd.f32 %v2651_v17, %v7344_v46  ;;  %5416 = vmatmul.msk.f32.gmra.mxu3 %vm2147_vm4, %v7587_v2 }
 0x33b   : > { %v3168_v39 = vpop.f32.mrf.mxu0  ;;  %5460 = vmatmul.msk.f32.gmra.mxu1 %vm2147_vm4, %v3282_v1 }
 0x33c   : > { %v2980_v53 = vadd.f32 %v2892_v48, %v2652_v0  ;;  %v7622_v48 = vld [vmem:[#allocation2 + $0x171] sm:$0xff] }
 0x33d   : > { %v2895_v37 = vpop.f32.mrf.mxu3  ;;  %8768 = vst [vmem:[#allocation9_spill] sm:$0xff] %v7622_v48 }
 0x33e   : > { %5384 = vmatmul.msk.f32.gmra.mxu2 %vm2147_vm4, %v7563_v47  ;;  %5448 = vmatmul.msk.f32.gmra.mxu0 %vm2147_vm4, %v7595_v18  ;;  %v7601_v57 = vadd.f32 %v3165_v50, %v2980_v53  ;;  %v7614_v50 = vld [vmem:[#allocation2 + $0x187] sm:$0xff]  ;;  %v7629_v53 = vld [vmem:[#allocation2 + $0x50] sm:$0xff] }
 0x33f   : > { %8766 = vst [vmem:[#allocation39_spill] sm:$0xff] %v7614_v50 }
 0x340   : > { %8764 = vst [vmem:[#allocation36_spill] sm:$0xff] %v7601_v57  ;;  %v7605_v62 = vpop.f32.mrf.mxu1 }
 0x341   : > { %v2654_v46 = vpop.f32.mrf.mxu2 }
 0x342   : > { %v2655_v35 = vadd.f32 %v2654_v46, %v7355_v61  ;;  %5417 = vmatmul.msk.f32.gmra.mxu3 %vm2147_vm4, %v7603_v27 }
 0x343   : > { %v3171_v14 = vpop.f32.mrf.mxu0  ;;  %5461 = vmatmul.msk.f32.gmra.mxu1 %vm2147_vm4, %v7610_v29 }
 0x344   : > { %v2981_v3 = vadd.f32 %v2895_v37, %v2655_v35 }
 0x345   : > { %v2898_v41 = vpop.f32.mrf.mxu3 }
 0x346   : > { %5385 = vmatmul.msk.f32.gmra.mxu2 %vm2147_vm4, %v7579_v56  ;;  %5449 = vmatmul.msk.f32.gmra.mxu0 %vm2147_vm4, %v7614_v50  ;;  %v7620_v61 = vadd.f32 %v3168_v39, %v2981_v3  ;;  %v7633_v39 = vld [vmem:[#allocation2 + $0x18f] sm:$0xff] }
 0x347   : > { %8769 = vst [vmem:[#allocation43_spill] sm:$0xff] %v7633_v39  ;;  %v7641_v3 = vld [vmem:[#allocation2 + $0x189] sm:$0xff] }
 0x348   : > { %8767 = vst [vmem:[#allocation38_spill] sm:$0xff] %v7620_v61  ;;  %v7624_v17 = vpop.f32.mrf.mxu1  ;;  %v7648_v61 = vld [vmem:[#allocation2 + $0x68] sm:$0xff] }
 0x349   : > { %v2657_v8 = vpop.f32.mrf.mxu2  ;;  %8771 = vst [vmem:[#allocation12_spill] sm:$0xff] %v7641_v3 }
 0x34a   : > { %v2658_v0 = vadd.f32 %v2657_v8, %v7374_v33  ;;  %5418 = vmatmul.msk.f32.gmra.mxu3 %vm2147_vm4, %v7622_v48 }
 0x34b   : > { %v3174_v1 = vpop.f32.mrf.mxu0  ;;  %5462 = vmatmul.msk.f32.gmra.mxu1 %vm2147_vm4, %v7629_v53 }
 0x34c   : > { %v2982_v37 = vadd.f32 %v2898_v41, %v2658_v0 }
 0x34d   : > { %v2901_v46 = vpop.f32.mrf.mxu3 }
 0x34e   : > { %5386 = vmatmul.msk.f32.gmra.mxu2 %vm2147_vm4, %v7595_v18  ;;  %5450 = vmatmul.msk.f32.gmra.mxu0 %vm2147_vm4, %v7633_v39  ;;  %v7639_v33 = vadd.f32 %v3171_v14, %v2982_v37  ;;  %v7652_v14 = vld [vmem:[#allocation2 + $0x1a7] sm:$0xff] }
 0x34f   : > { %8772 = vst [vmem:[#allocation44_spill] sm:$0xff] %v7652_v14 }
 0x350   : > { %8770 = vst [vmem:[#allocation42_spill] sm:$0xff] %v7639_v33  ;;  %v7643_v8 = vpop.f32.mrf.mxu1 }
 0x351   : > { %v2660_v35 = vpop.f32.mrf.mxu2 }
 0x352   : > { %v2661_v41 = vadd.f32 %v2660_v35, %v7388_v54  ;;  %5419 = vmatmul.msk.f32.gmra.mxu3 %vm2147_vm4, %v7641_v3  ;;  %v7660_v35 = vld [vmem:[#allocation2 + $0x191] sm:$0xff] }
 0x353   : > { %v3177_v0 = vpop.f32.mrf.mxu0  ;;  %5463 = vmatmul.msk.f32.gmra.mxu1 %vm2147_vm4, %v7648_v61  ;;  %8774 = vst [vmem:[#allocation46_spill] sm:$0xff] %v7660_v35  ;;  %v7667_v3 = vld [vmem:[#allocation2 + $0x70] sm:$0xff] }
 0x354   : > { %v2983_v48 = vadd.f32 %v2901_v46, %v2661_v41 }
 0x355   : > { %v2904_v57 = vpop.f32.mrf.mxu3 }
 0x356   : > { %5387 = vmatmul.msk.f32.gmra.mxu2 %vm2147_vm4, %v7614_v50  ;;  %5451 = vmatmul.msk.f32.gmra.mxu0 %vm2147_vm4, %v7652_v14  ;;  %v7658_v54 = vadd.f32 %v3174_v1, %v2983_v48  ;;  %v7671_v48 = vld [vmem:[#allocation2 + $0x1af] sm:$0xff] }
 0x357   : > { %8775 = vst [vmem:[#allocation45_spill] sm:$0xff] %v7671_v48 }
 0x358   : > { %8773 = vst [vmem:[#allocation16_spill] sm:$0xff] %v7658_v54  ;;  %v7662_v33 = vpop.f32.mrf.mxu1 }
 0x359   : > { %v2663_v37 = vpop.f32.mrf.mxu2 }
 0x35a   : > { %v2664_v46 = vadd.f32 %v2663_v37, %v7405_v31  ;;  %5420 = vmatmul.msk.f32.gmra.mxu3 %vm2147_vm4, %v7660_v35  ;;  %v7679_v37 = vld [vmem:[#allocation2 + $0x1a9] sm:$0xff] }
 0x35b   : > { %v3180_v41 = vpop.f32.mrf.mxu0  ;;  %5464 = vmatmul.msk.f32.gmra.mxu1 %vm2147_vm4, %v7667_v3  ;;  %8777 = vst [vmem:[#allocation47_spill] sm:$0xff] %v7679_v37  ;;  %v7686_v35 = vld [vmem:[#allocation2 + $0x88] sm:$0xff] }
 0x35c   : > { %v2984_v27 = vadd.f32 %v2904_v57, %v2664_v46 }
 0x35d   : > { %v2907_v50 = vpop.f32.mrf.mxu3 }
 0x35e   : > { %5388 = vmatmul.msk.f32.gmra.mxu2 %vm2147_vm4, %v7633_v39  ;;  %5452 = vmatmul.msk.f32.gmra.mxu0 %vm2147_vm4, %v7671_v48  ;;  %v7677_v31 = vadd.f32 %v3177_v0, %v2984_v27  ;;  %v7690_v27 = vld [vmem:[#allocation2 + $0x1c7] sm:$0xff] }
 0x35f   : > { %8778 = vst [vmem:[#allocation23_spill] sm:$0xff] %v7690_v27 }
 0x360   : > { %8776 = vst [vmem:[#allocation19_spill] sm:$0xff] %v7677_v31  ;;  %v7681_v54 = vpop.f32.mrf.mxu1 }
 0x361   : > { %v2666_v1 = vpop.f32.mrf.mxu2 }
 0x362   : > { %v2667_v57 = vadd.f32 %v2666_v1, %v7423_v55  ;;  %5421 = vmatmul.msk.f32.gmra.mxu3 %vm2147_vm4, %v7679_v37  ;;  %v7698_v1 = vld [vmem:[#allocation2 + $0x1b1] sm:$0xff] }
 0x363   : > { %v3183_v46 = vpop.f32.mrf.mxu0  ;;  %5465 = vmatmul.msk.f32.gmra.mxu1 %vm2147_vm4, %v7686_v35  ;;  %8780 = vst [vmem:[#allocation48_spill] sm:$0xff] %v7698_v1  ;;  %v7705_v37 = vld [vmem:[#allocation2 + $0x90] sm:$0xff] }
 0x364   : > { %v2985_v15 = vadd.f32 %v2907_v50, %v2667_v57 }
 0x365   : > { %v2910_v39 = vpop.f32.mrf.mxu3 }
 0x366   : > { %5389 = vmatmul.msk.f32.gmra.mxu2 %vm2147_vm4, %v7652_v14  ;;  %5453 = vmatmul.msk.f32.gmra.mxu0 %vm2147_vm4, %v7690_v27  ;;  %v7696_v55 = vadd.f32 %v3180_v41, %v2985_v15  ;;  %v7709_v15 = vld [vmem:[#allocation2 + $0x1cf] sm:$0xff] }
 0x367   : > { %8781 = vst [vmem:[#allocation26_spill] sm:$0xff] %v7709_v15 }
 0x368   : > { %8779 = vst [vmem:[#allocation49_spill] sm:$0xff] %v7696_v55  ;;  %v7700_v31 = vpop.f32.mrf.mxu1 }
 0x369   : > { %v2669_v0 = vpop.f32.mrf.mxu2 }
 0x36a   : > { %v2670_v50 = vadd.f32 %v2669_v0, %v7441_v52  ;;  %5422 = vmatmul.msk.f32.gmra.mxu3 %vm2147_vm4, %v7698_v1  ;;  %v7717_v0 = vld [vmem:[#allocation2 + $0x1c9] sm:$0xff] }
 0x36b   : > { %v3186_v57 = vpop.f32.mrf.mxu0  ;;  %5466 = vmatmul.msk.f32.gmra.mxu1 %vm2147_vm4, %v7705_v37  ;;  %8783 = vst [vmem:[#allocation30_spill] sm:$0xff] %v7717_v0  ;;  %v7724_v1 = vld [vmem:[#allocation2 + $0xa8] sm:$0xff] }
 0x36c   : > { %v2986_v2 = vadd.f32 %v2910_v39, %v2670_v50 }
 0x36d   : > { %v2913_v14 = vpop.f32.mrf.mxu3 }
 0x36e   : > { %5390 = vmatmul.msk.f32.gmra.mxu2 %vm2147_vm4, %v7671_v48  ;;  %5454 = vmatmul.msk.f32.gmra.mxu0 %vm2147_vm4, %v7709_v15  ;;  %v7715_v52 = vadd.f32 %v3183_v46, %v2986_v2  ;;  %v7728_v2 = vld [vmem:[#allocation2 + $0x1e7] sm:$0xff] }
 0x36f   : > { %8784 = vst [vmem:[#allocation52_spill] sm:$0xff] %v7728_v2 }
 0x370   : > { %8782 = vst [vmem:[#allocation50_spill] sm:$0xff] %v7715_v52  ;;  %v7719_v55 = vpop.f32.mrf.mxu1 }
 0x371   : > { %v2672_v41 = vpop.f32.mrf.mxu2 }
 0x372   : > { %v2673_v39 = vadd.f32 %v2672_v41, %v7465_v19  ;;  %5423 = vmatmul.msk.f32.gmra.mxu3 %vm2147_vm4, %v7717_v0  ;;  %v7736_v41 = vld [vmem:[#allocation2 + $0x1d1] sm:$0xff] }
 0x373   : > { %v3189_v50 = vpop.f32.mrf.mxu0  ;;  %5467 = vmatmul.msk.f32.gmra.mxu1 %vm2147_vm4, %v7724_v1  ;;  %8786 = vst [vmem:[#allocation33_spill] sm:$0xff] %v7736_v41  ;;  %v7743_v0 = vld [vmem:[#allocation2 + $0xb0] sm:$0xff] }
 0x374   : > { %v2987_v18 = vadd.f32 %v2913_v14, %v2673_v39 }
 0x375   : > { %v2916_v48 = vpop.f32.mrf.mxu3 }
 0x376   : > { %5391 = vmatmul.msk.f32.gmra.mxu2 %vm2147_vm4, %v7690_v27  ;;  %5455 = vmatmul.msk.f32.gmra.mxu0 %vm2147_vm4, %v7728_v2  ;;  %v7734_v19 = vadd.f32 %v3186_v57, %v2987_v18  ;;  %v7747_v18 = vld [vmem:[#allocation2 + $0x1ef] sm:$0xff] }
 0x377   : > { %8787 = vst [vmem:[#allocation53_spill] sm:$0xff] %v7747_v18 }
 0x378   : > { %8785 = vst [vmem:[#allocation51_spill] sm:$0xff] %v7734_v19  ;;  %v7738_v52 = vpop.f32.mrf.mxu1 }
 0x379   : > { %v2675_v46 = vpop.f32.mrf.mxu2 }
 0x37a   : > { %v2676_v14 = vadd.f32 %v2675_v46, %v7489_v22  ;;  %5424 = vmatmul.msk.f32.gmra.mxu3 %vm2147_vm4, %v7736_v41  ;;  %v7755_v46 = vld [vmem:[#allocation2 + $0x1e9] sm:$0xff] }
 0x37b   : > { %v3192_v39 = vpop.f32.mrf.mxu0  ;;  %5468 = vmatmul.msk.f32.gmra.mxu1 %vm2147_vm4, %v7743_v0  ;;  %8789 = vst [vmem:[#allocation55_spill] sm:$0xff] %v7755_v46  ;;  %v7762_v41 = vld [vmem:[#allocation2 + $0xc8] sm:$0xff] }
 0x37c   : > { %v2988_v49 = vadd.f32 %v2916_v48, %v2676_v14 }
 0x37d   : > { %v2919_v27 = vpop.f32.mrf.mxu3 }
 0x37e   : > { %5392 = vmatmul.msk.f32.gmra.mxu2 %vm2147_vm4, %v7709_v15  ;;  %5456 = vmatmul.msk.f32.gmra.mxu0 %vm2147_vm4, %v7747_v18  ;;  %v7753_v22 = vadd.f32 %v3189_v50, %v2988_v49  ;;  %v7766_v49 = vld [vmem:[#allocation2 + $0x207] sm:$0xff] }
 0x37f   : > { %8790 = vst [vmem:[#allocation54_spill] sm:$0xff] %v7766_v49 }
 0x380   : > { %8788 = vst [vmem:[#allocation37_spill] sm:$0xff] %v7753_v22  ;;  %v7757_v19 = vpop.f32.mrf.mxu1 }
 0x381   : > { %v2678_v57 = vpop.f32.mrf.mxu2 }
 0x382   : > { %v2679_v48 = vadd.f32 %v2678_v57, %v7514_v6  ;;  %5425 = vmatmul.msk.f32.gmra.mxu3 %vm2147_vm4, %v7755_v46  ;;  %v7774_v57 = vld [vmem:[#allocation2 + $0x1f1] sm:$0xff] }
 0x383   : > { %v3195_v14 = vpop.f32.mrf.mxu0  ;;  %5469 = vmatmul.msk.f32.gmra.mxu1 %vm2147_vm4, %v7762_v41  ;;  %8792 = vst [vmem:[#allocation57_spill] sm:$0xff] %v7774_v57  ;;  %v7781_v46 = vld [vmem:[#allocation2 + $0xd0] sm:$0xff] }
 0x384   : > { %v2989_v5 = vadd.f32 %v2919_v27, %v2679_v48 }
 0x385   : > { %v2922_v15 = vpop.f32.mrf.mxu3 }
 0x386   : > { %5393 = vmatmul.msk.f32.gmra.mxu2 %vm2147_vm4, %v7728_v2  ;;  %5457 = vmatmul.msk.f32.gmra.mxu0 %vm2147_vm4, %v7766_v49  ;;  %v7772_v6 = vadd.f32 %v3192_v39, %v2989_v5  ;;  %v7785_v5 = vld [vmem:[#allocation2 + $0x20f] sm:$0xff] }
 0x387   : > { %8793 = vst [vmem:[#allocation56_spill] sm:$0xff] %v7785_v5 }
 0x388   : > { %8791 = vst [vmem:[#allocation40_spill] sm:$0xff] %v7772_v6  ;;  %v7776_v22 = vpop.f32.mrf.mxu1 }
 0x389   : > { %v2681_v50 = vpop.f32.mrf.mxu2 }
 0x38a   : > { %v2682_v27 = vadd.f32 %v2681_v50, %v7535_v43  ;;  %5426 = vmatmul.msk.f32.gmra.mxu3 %vm2147_vm4, %v7774_v57  ;;  %v3828_v50 = vld [vmem:[#allocation2 + $0x47] sm:$0xff] }
 0x38b   : > { %v3198_v48 = vpop.f32.mrf.mxu0  ;;  %5470 = vmatmul.msk.f32.gmra.mxu1 %vm2147_vm4, %v7781_v46  ;;  %v7797_v57 = vld [vmem:[#allocation2 + $0xe8] sm:$0xff] }
 0x38c   : > { %v2990_v56 = vadd.f32 %v2922_v15, %v2682_v27 }
 0x38d   : > { %v2925_v49 = vpop.f32.mrf.mxu3 }
 0x38e   : > { %5394 = vmatmul.msk.f32.gmra.mxu2 %vm2147_vm4, %v7747_v18  ;;  %5458 = vmatmul.msk.f32.gmra.mxu0 %vm2147_vm4, %v7785_v5  ;;  %v7791_v43 = vadd.f32 %v3195_v14, %v2990_v56  ;;  %v3555_v5 = vld [vmem:[#allocation2 + $0x31] sm:$0xff] }
 0x390   : > { %8794 = vst [vmem:[#allocation3_spill] sm:$0xff] %v7791_v43  ;;  %v7793_v6 = vpop.f32.mrf.mxu1 }
 0x391   : > { %v2684_v39 = vpop.f32.mrf.mxu2 }
 0x392   : > { %v2685_v15 = vadd.f32 %v2684_v39, %v7554_v28  ;;  %5523 = vmatmul.msk.f32.vlgmr.msra.gmra.mxu3 %vm2147_vm4, %v3828_v50  ;;  %v3829_v28 = vld [vmem:[#allocation2 + $0x4f] sm:$0xff] }
 0x393   : > { %v3201_v27 = vpop.f32.mrf.mxu0  ;;  %5471 = vmatmul.msk.f32.gmra.mxu1 %vm2147_vm4, %v7797_v57 }
 0x394   : > { %v2991_v2 = vadd.f32 %v2925_v49, %v2685_v15  ;;  %v7810_v15 = vld [vmem:[#allocation2 + $0xf0] sm:$0xff] }
 0x395   : > { %v2928_v18 = vpop.f32.mrf.mxu3 }
 0x396   : > { %5491 = vmatmul.msk.f32.vlgmr.msra.gmra.mxu2 %vm2147_vm4, %v3554_v42  ;;  %5555 = vmatmul.msk.f32.vlgmr.msra.gmra.mxu0 %vm2147_vm4, %v7610_v29  ;;  %v7804_v56 = vadd.f32 %v3198_v48, %v2991_v2 }
 0x398   : > { %8795 = vst [vmem:[#allocation59_spill] sm:$0xff] %v7804_v56  ;;  %v7806_v39 = vpop.f32.mrf.mxu1  ;;  %v7827_v56 = vld [vmem:[#allocation2 + $0x49] sm:$0xff] }
 0x399   : > { %v2687_v14 = vpop.f32.mrf.mxu2  ;;  %8797 = vst [vmem:[#allocation4_spill] sm:$0xff] %v7827_v56 }
 0x39a   : > { %v2688_v50 = vadd.f32 %v2687_v14, %v7573_v16  ;;  %5524 = vmatmul.msk.f32.gmra.mxu3 %vm2147_vm4, %v3829_v28  ;;  %v3830_v16 = vld [vmem:[#allocation2 + $0x67] sm:$0xff] }
 0x39b   : > { %v3204_v49 = vpop.f32.mrf.mxu0  ;;  %5472 = vmatmul.msk.f32.gmra.mxu1 %vm2147_vm4, %v7810_v15  ;;  %v7823_v28 = vld [vmem:[#allocation2 + $0x108] sm:$0xff] }
 0x39c   : > { %v2992_v43 = vadd.f32 %v2928_v18, %v2688_v50 }
 0x39d   : > { %v2931_v42 = vpop.f32.mrf.mxu3 }
 0x39e   : > { %5492 = vmatmul.msk.f32.gmra.mxu2 %vm2147_vm4, %v3555_v5  ;;  %5556 = vmatmul.msk.f32.gmra.mxu0 %vm2147_vm4, %v7629_v53  ;;  %v7817_v29 = vadd.f32 %v3201_v27, %v2992_v43  ;;  %v3831_v43 = vld [vmem:[#allocation2 + $0x6f] sm:$0xff] }
 0x3a0   : > { %8796 = vst [vmem:[#allocation58_spill] sm:$0xff] %v7817_v29  ;;  %v7819_v48 = vpop.f32.mrf.mxu1 }
 0x3a1   : > { %v2690_v2 = vpop.f32.mrf.mxu2 }
 0x3a2   : > { %v2691_v14 = vadd.f32 %v2690_v2, %v7589_v24  ;;  %5525 = vmatmul.msk.f32.gmra.mxu3 %vm2147_vm4, %v3830_v16  ;;  %v7839_v16 = vld [vmem:[#allocation2 + $0x110] sm:$0xff] }
 0x3a3   : > { %v3207_v18 = vpop.f32.mrf.mxu0  ;;  %5473 = vmatmul.msk.f32.gmra.mxu1 %vm2147_vm4, %v7823_v28 }
 0x3a4   : > { %v2993_v50 = vadd.f32 %v2931_v42, %v2691_v14 }
 0x3a5   : > { %v2934_v5 = vpop.f32.mrf.mxu3 }
 0x3a6   : > { %5493 = vmatmul.msk.f32.gmra.mxu2 %vm2147_vm4, %v7827_v56  ;;  %5557 = vmatmul.msk.f32.gmra.mxu0 %vm2147_vm4, %v7648_v61  ;;  %v7833_v53 = vadd.f32 %v3204_v49, %v2993_v50  ;;  %v7843_v56 = vld [vmem:[#allocation2 + $0x51] sm:$0xff]  ;;  %v3832_v49 = vld [vmem:[#allocation2 + $0x87] sm:$0xff] }
 0x3a7   : > { %8799 = vst [vmem:[#allocation5_spill] sm:$0xff] %v7843_v56 }
 0x3a8   : > { %8798 = vst [vmem:[#allocation60_spill] sm:$0xff] %v7833_v53  ;;  %v7835_v27 = vpop.f32.mrf.mxu1 }
 0x3a9   : > { %v2693_v24 = vpop.f32.mrf.mxu2 }
 0x3aa   : > { %v2694_v42 = vadd.f32 %v2693_v24, %v7605_v62  ;;  %5526 = vmatmul.msk.f32.gmra.mxu3 %vm2147_vm4, %v3831_v43  ;;  %v7855_v43 = vld [vmem:[#allocation2 + $0x128] sm:$0xff] }
 0x3ab   : > { %v3210_v2 = vpop.f32.mrf.mxu0  ;;  %5474 = vmatmul.msk.f32.gmra.mxu1 %vm2147_vm4, %v7839_v16 }
 0x3ac   : > { %v2994_v14 = vadd.f32 %v2934_v5, %v2694_v42 }
 0x3ad   : > { %v2937_v29 = vpop.f32.mrf.mxu3 }
 0x3ae   : > { %5494 = vmatmul.msk.f32.gmra.mxu2 %vm2147_vm4, %v7843_v56  ;;  %5558 = vmatmul.msk.f32.gmra.mxu0 %vm2147_vm4, %v7667_v3  ;;  %v7849_v61 = vadd.f32 %v3207_v18, %v2994_v14  ;;  %v7859_v56 = vld [vmem:[#allocation2 + $0x69] sm:$0xff] }
 0x3af   : > { %8801 = vst [vmem:[#allocation62_spill] sm:$0xff] %v7859_v56  ;;  %v3833_v18 = vld [vmem:[#allocation2 + $0x8f] sm:$0xff] }
 0x3b0   : > { %8800 = vst [vmem:[#allocation61_spill] sm:$0xff] %v7849_v61  ;;  %v7851_v50 = vpop.f32.mrf.mxu1 }
 0x3b1   : > { %v2696_v62 = vpop.f32.mrf.mxu2 }
 0x3b2   : > { %v2697_v5 = vadd.f32 %v2696_v62, %v7624_v17  ;;  %5527 = vmatmul.msk.f32.gmra.mxu3 %vm2147_vm4, %v3832_v49  ;;  %v7871_v49 = vld [vmem:[#allocation2 + $0x130] sm:$0xff] }
 0x3b3   : > { %v3213_v24 = vpop.f32.mrf.mxu0  ;;  %5475 = vmatmul.msk.f32.gmra.mxu1 %vm2147_vm4, %v7855_v43 }
 0x3b4   : > { %v2995_v42 = vadd.f32 %v2937_v29, %v2697_v5 }
 0x3b5   : > { %v2940_v53 = vpop.f32.mrf.mxu3 }
 0x3b6   : > { %5495 = vmatmul.msk.f32.gmra.mxu2 %vm2147_vm4, %v7859_v56  ;;  %5559 = vmatmul.msk.f32.gmra.mxu0 %vm2147_vm4, %v7686_v35  ;;  %v7865_v3 = vadd.f32 %v3210_v2, %v2995_v42  ;;  %v7875_v56 = vld [vmem:[#allocation2 + $0x71] sm:$0xff]  ;;  %v3834_v2 = vld [vmem:[#allocation2 + $0xa7] sm:$0xff] }
 0x3b7   : > { %8803 = vst [vmem:[#allocation7_spill] sm:$0xff] %v7875_v56 }
 0x3b8   : > { %8802 = vst [vmem:[#allocation63_spill] sm:$0xff] %v7865_v3  ;;  %v7867_v14 = vpop.f32.mrf.mxu1 }
 0x3b9   : > { %v2699_v17 = vpop.f32.mrf.mxu2 }
 0x3ba   : > { %v2700_v29 = vadd.f32 %v2699_v17, %v7643_v8  ;;  %5528 = vmatmul.msk.f32.gmra.mxu3 %vm2147_vm4, %v3833_v18  ;;  %v7887_v18 = vld [vmem:[#allocation2 + $0x148] sm:$0xff] }
 0x3bb   : > { %v3216_v62 = vpop.f32.mrf.mxu0  ;;  %5476 = vmatmul.msk.f32.gmra.mxu1 %vm2147_vm4, %v7871_v49 }
 0x3bc   : > { %v2996_v5 = vadd.f32 %v2940_v53, %v2700_v29 }
 0x3bd   : > { %v2943_v61 = vpop.f32.mrf.mxu3 }
 0x3be   : > { %5496 = vmatmul.msk.f32.gmra.mxu2 %vm2147_vm4, %v7875_v56  ;;  %5560 = vmatmul.msk.f32.gmra.mxu0 %vm2147_vm4, %v7705_v37  ;;  %v7881_v35 = vadd.f32 %v3213_v24, %v2996_v5  ;;  %v7891_v56 = vld [vmem:[#allocation2 + $0x89] sm:$0xff] }
 0x3c0   : > { %8804 = vst [vmem:[#allocation8_spill] sm:$0xff] %v7881_v35  ;;  %v7883_v42 = vpop.f32.mrf.mxu1  ;;  %v7908_v35 = vld [vmem:[#allocation2 + $0x91] sm:$0xff] }
 0x3c1   : > { %v2702_v8 = vpop.f32.mrf.mxu2 }
 0x3c2   : > { %v2703_v53 = vadd.f32 %v2702_v8, %v7662_v33  ;;  %5529 = vmatmul.msk.f32.gmra.mxu3 %vm2147_vm4, %v3834_v2  ;;  %v7904_v8 = vld [vmem:[#allocation2 + $0x150] sm:$0xff] }
 0x3c3   : > { %v3219_v17 = vpop.f32.mrf.mxu0  ;;  %5477 = vmatmul.msk.f32.gmra.mxu1 %vm2147_vm4, %v7887_v18 }
 0x3c4   : > { %v2997_v29 = vadd.f32 %v2943_v61, %v2703_v53 }
 0x3c5   : > { %v2946_v3 = vpop.f32.mrf.mxu3 }
 0x3c6   : > { %5497 = vmatmul.msk.f32.gmra.mxu2 %vm2147_vm4, %v7891_v56  ;;  %5561 = vmatmul.msk.f32.gmra.mxu0 %vm2147_vm4, %v7724_v1  ;;  %v7897_v37 = vadd.f32 %v3216_v62, %v2997_v29  ;;  %v7921_v29 = vld [vmem:[#allocation2 + $0x168] sm:$0xff] }
 0x3c8   : > { %8805 = vst [vmem:[#allocation6_spill] sm:$0xff] %v7897_v37  ;;  %v7899_v24 = vpop.f32.mrf.mxu1  ;;  %v7925_v37 = vld [vmem:[#allocation2 + $0xa9] sm:$0xff] }
 0x3c9   : > { %v2705_v33 = vpop.f32.mrf.mxu2 }
 0x3ca   : > { %v2706_v5 = vadd.f32 %v2705_v33, %v7681_v54  ;;  %5530 = vmatmul.msk.f32.gmra.mxu3 %vm2147_vm4, %v7361_v30 }
 0x3cb   : > { %v3222_v61 = vpop.f32.mrf.mxu0  ;;  %5478 = vmatmul.msk.f32.gmra.mxu1 %vm2147_vm4, %v7904_v8 }
 0x3cc   : > { %v2998_v2 = vadd.f32 %v2946_v3, %v2706_v5 }
 0x3cd   : > { %v2949_v53 = vpop.f32.mrf.mxu3 }
 0x3ce   : > { %5498 = vmatmul.msk.f32.gmra.mxu2 %vm2147_vm4, %v7908_v35  ;;  %5562 = vmatmul.msk.f32.gmra.mxu0 %vm2147_vm4, %v7743_v0  ;;  %v7914_v54 = vadd.f32 %v3219_v17, %v2998_v2 }
 0x3d0   : > { %8806 = vst [vmem:[#allocation11_spill] sm:$0xff] %v7914_v54  ;;  %v7916_v30 = vpop.f32.mrf.mxu1  ;;  %v7942_v54 = vld [vmem:[#allocation2 + $0xb1] sm:$0xff] }
 0x3d1   : > { %v2708_v1 = vpop.f32.mrf.mxu2 }
 0x3d2   : > { %v2709_v62 = vadd.f32 %v2708_v1, %v7700_v31  ;;  %5531 = vmatmul.msk.f32.gmra.mxu3 %vm2147_vm4, %v7380_v58 }
 0x3d3   : > { %v3225_v3 = vpop.f32.mrf.mxu0  ;;  %5479 = vmatmul.msk.f32.gmra.mxu1 %vm2147_vm4, %v7921_v29 }
 0x3d4   : > { %v2999_v33 = vadd.f32 %v2949_v53, %v2709_v62  ;;  %v7938_v53 = vld [vmem:[#allocation2 + $0x170] sm:$0xff] }
 0x3d5   : > { %v2952_v5 = vpop.f32.mrf.mxu3 }
 0x3d6   : > { %5499 = vmatmul.msk.f32.gmra.mxu2 %vm2147_vm4, %v7925_v37  ;;  %5563 = vmatmul.msk.f32.gmra.mxu0 %vm2147_vm4, %v7762_v41  ;;  %v7931_v31 = vadd.f32 %v3222_v61, %v2999_v33 }
 0x3d8   : > { %v7933_v58 = vpop.f32.mrf.mxu1 }
 0x3d9   : > { %v2711_v0 = vpop.f32.mrf.mxu2 }
 0x3da   : > { %v2712_v17 = vadd.f32 %v2711_v0, %v7719_v55  ;;  %5532 = vmatmul.msk.f32.gmra.mxu3 %vm2147_vm4, %v7394_v11 }
 0x3db   : > { %v3228_v2 = vpop.f32.mrf.mxu0  ;;  %5480 = vmatmul.msk.f32.gmra.mxu1 %vm2147_vm4, %v7938_v53 }
 0x3dc   : > { %v3000_v1 = vadd.f32 %v2952_v5, %v2712_v17  ;;  %v7955_v5 = vld [vmem:[#allocation2 + $0x188] sm:$0xff] }
 0x3dd   : > { %v2955_v62 = vpop.f32.mrf.mxu3 }
 0x3de   : > { %5500 = vmatmul.msk.f32.gmra.mxu2 %vm2147_vm4, %v7942_v54  ;;  %5564 = vmatmul.msk.f32.gmra.mxu0 %vm2147_vm4, %v7781_v46  ;;  %v7948_v55 = vadd.f32 %v3225_v3, %v3000_v1 }
 0x3e0   : > { %v7950_v11 = vpop.f32.mrf.mxu1 }
 0x3e1   : > { %v2714_v41 = vpop.f32.mrf.mxu2 }
 0x3e2   : > { %v2715_v61 = vadd.f32 %v2714_v41, %v7738_v52  ;;  %5533 = vmatmul.msk.f32.gmra.mxu3 %vm2147_vm4, %v7412_v34 }
 0x3e3   : > { %v3231_v33 = vpop.f32.mrf.mxu0  ;;  %5481 = vmatmul.msk.f32.gmra.mxu1 %vm2147_vm4, %v7955_v5 }
 0x3e4   : > { %v3001_v0 = vadd.f32 %v2955_v62, %v2715_v61  ;;  %v7970_v62 = vld [vmem:[#allocation2 + $0x190] sm:$0xff] }
 0x3e5   : > { %v2958_v17 = vpop.f32.mrf.mxu3 }
 0x3e6   : > { %5501 = vmatmul.msk.f32.gmra.mxu2 %vm2147_vm4, %v7403_v12  ;;  %5565 = vmatmul.msk.f32.gmra.mxu0 %vm2147_vm4, %v7797_v57  ;;  %v7963_v46 = vadd.f32 %v3228_v2, %v3001_v0 }
 0x3e8   : > { %v7965_v3 = vpop.f32.mrf.mxu1 }
 0x3e9   : > { %v2717_v52 = vpop.f32.mrf.mxu2 }
 0x3ea   : > { %v2718_v34 = vadd.f32 %v2717_v52, %v7757_v19  ;;  %5534 = vmatmul.msk.f32.gmra.mxu3 %vm2147_vm4, %v7430_v44 }
 0x3eb   : > { %v3234_v1 = vpop.f32.mrf.mxu0  ;;  %5482 = vmatmul.msk.f32.gmra.mxu1 %vm2147_vm4, %v7970_v62 }
 0x3ec   : > { %v3002_v41 = vadd.f32 %v2958_v17, %v2718_v34 }
 0x3ed   : > { %v2961_v12 = vpop.f32.mrf.mxu3 }
 0x3ee   : > { %5502 = vmatmul.msk.f32.gmra.mxu2 %vm2147_vm4, %v7421_v36  ;;  %5566 = vmatmul.msk.f32.gmra.mxu0 %vm2147_vm4, %v7810_v15  ;;  %v7978_v57 = vadd.f32 %v3231_v33, %v3002_v41 }
 0x3f0   : > { %v7980_v2 = vpop.f32.mrf.mxu1 }
 0x3f1   : > { %v2720_v19 = vpop.f32.mrf.mxu2 }
 0x3f2   : > { %v2721_v44 = vadd.f32 %v2720_v19, %v7776_v22  ;;  %5535 = vmatmul.msk.f32.gmra.mxu3 %vm2147_vm4, %v7451_v25 }
 0x3f3   : > { %v3237_v61 = vpop.f32.mrf.mxu0  ;;  %5483 = vmatmul.msk.f32.gmra.mxu1 %vm2147_vm4, %v7443_v60 }
 0x3f4   : > { %v3003_v0 = vadd.f32 %v2961_v12, %v2721_v44 }
 0x3f5   : > { %v2964_v17 = vpop.f32.mrf.mxu3 }
 0x3f6   : > { %5503 = vmatmul.msk.f32.gmra.mxu2 %vm2147_vm4, %v7439_v21  ;;  %5567 = vmatmul.msk.f32.gmra.mxu0 %vm2147_vm4, %v7823_v28  ;;  %v7991_v36 = vadd.f32 %v3234_v1, %v3003_v0 }
 0x3f8   : > { %v7993_v33 = vpop.f32.mrf.mxu1 }
 0x3f9   : > { %v2723_v15 = vpop.f32.mrf.mxu2 }
 0x3fa   : > { %v2724_v22 = vadd.f32 %v2723_v15, %v7793_v6  ;;  %5536 = vmatmul.msk.f32.gmra.mxu3 %vm2147_vm4, %v7478_v7 }
 0x3fb   : > { %v3240_v25 = vpop.f32.mrf.mxu0  ;;  %5484 = vmatmul.msk.f32.gmra.mxu1 %vm2147_vm4, %v7467_v9 }
 0x3fc   : > { %v3004_v52 = vadd.f32 %v2964_v17, %v2724_v22  ;;  %v8808_v22 = vld [vmem:[#allocation27_spill] sm:$0xff] }
 0x3fd   : > { %v2967_v60 = vpop.f32.mrf.mxu3 }
 0x3fe   : > { %5504 = vmatmul.msk.f32.gmra.mxu2 %vm2147_vm4, %v7463_v45  ;;  %5568 = vmatmul.msk.f32.gmra.mxu0 %vm2147_vm4, %v7839_v16  ;;  %v8004_v21 = vadd.f32 %v3237_v61, %v3004_v52 }
 0x400   : > { %v8006_v34 = vpop.f32.mrf.mxu1 }
 0x401   : > { %v2726_v28 = vpop.f32.mrf.mxu2 }
 0x402   : > { %v2727_v6 = vadd.f32 %v2726_v28, %v7806_v39  ;;  %5537 = vmatmul.msk.f32.gmra.mxu3 %vm2147_vm4, %v7505_v23 }
 0x403   : > { %v3243_v7 = vpop.f32.mrf.mxu0  ;;  %5485 = vmatmul.msk.f32.gmra.mxu1 %vm2147_vm4, %v7491_v4 }
 0x404   : > { %v3005_v1 = vadd.f32 %v2967_v60, %v2727_v6  ;;  %v8810_v60 = vld [vmem:[#allocation28_spill] sm:$0xff] }
 0x405   : > { %v2970_v9 = vpop.f32.mrf.mxu3  ;;  %v3524_v28 = vadd.f32 %v7883_v42, %v8810_v60 }
 0x406   : > { %5505 = vmatmul.msk.f32.gmra.mxu2 %vm2147_vm4, %v7487_v10  ;;  %5569 = vmatmul.msk.f32.gmra.mxu0 %vm2147_vm4, %v7855_v43  ;;  %v8017_v45 = vadd.f32 %v3240_v25, %v3005_v1  ;;  %v8065_v25 = vld [vmem:[#allocation2 + $0x208] sm:$0xff] }
 0x408   : > { %v8019_v41 = vpop.f32.mrf.mxu1 }
 0x409   : > { %v2729_v16 = vpop.f32.mrf.mxu2 }
 0x40a   : > { %v2730_v39 = vadd.f32 %v2729_v16, %v7819_v48  ;;  %5538 = vmatmul.msk.f32.gmra.mxu3 %vm2147_vm4, %v7525_v38  ;;  %v8081_v16 = vld [vmem:[#allocation2 + $0x210] sm:$0xff] }
 0x40b   : > { %v3246_v23 = vpop.f32.mrf.mxu0  ;;  %5486 = vmatmul.msk.f32.gmra.mxu1 %vm2147_vm4, %v7516_v51 }
 0x40c   : > { %v3006_v12 = vadd.f32 %v2970_v9, %v2730_v39  ;;  %v8811_v9 = vld [vmem:[#allocation35_spill] sm:$0xff] }
 0x40d   : > { %v2973_v4 = vpop.f32.mrf.mxu3 }
 0x40e   : > { %5506 = vmatmul.msk.f32.gmra.mxu2 %vm2147_vm4, %v7512_v26  ;;  %5570 = vmatmul.msk.f32.gmra.mxu0 %vm2147_vm4, %v7871_v49  ;;  %v8030_v10 = vadd.f32 %v3243_v7, %v3006_v12  ;;  %v8812_v12 = vld [vmem:[#allocation31_spill] sm:$0xff] }
 0x410   : > { %v8032_v19 = vpop.f32.mrf.mxu1 }
 0x411   : > { %v2732_v43 = vpop.f32.mrf.mxu2 }
 0x412   : > { %v2733_v48 = vadd.f32 %v2732_v43, %v7835_v27  ;;  %5539 = vmatmul.msk.f32.gmra.mxu3 %vm2147_vm4, %v7544_v63  ;;  %v3522_v27 = vadd.f32 %v7851_v50, %v7531_v32  ;;  %v8807_v50 = vld [vmem:[#allocation24_spill] sm:$0xff] }
 0x413   : > { %v4246_v38 = vpop.f32.mrf.mxu0  ;;  %5487 = vmatmul.msk.f32.gmra.mxu1 %vm2147_vm4, %v7537_v40 }
 0x414   : > { %v3007_v44 = vadd.f32 %v2973_v4, %v2733_v48  ;;  %v8813_v4 = vld [vmem:[#allocation32_spill] sm:$0xff] }
 0x415   : > { %v3973_v51 = vpop.f32.mrf.mxu3  ;;  %v3525_v43 = vadd.f32 %v7899_v24, %v8813_v4 }
 0x416   : > { %5507 = vmatmul.msk.f32.gmra.mxu2 %vm2147_vm4, %v7533_v13  ;;  %5571 = vmatmul.msk.f32.gmra.mxu0 %vm2147_vm4, %v7887_v18  ;;  %v8043_v26 = vadd.f32 %v3246_v23, %v3007_v44  ;;  %v3523_v18 = vadd.f32 %v7867_v14, %v8807_v50 }
 0x418   : > { %v8047_v61 = vpop.f32.mrf.mxu1 }
 0x419   : > { %v3699_v49 = vpop.f32.mrf.mxu2 }
 0x41a   : > { %v3795_v63 = vadd.f32 %v3699_v49, %v3522_v27  ;;  %5540 = vmatmul.msk.f32.gmra.mxu3 %vm2147_vm4, %v7563_v47  ;;  %v8815_v49 = vld [vmem:[#allocation4_spill] sm:$0xff] }
 0x41b   : > { %v4249_v40 = vpop.f32.mrf.mxu0  ;;  %5488 = vmatmul.msk.f32.gmra.mxu1 %vm2147_vm4, %v7556_v20 }
 0x41c   : > { %v4069_v0 = vadd.f32 %v3973_v51, %v3795_v63  ;;  %v8814_v51 = vld [vmem:[#allocation39_spill] sm:$0xff] }
 0x41d   : > { %v3976_v13 = vpop.f32.mrf.mxu3 }
 0x41e   : > { %5508 = vmatmul.msk.f32.gmra.mxu2 %vm2147_vm4, %v7552_v59  ;;  %5572 = vmatmul.msk.f32.gmra.mxu0 %vm2147_vm4, %v7904_v8  ;;  %v8057_v32 = vadd.f32 %v4246_v38, %v4069_v0  ;;  %v8809_v8 = vld [vmem:[#allocation29_spill] sm:$0xff]  ;;  %v8817_v0 = vld [vmem:[#allocation36_spill] sm:$0xff] }
 0x420   : > { %v8061_v15 = vpop.f32.mrf.mxu1 }
 0x421   : > { %v3702_v17 = vpop.f32.mrf.mxu2 }
 0x422   : > { %v3796_v47 = vadd.f32 %v3702_v17, %v3523_v18  ;;  %5541 = vmatmul.msk.f32.gmra.mxu3 %vm2147_vm4, %v8808_v22 }
 0x423   : > { %v4252_v20 = vpop.f32.mrf.mxu0  ;;  %5489 = vmatmul.msk.f32.gmra.mxu1 %vm2147_vm4, %v8065_v25 }
 0x424   : > { %v4070_v52 = vadd.f32 %v3976_v13, %v3796_v47  ;;  %v3526_v13 = vadd.f32 %v7916_v30, %v8817_v0  ;;  %v8818_v47 = vld [vmem:[#allocation43_spill] sm:$0xff]  ;;  %v8828_v0 = vld [vmem:[#allocation46_spill] sm:$0xff] }
 0x425   : > { %v3979_v59 = vpop.f32.mrf.mxu3 }
 0x426   : > { %5509 = vmatmul.msk.f32.gmra.mxu2 %vm2147_vm4, %v8809_v8  ;;  %5573 = vmatmul.msk.f32.gmra.mxu0 %vm2147_vm4, %v7921_v29  ;;  %v8073_v14 = vadd.f32 %v4249_v40, %v4070_v52  ;;  %v8816_v40 = vld [vmem:[#allocation34_spill] sm:$0xff]  ;;  %v8820_v52 = vld [vmem:[#allocation9_spill] sm:$0xff] }
 0x428   : > { %v8077_v7 = vpop.f32.mrf.mxu1 }
 0x429   : > { %v3705_v6 = vpop.f32.mrf.mxu2 }
 0x42a   : > { %v3797_v1 = vadd.f32 %v3705_v6, %v3524_v28  ;;  %5542 = vmatmul.msk.f32.gmra.mxu3 %vm2147_vm4, %v8811_v9  ;;  %v8822_v9 = vld [vmem:[#allocation44_spill] sm:$0xff] }
 0x42b   : > { %5490 = vmatmul.msk.f32.gmra.mxu1 %vm2147_vm4, %v8081_v16  ;;  %v4255_v23 = vpop.f32.mrf.mxu0 }
 0x42c   : > { %v4071_v39 = vadd.f32 %v3979_v59, %v3797_v1  ;;  %v8821_v59 = vld [vmem:[#allocation38_spill] sm:$0xff] }
 0x42d   : > { %v3982_v29 = vpop.f32.mrf.mxu3  ;;  %v3527_v8 = vadd.f32 %v7933_v58, %v8821_v59  ;;  %v8825_v58 = vld [vmem:[#allocation42_spill] sm:$0xff] }
 0x42e   : > { %5510 = vmatmul.msk.f32.gmra.mxu2 %vm2147_vm4, %v8812_v12  ;;  %5574 = vmatmul.msk.f32.gmra.mxu0 %vm2147_vm4, %v7938_v53  ;;  %v8089_v42 = vadd.f32 %v4252_v20, %v4071_v39  ;;  %v8819_v20 = vld [vmem:[#allocation5_spill] sm:$0xff]  ;;  %v3528_v4 = vadd.f32 %v7950_v11, %v8825_v58 }
 0x42f   : > { %v8836_v58 = vld [vmem:[#allocation53_spill] sm:$0xff] }
 0x430   : > { %v8093_v38 = vpop.f32.mrf.mxu1 }
 0x431   : > { %v3708_v48 = vpop.f32.mrf.mxu2 }
 0x432   : > { %v3798_v44 = vadd.f32 %v3708_v48, %v3525_v43  ;;  %5543 = vmatmul.msk.f32.gmra.mxu3 %vm2147_vm4, %v8814_v51 }
 0x433   : > { %5587 = vmatmul.msk.f32.vlgmr.msra.gmra.mxu1 %vm2147_vm4, %v8815_v49  ;;  %v4258_v24 = vpop.f32.mrf.mxu0 }
 0x434   : > { %v4072_v27 = vadd.f32 %v3982_v29, %v3798_v44  ;;  %v4123_v29 = vld [vmem:[#allocation2 + $0x1a8] sm:$0xff] }
 0x435   : > { %v3985_v63 = vpop.f32.mrf.mxu3 }
 0x436   : > { %5511 = vmatmul.msk.f32.gmra.mxu2 %vm2147_vm4, %v8816_v40  ;;  %5575 = vmatmul.msk.f32.gmra.mxu0 %vm2147_vm4, %v7955_v5  ;;  %v8103_v53 = vadd.f32 %v4255_v23, %v4072_v27  ;;  %v8823_v23 = vld [vmem:[#allocation62_spill] sm:$0xff]  ;;  %v8826_v27 = vld [vmem:[#allocation45_spill] sm:$0xff]  ;;  %v8827_v40 = vld [vmem:[#allocation7_spill] sm:$0xff] }
 0x438   : > { %v8107_v18 = vpop.f32.mrf.mxu1 }
 0x439   : > { %v3711_v50 = vpop.f32.mrf.mxu2 }
 0x43a   : > { %v3799_v17 = vadd.f32 %v3711_v50, %v3526_v13  ;;  %5544 = vmatmul.msk.f32.gmra.mxu3 %vm2147_vm4, %v8818_v47  ;;  %v8829_v13 = vld [vmem:[#allocation16_spill] sm:$0xff] }
 0x43b   : > { %5588 = vmatmul.msk.f32.gmra.mxu1 %vm2147_vm4, %v8819_v20  ;;  %v4261_v60 = vpop.f32.mrf.mxu0  ;;  %v3529_v50 = vadd.f32 %v7965_v3, %v8829_v13  ;;  %v8830_v20 = vld [vmem:[#allocation23_spill] sm:$0xff]  ;;  %v8207_v13 = vld [vmem:[#allocation2 + $0x209] sm:$0xff] }
 0x43c   : > { %v4073_v22 = vadd.f32 %v3985_v63, %v3799_v17 }
 0x43d   : > { %v3988_v30 = vpop.f32.mrf.mxu3 }
 0x43e   : > { %5512 = vmatmul.msk.f32.gmra.mxu2 %vm2147_vm4, %v8820_v52  ;;  %5576 = vmatmul.msk.f32.gmra.mxu0 %vm2147_vm4, %v7970_v62  ;;  %v8117_v5 = vadd.f32 %v4258_v24, %v4073_v22  ;;  %v8824_v62 = vld [vmem:[#allocation12_spill] sm:$0xff]  ;;  %v4124_v24 = vld [vmem:[#allocation2 + $0x1b0] sm:$0xff] }
 0x440   : > { %v8121_v6 = vpop.f32.mrf.mxu1 }
 0x441   : > { %v3714_v28 = vpop.f32.mrf.mxu2 }
 0x442   : > { %v3800_v1 = vadd.f32 %v3714_v28, %v3527_v8  ;;  %5545 = vmatmul.msk.f32.gmra.mxu3 %vm2147_vm4, %v8822_v9  ;;  %v4125_v8 = vld [vmem:[#allocation2 + $0x1c8] sm:$0xff]  ;;  %v4126_v9 = vld [vmem:[#allocation2 + $0x1d0] sm:$0xff] }
 0x443   : > { %5589 = vmatmul.msk.f32.gmra.mxu1 %vm2147_vm4, %v8823_v23  ;;  %v4264_v49 = vpop.f32.mrf.mxu0  ;;  %v8834_v23 = vld [vmem:[#allocation52_spill] sm:$0xff] }
 0x444   : > { %v4074_v39 = vadd.f32 %v3988_v30, %v3800_v1  ;;  %v8832_v1 = vld [vmem:[#allocation26_spill] sm:$0xff] }
 0x445   : > { %v3991_v43 = vpop.f32.mrf.mxu3 }
 0x446   : > { %5513 = vmatmul.msk.f32.gmra.mxu2 %vm2147_vm4, %v8824_v62  ;;  %5577 = vmatmul.msk.f32.gmra.mxu0 %vm2147_vm4, %v4123_v29  ;;  %v8130_v12 = vadd.f32 %v4261_v60, %v4074_v39  ;;  %v8831_v60 = vld [vmem:[#allocation47_spill] sm:$0xff]  ;;  %v8833_v39 = vld [vmem:[#allocation48_spill] sm:$0xff]  ;;  %v8835_v62 = vld [vmem:[#allocation30_spill] sm:$0xff] }
 0x447   : > { %v4127_v29 = vld [vmem:[#allocation2 + $0x1e8] sm:$0xff] }
 0x448   : > { %v8134_v44 = vpop.f32.mrf.mxu1 }
 0x449   : > { %v3717_v48 = vpop.f32.mrf.mxu2 }
 0x44a   : > { %v3801_v51 = vadd.f32 %v3717_v48, %v3528_v4  ;;  %5546 = vmatmul.msk.f32.gmra.mxu3 %vm2147_vm4, %v8826_v27  ;;  %v4128_v4 = vld [vmem:[#allocation2 + $0x1f0] sm:$0xff]  ;;  %v8838_v48 = vld [vmem:[#allocation54_spill] sm:$0xff]  ;;  %v8839_v27 = vld [vmem:[#allocation55_spill] sm:$0xff] }
 0x44b   : > { %5590 = vmatmul.msk.f32.gmra.mxu1 %vm2147_vm4, %v8827_v40  ;;  %v4267_v59 = vpop.f32.mrf.mxu0  ;;  %v8841_v40 = vld [vmem:[#allocation57_spill] sm:$0xff] }
 0x44c   : > { %v4075_v63 = vadd.f32 %v3991_v43, %v3801_v51  ;;  %v8837_v43 = vld [vmem:[#allocation33_spill] sm:$0xff] }
 0x44d   : > { %v3994_v52 = vpop.f32.mrf.mxu3  ;;  %v4382_v51 = vld [vmem:[#allocation2 + $0xc9] sm:$0xff] }
 0x44e   : > { %5514 = vmatmul.msk.f32.gmra.mxu2 %vm2147_vm4, %v8828_v0  ;;  %5578 = vmatmul.msk.f32.gmra.mxu0 %vm2147_vm4, %v4124_v24  ;;  %v8143_v11 = vadd.f32 %v4264_v49, %v4075_v63  ;;  %v8840_v49 = vld [vmem:[#allocation56_spill] sm:$0xff]  ;;  %v4383_v63 = vld [vmem:[#allocation2 + $0xd1] sm:$0xff] }
 0x44f   : > { %v3858_v24 = vld [vmem:[#allocation2 + $0x227] sm:$0xff] }
 0x450   : > { %v8147_v47 = vpop.f32.mrf.mxu1 }
 0x451   : > { %v3720_v17 = vpop.f32.mrf.mxu2 }
 0x452   : > { %v3802_v22 = vadd.f32 %v3720_v17, %v3529_v50  ;;  %5547 = vmatmul.msk.f32.gmra.mxu3 %vm2147_vm4, %v8830_v20  ;;  %v4131_v50 = vld [vmem:[#allocation2 + $0x228] sm:$0xff]  ;;  %v8216_v20 = vld [vmem:[#allocation2 + $0x211] sm:$0xff] }
 0x453   : > { %5591 = vmatmul.msk.f32.gmra.mxu1 %vm2147_vm4, %v7891_v56  ;;  %v3859_v17 = vld [vmem:[#allocation2 + $0x22f] sm:$0xff] }
 0x454   : > { %v4076_v30 = vadd.f32 %v3994_v52, %v3802_v22  ;;  %v4132_v52 = vld [vmem:[#allocation2 + $0x230] sm:$0xff] }
 0x456   : > { %5515 = vmatmul.msk.f32.gmra.mxu2 %vm2147_vm4, %v8831_v60  ;;  %5579 = vmatmul.msk.f32.gmra.mxu0 %vm2147_vm4, %v4125_v8  ;;  %v8156_v3 = vadd.f32 %v4267_v59, %v4076_v30  ;;  %v4386_v59 = vld [vmem:[#allocation2 + $0x109] sm:$0xff]  ;;  %v4387_v60 = vld [vmem:[#allocation2 + $0x111] sm:$0xff] }
 0x458   : > { %v8158_v28 = vpop.f32.mrf.mxu1 }
 0x45a   : > { %5548 = vmatmul.msk.f32.gmra.mxu3 %vm2147_vm4, %v8832_v1 }
 0x45b   : > { %5592 = vmatmul.msk.f32.gmra.mxu1 %vm2147_vm4, %v7908_v35 }
 0x45e   : > { %5516 = vmatmul.msk.f32.gmra.mxu2 %vm2147_vm4, %v8833_v39  ;;  %5580 = vmatmul.msk.f32.gmra.mxu0 %vm2147_vm4, %v4126_v9  ;;  %v4388_v9 = vld [vmem:[#allocation2 + $0x129] sm:$0xff] }
 0x460   : > { %v8167_v56 = vpop.f32.mrf.mxu1 }
 0x462   : > { %5549 = vmatmul.msk.f32.gmra.mxu3 %vm2147_vm4, %v8834_v23  ;;  %v4389_v23 = vld [vmem:[#allocation2 + $0x131] sm:$0xff] }
 0x463   : > { %5593 = vmatmul.msk.f32.gmra.mxu1 %vm2147_vm4, %v7925_v37 }
 0x466   : > { %5517 = vmatmul.msk.f32.gmra.mxu2 %vm2147_vm4, %v8835_v62  ;;  %5581 = vmatmul.msk.f32.gmra.mxu0 %vm2147_vm4, %v4127_v29  ;;  %v8236_v29 = vld [vmem:[%s8508_s4] ss:$0 sm:$0xff] }
 0x468   : > { %v8176_v35 = vpop.f32.mrf.mxu1 }
 0x46a   : > { %5550 = vmatmul.msk.f32.gmra.mxu3 %vm2147_vm4, %v8836_v58 }
 0x46b   : > { %5594 = vmatmul.msk.f32.gmra.mxu1 %vm2147_vm4, %v7942_v54 }
 0x46e   : > { %5518 = vmatmul.msk.f32.gmra.mxu2 %vm2147_vm4, %v8837_v43  ;;  %5582 = vmatmul.msk.f32.gmra.mxu0 %vm2147_vm4, %v4128_v4  ;;  %v4390_v4 = vld [vmem:[#allocation2 + $0x149] sm:$0xff] }
 0x470   : > { %v8185_v37 = vpop.f32.mrf.mxu1 }
 0x472   : > { %5551 = vmatmul.msk.f32.gmra.mxu3 %vm2147_vm4, %v8838_v48  ;;  %v4812_v48 = vpop.permute.xlu0 %4811 }
 0x473   : > { %5595 = vmatmul.msk.f32.gmra.mxu1 %vm2147_vm4, %v4382_v51 }
 0x476   : > { %5519 = vmatmul.msk.f32.gmra.mxu2 %vm2147_vm4, %v8839_v27  ;;  %5583 = vmatmul.msk.f32.gmra.mxu0 %vm2147_vm4, %v8065_v25  ;;  %v4384_v25 = vld [vmem:[#allocation2 + $0xe9] sm:$0xff]  ;;  %v8242_v27 = vpop.f32.mrf.mxu2 }
 0x478   : > { %v8194_v54 = vpop.f32.mrf.mxu1 }
 0x47a   : > { %5552 = vmatmul.msk.f32.gmra.mxu3 %vm2147_vm4, %v8840_v49 }
 0x47b   : > { %5596 = vmatmul.msk.f32.gmra.mxu1 %vm2147_vm4, %v4383_v63 }
 0x47e   : > { %5520 = vmatmul.msk.f32.gmra.mxu2 %vm2147_vm4, %v8841_v40  ;;  %5584 = vmatmul.msk.f32.gmra.mxu0 %vm2147_vm4, %v8081_v16  ;;  %v4385_v16 = vld [vmem:[#allocation2 + $0xf1] sm:$0xff] }
 0x480   : > { %v8203_v0 = vpop.f32.mrf.mxu1 }
 0x482   : > { %5553 = vmatmul.msk.f32.gmra.mxu3 %vm2147_vm4, %v3858_v24  ;;  %v4391_v24 = vld [vmem:[#allocation2 + $0x151] sm:$0xff] }
 0x483   : > { %5597 = vmatmul.msk.f32.gmra.mxu1 %vm2147_vm4, %v4384_v25 }
 0x486   : > { %5521 = vmatmul.msk.f32.gmra.mxu2 %vm2147_vm4, %v8207_v13  ;;  %5585 = vmatmul.msk.f32.gmra.mxu0 %vm2147_vm4, %v4131_v50  ;;  %v8254_v50 = vpop.f32.mrf.mxu3 }
 0x488   : > { %v8212_v22 = vpop.f32.mrf.mxu1 }
 0x48a   : > { %5554 = vmatmul.msk.f32.gmra.mxu3 %vm2147_vm4, %v3859_v17 }
 0x48b   : > { %5598 = vmatmul.msk.f32.gmra.mxu1 %vm2147_vm4, %v4385_v16  ;;  %v4814_v16 = vpop.permute.xlu0 %4813 }
 0x48e   : > { %5522 = vmatmul.msk.f32.gmra.mxu2 %vm2147_vm4, %v8216_v20  ;;  %5586 = vmatmul.msk.f32.gmra.mxu0 %vm2147_vm4, %v4132_v52  ;;  %v8256_v52 = vpop.f32.mrf.mxu0 }
 0x490   : > { %v8221_v30 = vpop.f32.mrf.mxu1 }
 0x493   : > { %5599 = vmatmul.msk.f32.gmra.mxu1 %vm2147_vm4, %v4386_v59 }
 0x498   : > { %v8224_v8 = vpop.f32.mrf.mxu1 }
 0x49b   : > { %5600 = vmatmul.msk.f32.gmra.mxu1 %vm2147_vm4, %v4387_v60  ;;  %v8258_v60 = vpop.f32.mrf.mxu2 }
 0x4a0   : > { %v8227_v1 = vpop.f32.mrf.mxu1 }
 0x4a3   : > { %5601 = vmatmul.msk.f32.gmra.mxu1 %vm2147_vm4, %v4388_v9 }
 0x4a8   : > { %v8230_v39 = vpop.f32.mrf.mxu1 }
 0x4a9   : > { %8842 = vst [vmem:[#allocation10_spill] sm:$0xff] %v8230_v39 }
 0x4ab   : > { %5602 = vmatmul.msk.f32.gmra.mxu1 %vm2147_vm4, %v4389_v23 }
 0x4b0   : > { %v4519_v62 = vpop.f32.mrf.mxu1 }
 0x4b1   : > { %v4615_v58 = vadd.f32 %v4519_v62, %v8057_v32  ;;  %v4392_v62 = vld [vmem:[#allocation2 + $0x169] sm:$0xff] }
 0x4b3   : > { %v4651_v43 = vadd.f32 %v8236_v29, %v4615_v58  ;;  %5603 = vmatmul.msk.f32.gmra.mxu1 %vm2147_vm4, %v4390_v4  ;;  %v4816_v4 = vpop.permute.xlu1 %4815 }
 0x4b5   : > { %vm4683_vm7 = vcmp.ge.f32.partialorder %v4651_v43, 0.0  ;;  %v4715_v51 = vmul.f32 0.1, %v4651_v43 }
 0x4b7   : > { %v4747_v49 = vsel %vm4683_vm7, %v4651_v43, %v4715_v51 }
 0x4b8   : > { %v4907_v63 = vadd.f32 %v4812_v48, %v4747_v49  ;;  %v4522_v32 = vpop.f32.mrf.mxu1  ;;  %v8265_v48 = vpop.f32.mrf.mxu3 }
 0x4b9   : > { %v4616_v40 = vadd.f32 %v4522_v32, %v8073_v14  ;;  %v8267_v32 = vpop.f32.mrf.mxu0 }
 0x4ba   : > { %4939 = vst.msk [vmem:[%s8247_s14] sm:$0xff] %vm2147_vm4, %v4907_v63 }
 0x4bb   : > { %v4652_v25 = vadd.f32 %v8236_v29, %v4616_v40  ;;  %5604 = vmatmul.msk.f32.gmra.mxu1 %vm2147_vm4, %v4391_v24  ;;  %v8270_v40 = vpop.f32.mrf.mxu2  ;;  %v4393_v24 = vld [vmem:[#allocation2 + $0x171] sm:$0xff] }
 0x4bd   : > { %vm4684_vm8 = vcmp.ge.f32.partialorder %v4652_v25, 0.0  ;;  %v4716_v17 = vmul.f32 0.1, %v4652_v25 }
 0x4bf   : > { %v4748_v59 = vsel %vm4684_vm8, %v4652_v25, %v4716_v17 }
 0x4c0   : > { %v4908_v9 = vadd.f32 %v4814_v16, %v4748_v59  ;;  %v4525_v23 = vpop.f32.mrf.mxu1  ;;  %v4818_v16 = vpop.permute.xlu1 %4817 }
 0x4c1   : > { %v4617_v14 = vadd.f32 %v4525_v23, %v8089_v42 }
 0x4c2   : > { %4940 = vst.msk [vmem:[%s8247_s14 + $0x8] sm:$0xff] %vm2147_vm4, %v4908_v9  ;;  %v8276_v9 = vpop.f32.mrf.mxu3 }
 0x4c3   : > { %v4653_v58 = vadd.f32 %v8236_v29, %v4617_v14  ;;  %5605 = vmatmul.msk.f32.gmra.mxu1 %vm2147_vm4, %v4392_v62  ;;  %v4394_v62 = vld [vmem:[#allocation2 + $0x189] sm:$0xff] }
 0x4c5   : > { %vm4685_vm9 = vcmp.ge.f32.partialorder %v4653_v58, 0.0  ;;  %v4717_v43 = vmul.f32 0.1, %v4653_v58 }
 0x4c7   : > { %v4749_v51 = vsel %vm4685_vm9, %v4653_v58, %v4717_v43  ;;  %v8281_v58 = vpop.f32.mrf.mxu0  ;;  %v8285_v43 = vpop.f32.mrf.mxu2 }
 0x4c8   : > { %v4909_v49 = vadd.f32 %v4816_v4, %v4749_v51  ;;  %v4528_v63 = vpop.f32.mrf.mxu1  ;;  %v4820_v51 = vpop.permute.xlu2 %4819 }
 0x4c9   : > { %v4618_v42 = vadd.f32 %v4528_v63, %v8103_v53 }
 0x4ca   : > { %4941 = vst.msk [vmem:[%s8247_s14 + $0x10] sm:$0xff] %vm2147_vm4, %v4909_v49 }
 0x4cb   : > { %v4654_v25 = vadd.f32 %v8236_v29, %v4618_v42  ;;  %5606 = vmatmul.msk.f32.gmra.mxu1 %vm2147_vm4, %v4393_v24 }
 0x4cd   : > { %vm4686_vm10 = vcmp.ge.f32.partialorder %v4654_v25, 0.0  ;;  %v4718_v17 = vmul.f32 0.1, %v4654_v25 }
 0x4cf   : > { %v4750_v59 = vsel %vm4686_vm10, %v4654_v25, %v4718_v17  ;;  %v8288_v25 = vpop.f32.mrf.mxu3  ;;  %v4395_v17 = vld [vmem:[#allocation2 + $0x191] sm:$0xff] }
 0x4d0   : > { %v4910_v23 = vadd.f32 %v4818_v16, %v4750_v59  ;;  %v4531_v14 = vpop.f32.mrf.mxu1  ;;  %v8294_v59 = vpop.f32.mrf.mxu0 }
 0x4d1   : > { %v4619_v53 = vadd.f32 %v4531_v14, %v8117_v5  ;;  %v8296_v14 = vpop.f32.mrf.mxu2 }
 0x4d2   : > { %4942 = vst.msk [vmem:[%s8247_s14 + $0x18] sm:$0xff] %vm2147_vm4, %v4910_v23 }
 0x4d3   : > { %v4655_v4 = vadd.f32 %v8236_v29, %v4619_v53  ;;  %5607 = vmatmul.msk.f32.gmra.mxu1 %vm2147_vm4, %v4394_v62  ;;  %v4822_v53 = vpop.permute.xlu2 %4821 }
 0x4d5   : > { %vm4687_vm11 = vcmp.ge.f32.partialorder %v4655_v4, 0.0  ;;  %v4719_v49 = vmul.f32 0.1, %v4655_v4 }
 0x4d7   : > { %v4751_v63 = vsel %vm4687_vm11, %v4655_v4, %v4719_v49  ;;  %v4396_v49 = vld [vmem:[#allocation2 + $0x1a9] sm:$0xff] }
 0x4d8   : > { %v4911_v42 = vadd.f32 %v4820_v51, %v4751_v63  ;;  %v4534_v24 = vpop.f32.mrf.mxu1 }
 0x4d9   : > { %v4620_v5 = vadd.f32 %v4534_v24, %v8130_v12  ;;  %v8843_v24 = vld [vmem:[#allocation19_spill] sm:$0xff] }
 0x4da   : > { %4943 = vst.msk [vmem:[%s8247_s14 + $0x20] sm:$0xff] %vm2147_vm4, %v4911_v42  ;;  %v8303_v42 = vpop.f32.mrf.mxu3 }
 0x4db   : > { %v4656_v16 = vadd.f32 %v8236_v29, %v4620_v5  ;;  %5608 = vmatmul.msk.f32.gmra.mxu1 %vm2147_vm4, %v4395_v17  ;;  %v3530_v5 = vadd.f32 %v7980_v2, %v8843_v24 }
 0x4dd   : > { %vm4688_vm12 = vcmp.ge.f32.partialorder %v4656_v16, 0.0  ;;  %v4720_v23 = vmul.f32 0.1, %v4656_v16 }
 0x4df   : > { %v4752_v62 = vsel %vm4688_vm12, %v4656_v16, %v4720_v23  ;;  %v4824_v16 = vpop.permute.xlu0 %4823  ;;  %v3803_v23 = vadd.f32 %v8242_v27, %v3530_v5  ;;  %v8844_v27 = vld [vmem:[#allocation49_spill] sm:$0xff] }
 0x4e0   : > { %v4912_v4 = vadd.f32 %v4822_v53, %v4752_v62  ;;  %v4537_v51 = vpop.f32.mrf.mxu1  ;;  %v8308_v53 = vpop.f32.mrf.mxu0  ;;  %v3531_v24 = vadd.f32 %v7993_v33, %v8844_v27  ;;  %v4398_v33 = vld [vmem:[#allocation2 + $0x1c9] sm:$0xff] }
 0x4e1   : > { %v4621_v12 = vadd.f32 %v4537_v51, %v8143_v11  ;;  %v8310_v62 = vpop.f32.mrf.mxu2  ;;  %v4077_v39 = vadd.f32 %v8254_v50, %v3803_v23 }
 0x4e2   : > { %4944 = vst.msk [vmem:[%s8247_s14 + $0x28] sm:$0xff] %vm2147_vm4, %v4912_v4  ;;  %v8320_v5 = vpop.f32.mrf.mxu3 }
 0x4e3   : > { %v4657_v63 = vadd.f32 %v8236_v29, %v4621_v12  ;;  %5609 = vmatmul.msk.f32.gmra.mxu1 %vm2147_vm4, %v4396_v49  ;;  %v4397_v49 = vld [vmem:[#allocation2 + $0x1b1] sm:$0xff] }
 0x4e5   : > { %vm4689_vm13 = vcmp.ge.f32.partialorder %v4657_v63, 0.0  ;;  %v4721_v17 = vmul.f32 0.1, %v4657_v63 }
 0x4e7   : > { %v4753_v11 = vsel %vm4689_vm13, %v4657_v63, %v4721_v17  ;;  %v4826_v17 = vpop.permute.xlu1 %4825 }
 0x4e8   : > { %v4913_v4 = vadd.f32 %v4824_v16, %v4753_v11  ;;  %v4540_v51 = vpop.f32.mrf.mxu1  ;;  %v4350_v11 = vadd.f32 %v8256_v52, %v4077_v39  ;;  %v8324_v23 = vpop.f32.mrf.mxu0 }
 0x4e9   : > { %v4622_v12 = vadd.f32 %v4540_v51, %v8156_v3  ;;  %v3804_v3 = vadd.f32 %v8258_v60, %v3531_v24  ;;  %v8845_v60 = vld [vmem:[#allocation50_spill] sm:$0xff] }
 0x4ea   : > { %4945 = vst.msk [vmem:[%s8247_s14 + $0x30] sm:$0xff] %vm2147_vm4, %v4913_v4  ;;  %v3532_v39 = vadd.f32 %v8006_v34, %v8845_v60 }
 0x4eb   : > { %v4658_v2 = vadd.f32 %v8236_v29, %v4622_v12  ;;  %5610 = vmatmul.msk.f32.gmra.mxu1 %vm2147_vm4, %v4397_v49  ;;  %v8326_v12 = vpop.f32.mrf.mxu2  ;;  %v4078_v49 = vadd.f32 %v8265_v48, %v3804_v3  ;;  %v4399_v3 = vld [vmem:[#allocation2 + $0x1d1] sm:$0xff] }
 0x4ec   : > { %v3805_v24 = vadd.f32 %v8270_v40, %v3532_v39 }
 0x4ed   : > { %vm4690_vm14 = vcmp.ge.f32.partialorder %v4658_v2, 0.0  ;;  %v4722_v63 = vmul.f32 0.1, %v4658_v2 }
 0x4ef   : > { %v4754_v16 = vsel %vm4690_vm14, %v4658_v2, %v4722_v63  ;;  %v4828_v2 = vpop.permute.xlu2 %4827 }
 0x4f0   : > { %v4914_v4 = vadd.f32 %v4826_v17, %v4754_v16  ;;  %v4543_v50 = vpop.f32.mrf.mxu1  ;;  %v4351_v17 = vadd.f32 %v8267_v32, %v4078_v49  ;;  %v8337_v16 = vpop.f32.mrf.mxu3  ;;  %v8846_v32 = vld [vmem:[#allocation51_spill] sm:$0xff] }
 0x4f1   : > { %v4623_v51 = vadd.f32 %v4543_v50, %v4350_v11  ;;  %v4079_v50 = vadd.f32 %v8276_v9, %v3805_v24  ;;  %v8342_v34 = vpop.f32.mrf.mxu0 }
 0x4f2   : > { %4946 = vst.msk [vmem:[%s8247_s14 + $0x38] sm:$0xff] %vm2147_vm4, %v4914_v4 }
 0x4f3   : > { %v4659_v27 = vadd.f32 %v8236_v29, %v4623_v51  ;;  %5611 = vmatmul.msk.f32.gmra.mxu1 %vm2147_vm4, %v4398_v33  ;;  %v8346_v40 = vpop.f32.mrf.mxu2  ;;  %v3533_v33 = vadd.f32 %v8019_v41, %v8846_v32  ;;  %v4352_v9 = vadd.f32 %v8281_v58, %v4079_v50  ;;  %v4832_v50 = vpop.permute.xlu1 %4831 }
 0x4f5   : > { %vm4691_vm15 = vcmp.ge.f32.partialorder %v4659_v27, 0.0  ;;  %v4723_v52 = vmul.f32 0.1, %v4659_v27  ;;  %v3806_v60 = vadd.f32 %v8285_v43, %v3533_v33 }
 0x4f7   : > { %v4755_v63 = vsel %vm4691_vm15, %v4659_v27, %v4723_v52  ;;  %v4830_v27 = vpop.permute.xlu0 %4829 }
 0x4f8   : > { %v4915_v11 = vadd.f32 %v4828_v2, %v4755_v63  ;;  %v4546_v4 = vpop.f32.mrf.mxu1  ;;  %v8352_v63 = vpop.f32.mrf.mxu3 }
 0x4f9   : > { %v4624_v48 = vadd.f32 %v4546_v4, %v4351_v17  ;;  %v4400_v17 = vld [vmem:[#allocation2 + $0x1e9] sm:$0xff] }
 0x4fa   : > { %4947 = vst.msk [vmem:[%s8247_s14 + $0x40] sm:$0xff] %vm2147_vm4, %v4915_v11  ;;  %v4080_v11 = vadd.f32 %v8288_v25, %v3806_v60  ;;  %v8847_v4 = vld [vmem:[#allocation37_spill] sm:$0xff] }
 0x4fb   : > { %v4660_v51 = vadd.f32 %v8236_v29, %v4624_v48  ;;  %5612 = vmatmul.msk.f32.gmra.mxu1 %vm2147_vm4, %v4399_v3  ;;  %v3534_v43 = vadd.f32 %v8032_v19, %v8847_v4  ;;  %v8361_v48 = vpop.f32.mrf.mxu0  ;;  %v8363_v3 = vpop.f32.mrf.mxu2  ;;  %v4401_v60 = vld [vmem:[#allocation2 + $0x1f1] sm:$0xff] }
 0x4fc   : > { %v4353_v33 = vadd.f32 %v8294_v59, %v4080_v11 }
 0x4fd   : > { %vm4692_vm0 = vcmp.ge.f32.partialorder %v4660_v51, 0.0  ;;  %v4724_v49 = vmul.f32 0.1, %v4660_v51 }
 0x4ff   : > { %v4756_v39 = vsel %vm4692_vm0, %v4660_v51, %v4724_v49  ;;  %v3807_v51 = vadd.f32 %v8296_v14, %v3534_v43 }
 0x500   : > { %v4916_v52 = vadd.f32 %v4830_v27, %v4756_v39  ;;  %v4549_v2 = vpop.f32.mrf.mxu1 }
 0x501   : > { %v4625_v24 = vadd.f32 %v4549_v2, %v4352_v9  ;;  %v4081_v19 = vadd.f32 %v8303_v42, %v3807_v51  ;;  %v8372_v9 = vpop.f32.mrf.mxu3  ;;  %v4834_v2 = vpop.permute.xlu2 %4833 }
 0x502   : > { %4948 = vst.msk [vmem:[%s8247_s14 + $0x48] sm:$0xff] %vm2147_vm4, %v4916_v52  ;;  %v8848_v52 = vld [vmem:[#allocation40_spill] sm:$0xff] }
 0x503   : > { %v4661_v41 = vadd.f32 %v8236_v29, %v4625_v24  ;;  %5613 = vmatmul.msk.f32.gmra.mxu1 %vm2147_vm4, %v4400_v17  ;;  %v3535_v14 = vadd.f32 %v8047_v61, %v8848_v52  ;;  %v8377_v17 = vpop.f32.mrf.mxu0  ;;  %v4354_v42 = vadd.f32 %v8308_v53, %v4081_v19 }
 0x505   : > { %vm4693_vm5 = vcmp.ge.f32.partialorder %v4661_v41, 0.0  ;;  %v4725_v58 = vmul.f32 0.1, %v4661_v41  ;;  %v3808_v24 = vadd.f32 %v8310_v62, %v3535_v14  ;;  %v8849_v62 = vld [vmem:[#allocation3_spill] sm:$0xff] }
 0x506   : > { %v3536_v51 = vadd.f32 %v8061_v15, %v8849_v62 }
 0x507   : > { %v4757_v32 = vsel %vm4693_vm5, %v4661_v41, %v4725_v58  ;;  %v8380_v41 = vpop.f32.mrf.mxu2 }
 0x508   : > { %v4917_v25 = vadd.f32 %v4832_v50, %v4757_v32  ;;  %v4552_v49 = vpop.f32.mrf.mxu1  ;;  %v4082_v50 = vadd.f32 %v8320_v5, %v3808_v24 }
 0x509   : > { %v4626_v27 = vadd.f32 %v4552_v49, %v4353_v33  ;;  %v4024_v32 = vpop.f32.mrf.mxu3  ;;  %v4836_v33 = vpop.permute.xlu0 %4835 }
 0x50a   : > { %4949 = vst.msk [vmem:[%s8247_s14 + $0x50] sm:$0xff] %vm2147_vm4, %v4917_v25  ;;  %v3809_v25 = vadd.f32 %v8326_v12, %v3536_v51  ;;  %v8850_v12 = vld [vmem:[#allocation59_spill] sm:$0xff]  ;;  %v4840_v51 = vpop.permute.xlu2 %4839 }
 0x50b   : > { %v4662_v39 = vadd.f32 %v8236_v29, %v4626_v27  ;;  %5614 = vmatmul.msk.f32.gmra.mxu1 %vm2147_vm4, %v4401_v60  ;;  %v4355_v27 = vadd.f32 %v8324_v23, %v4082_v50  ;;  %v8392_v19 = vpop.f32.mrf.mxu0  ;;  %v3537_v14 = vadd.f32 %v8077_v7, %v8850_v12 }
 0x50c   : > { %v4083_v15 = vadd.f32 %v8337_v16, %v3809_v25  ;;  %v4404_v16 = vld [vmem:[#allocation2 + $0x229] sm:$0xff] }
 0x50d   : > { %vm4694_vm6 = vcmp.ge.f32.partialorder %v4662_v39, 0.0  ;;  %v4726_v59 = vmul.f32 0.1, %v4662_v39 }
 0x50f   : > { %v4758_v11 = vsel %vm4694_vm6, %v4662_v39, %v4726_v59  ;;  %v3753_v52 = vpop.f32.mrf.mxu2  ;;  %v4838_v59 = vpop.permute.xlu1 %4837 }
 0x510   : > { %v4918_v4 = vadd.f32 %v4834_v2, %v4758_v11  ;;  %v4555_v43 = vpop.f32.mrf.mxu1  ;;  %v3810_v2 = vadd.f32 %v8346_v40, %v3537_v14  ;;  %v4356_v11 = vadd.f32 %v8342_v34, %v4083_v15  ;;  %v8851_v40 = vld [vmem:[#allocation58_spill] sm:$0xff]  ;;  %v8852_v15 = vld [vmem:[#allocation60_spill] sm:$0xff] }
 0x511   : > { %v4627_v58 = vadd.f32 %v4555_v43, %v4354_v42  ;;  %v4027_v42 = vpop.f32.mrf.mxu3  ;;  %v3538_v62 = vadd.f32 %v8093_v38, %v8851_v40  ;;  %v4842_v14 = vpop.permute.xlu0 %4841 }
 0x512   : > { %4950 = vst.msk [vmem:[%s8247_s14 + $0x58] sm:$0xff] %vm2147_vm4, %v4918_v4 }
 0x513   : > { %v4663_v61 = vadd.f32 %v8236_v29, %v4627_v58  ;;  %5615 = vmatmul.msk.f32.gmra.mxu1 %vm2147_vm4, %v8207_v13  ;;  %v4300_v50 = vpop.f32.mrf.mxu0 }
 0x515   : > { %vm4695_vm2 = vcmp.ge.f32.partialorder %v4663_v61, 0.0  ;;  %v4727_v53 = vmul.f32 0.1, %v4663_v61 }
 0x517   : > { %v4759_v49 = vsel %vm4695_vm2, %v4663_v61, %v4727_v53  ;;  %v3756_v61 = vpop.f32.mrf.mxu2  ;;  %v3811_v53 = vadd.f32 %v8363_v3, %v3538_v62  ;;  %v3539_v3 = vadd.f32 %v8107_v18, %v8852_v15 }
 0x518   : > { %v4919_v60 = vadd.f32 %v4836_v33, %v4759_v49  ;;  %v4558_v5 = vpop.f32.mrf.mxu1 }
 0x519   : > { %v4628_v39 = vadd.f32 %v4558_v5, %v4355_v27  ;;  %v4405_v27 = vld [vmem:[#allocation2 + $0x231] sm:$0xff]  ;;  %v4030_v5 = vpop.f32.mrf.mxu3 }
 0x51a   : > { %4951 = vst.msk [vmem:[%s8247_s14 + $0x60] sm:$0xff] %vm2147_vm4, %v4919_v60 }
 0x51b   : > { %v4664_v13 = vadd.f32 %v8236_v29, %v4628_v39  ;;  %5616 = vmatmul.msk.f32.gmra.mxu1 %vm2147_vm4, %v8216_v20  ;;  %v4084_v20 = vadd.f32 %v8352_v63, %v3810_v2  ;;  %v4085_v39 = vadd.f32 %v8372_v9, %v3811_v53 }
 0x51d   : > { %vm4696_vm1 = vcmp.ge.f32.partialorder %v4664_v13, 0.0  ;;  %v4728_v23 = vmul.f32 0.1, %v4664_v13  ;;  %v4357_v25 = vadd.f32 %v8361_v48, %v4084_v20  ;;  %v4358_v2 = vadd.f32 %v8377_v17, %v4085_v39 }
 0x51f   : > { %v4760_v24 = vsel %vm4696_vm1, %v4664_v13, %v4728_v23  ;;  %v4303_v13 = vpop.f32.mrf.mxu0  ;;  %v3759_v12 = vpop.f32.mrf.mxu2  ;;  %v3812_v23 = vadd.f32 %v8380_v41, %v3539_v3 }
 0x520   : > { %v4920_v4 = vadd.f32 %v4838_v59, %v4760_v24  ;;  %v4561_v43 = vpop.f32.mrf.mxu1 }
 0x521   : > { %v4629_v58 = vadd.f32 %v4561_v43, %v4356_v11  ;;  %v4033_v18 = vpop.f32.mrf.mxu3 }
 0x522   : > { %4952 = vst.msk [vmem:[%s8247_s14 + $0x68] sm:$0xff] %vm2147_vm4, %v4920_v4  ;;  %v4086_v4 = vadd.f32 %v4024_v32, %v3812_v23 }
 0x523   : > { %v4665_v7 = vadd.f32 %v8236_v29, %v4629_v58  ;;  %5617 = vmatmul.msk.f32.gmra.mxu1 %vm2147_vm4, %v4404_v16  ;;  %v8853_v16 = vld [vmem:[#allocation61_spill] sm:$0xff] }
 0x524   : > { %v3540_v58 = vadd.f32 %v8121_v6, %v8853_v16  ;;  %v4359_v17 = vadd.f32 %v8392_v19, %v4086_v4 }
 0x525   : > { %vm4697_vm3 = vcmp.ge.f32.partialorder %v4665_v7, 0.0  ;;  %v4729_v34 = vmul.f32 0.1, %v4665_v7 }
 0x526   : > { %v3813_v41 = vadd.f32 %v3753_v52, %v3540_v58 }
 0x527   : > { %v4761_v33 = vsel %vm4697_vm3, %v4665_v7, %v4729_v34  ;;  %v4844_v7 = vpop.permute.xlu1 %4843  ;;  %v4306_v40 = vpop.f32.mrf.mxu0 }
 0x528   : > { %v4921_v49 = vadd.f32 %v4840_v51, %v4761_v33  ;;  %v4564_v63 = vpop.f32.mrf.mxu1  ;;  %v3762_v34 = vpop.f32.mrf.mxu2  ;;  %v4087_v32 = vadd.f32 %v4027_v42, %v3813_v41  ;;  %v8856_v41 = vld [vmem:[#allocation6_spill] sm:$0xff] }
 0x529   : > { %v4630_v60 = vadd.f32 %v4564_v63, %v4357_v25  ;;  %v4036_v52 = vpop.f32.mrf.mxu3 }
 0x52a   : > { %4953 = vst.msk [vmem:[%s8247_s14 + $0x70] sm:$0xff] %vm2147_vm4, %v4921_v49  ;;  %v8854_v49 = vld [vmem:[#allocation63_spill] sm:$0xff]  ;;  %v4360_v19 = vadd.f32 %v4300_v50, %v4087_v32 }
 0x52b   : > { %v4666_v38 = vadd.f32 %v8236_v29, %v4630_v60  ;;  %5618 = vmatmul.msk.f32.gmra.mxu1 %vm2147_vm4, %v4405_v27  ;;  %v3541_v6 = vadd.f32 %v8134_v44, %v8854_v49  ;;  %v4846_v27 = vpop.permute.xlu2 %4845 }
 0x52d   : > { %vm4698_vm7 = vcmp.ge.f32.partialorder %v4666_v38, 0.0  ;;  %v4730_v48 = vmul.f32 0.1, %v4666_v38  ;;  %v3814_v60 = vadd.f32 %v3756_v61, %v3541_v6  ;;  %v8857_v6 = vld [vmem:[#allocation11_spill] sm:$0xff] }
 0x52f   : > { %v4762_v59 = vsel %vm4698_vm7, %v4666_v38, %v4730_v48  ;;  %v4309_v3 = vpop.f32.mrf.mxu0  ;;  %v4088_v42 = vadd.f32 %v4030_v5, %v3814_v60 }
 0x530   : > { %v4922_v24 = vadd.f32 %v4842_v14, %v4762_v59  ;;  %v4567_v11 = vpop.f32.mrf.mxu1  ;;  %v3765_v14 = vpop.f32.mrf.mxu2  ;;  %v8855_v59 = vld [vmem:[#allocation8_spill] sm:$0xff] }
 0x531   : > { %v4631_v9 = vadd.f32 %v4567_v11, %v4358_v2  ;;  %v3542_v44 = vadd.f32 %v8147_v47, %v8855_v59  ;;  %v4361_v50 = vadd.f32 %v4303_v13, %v4088_v42  ;;  %v3543_v47 = vadd.f32 %v8158_v28, %v8856_v41 }
 0x532   : > { %4954 = vst.msk [vmem:[%s8247_s14 + $0x78] sm:$0xff] %vm2147_vm4, %v4922_v24  ;;  %v4848_v24 = vpop.permute.xlu0 %4847 }
 0x533   : > { %v4667_v43 = vadd.f32 %v8236_v29, %v4631_v9  ;;  %v3815_v61 = vadd.f32 %v3759_v12, %v3542_v44  ;;  %v4039_v9 = vpop.f32.mrf.mxu3  ;;  %v4850_v12 = vpop.permute.xlu1 %4849 }
 0x535   : > { %vm4699_vm8 = vcmp.ge.f32.partialorder %v4667_v43, 0.0  ;;  %v4731_v20 = vmul.f32 0.1, %v4667_v43  ;;  %v4089_v58 = vadd.f32 %v4033_v18, %v3815_v61 }
 0x537   : > { %v4763_v62 = vsel %vm4699_vm8, %v4667_v43, %v4731_v20  ;;  %v4312_v5 = vpop.f32.mrf.mxu0 }
 0x538   : > { %v4923_v51 = vadd.f32 %v4844_v7, %v4763_v62  ;;  %v4570_v53 = vpop.f32.mrf.mxu1  ;;  %v3768_v7 = vpop.f32.mrf.mxu2 }
 0x539   : > { %v4632_v33 = vadd.f32 %v4570_v53, %v4359_v17  ;;  %v3816_v17 = vadd.f32 %v3762_v34, %v3543_v47  ;;  %v4852_v34 = vpop.permute.xlu2 %4851 }
 0x53a   : > { %4955 = vst.msk [vmem:[%s8247_s14 + $0x80] sm:$0xff] %vm2147_vm4, %v4923_v51  ;;  %v4362_v51 = vadd.f32 %v4306_v40, %v4089_v58  ;;  %v4854_v44 = vpop.permute.xlu0 %4853 }
 0x53b   : > { %v4668_v25 = vadd.f32 %v8236_v29, %v4632_v33  ;;  %v4090_v18 = vadd.f32 %v4036_v52, %v3816_v17  ;;  %v4856_v58 = vpop.permute.xlu1 %4855 }
 0x53d   : > { %vm4700_vm9 = vcmp.ge.f32.partialorder %v4668_v25, 0.0  ;;  %v4732_v63 = vmul.f32 0.1, %v4668_v25 }
 0x53f   : > { %v4764_v39 = vsel %vm4700_vm9, %v4668_v25, %v4732_v63  ;;  %v4042_v25 = vpop.f32.mrf.mxu3  ;;  %v3544_v63 = vadd.f32 %v8167_v56, %v8857_v6  ;;  %v4315_v28 = vpop.f32.mrf.mxu0  ;;  %v3545_v56 = vadd.f32 %v8176_v35, %v7931_v31  ;;  %v3546_v31 = vadd.f32 %v8185_v37, %v7948_v55 }
 0x540   : > { %v4924_v38 = vadd.f32 %v4846_v27, %v4764_v39  ;;  %v4573_v15 = vpop.f32.mrf.mxu1  ;;  %v3771_v60 = vpop.f32.mrf.mxu2  ;;  %v3547_v55 = vadd.f32 %v8194_v54, %v7963_v46  ;;  %v3548_v46 = vadd.f32 %v8203_v0, %v7978_v57 }
 0x541   : > { %v4633_v48 = vadd.f32 %v4573_v15, %v4360_v19  ;;  %v3817_v39 = vadd.f32 %v3765_v14, %v3544_v63  ;;  %v4363_v19 = vadd.f32 %v4309_v3, %v4090_v18 }
 0x542   : > { %4956 = vst.msk [vmem:[%s8247_s14 + $0x88] sm:$0xff] %vm2147_vm4, %v4924_v38 }
 0x543   : > { %v4669_v23 = vadd.f32 %v8236_v29, %v4633_v48  ;;  %v4091_v52 = vadd.f32 %v4039_v9, %v3817_v39  ;;  %v4860_v39 = vpop.permute.xlu0 %4859 }
 0x545   : > { %vm4701_vm10 = vcmp.ge.f32.partialorder %v4669_v23, 0.0  ;;  %v4733_v2 = vmul.f32 0.1, %v4669_v23  ;;  %v4364_v3 = vadd.f32 %v4312_v5, %v4091_v52 }
 0x547   : > { %v4765_v11 = vsel %vm4701_vm10, %v4669_v23, %v4733_v2  ;;  %v4045_v23 = vpop.f32.mrf.mxu3  ;;  %v3818_v2 = vadd.f32 %v3768_v7, %v3545_v56  ;;  %v4318_v14 = vpop.f32.mrf.mxu0 }
 0x548   : > { %v4925_v4 = vadd.f32 %v4848_v24, %v4765_v11  ;;  %v4576_v43 = vpop.f32.mrf.mxu1  ;;  %v3774_v61 = vpop.f32.mrf.mxu2 }
 0x549   : > { %v4634_v16 = vadd.f32 %v4576_v43, %v4361_v50  ;;  %v4092_v9 = vadd.f32 %v4042_v25, %v3818_v2  ;;  %v4862_v2 = vpop.permute.xlu1 %4861 }
 0x54a   : > { %4957 = vst.msk [vmem:[%s8247_s14 + $0x90] sm:$0xff] %vm2147_vm4, %v4925_v4 }
 0x54b   : > { %v4670_v20 = vadd.f32 %v8236_v29, %v4634_v16  ;;  %v4365_v5 = vadd.f32 %v4315_v28, %v4092_v9 }
 0x54d   : > { %vm4702_vm11 = vcmp.ge.f32.partialorder %v4670_v20, 0.0  ;;  %v4734_v62 = vmul.f32 0.1, %v4670_v20 }
 0x54f   : > { %v4766_v13 = vsel %vm4702_vm11, %v4670_v20, %v4734_v62  ;;  %v4048_v16 = vpop.f32.mrf.mxu3  ;;  %v3819_v20 = vadd.f32 %v3771_v60, %v3546_v31  ;;  %v4321_v62 = vpop.f32.mrf.mxu0 }
 0x550   : > { %v4926_v53 = vadd.f32 %v4850_v12, %v4766_v13  ;;  %v4579_v33 = vpop.f32.mrf.mxu1  ;;  %v3777_v17 = vpop.f32.mrf.mxu2 }
 0x551   : > { %v4635_v32 = vadd.f32 %v4579_v33, %v4362_v51  ;;  %v4093_v13 = vadd.f32 %v4045_v23, %v3819_v20  ;;  %v3820_v33 = vadd.f32 %v3774_v61, %v3547_v55 }
 0x552   : > { %4958 = vst.msk [vmem:[%s8247_s14 + $0x98] sm:$0xff] %vm2147_vm4, %v4926_v53  ;;  %v4858_v53 = vpop.permute.xlu2 %4857 }
 0x553   : > { %v4671_v49 = vadd.f32 %v8236_v29, %v4635_v32  ;;  %v4366_v25 = vadd.f32 %v4318_v14, %v4093_v13  ;;  %v4094_v28 = vadd.f32 %v4048_v16, %v3820_v33  ;;  %v4866_v13 = vpop.permute.xlu0 %4865 }
 0x555   : > { %vm4703_vm12 = vcmp.ge.f32.partialorder %v4671_v49, 0.0  ;;  %v4735_v27 = vmul.f32 0.1, %v4671_v49 }
 0x557   : > { %v4767_v40 = vsel %vm4703_vm12, %v4671_v49, %v4735_v27  ;;  %v4051_v18 = vpop.f32.mrf.mxu3  ;;  %v4324_v27 = vpop.f32.mrf.mxu0 }
 0x558   : > { %v4927_v38 = vadd.f32 %v4852_v34, %v4767_v40  ;;  %v4582_v15 = vpop.f32.mrf.mxu1  ;;  %v3780_v34 = vpop.f32.mrf.mxu2  ;;  %v3821_v40 = vadd.f32 %v3777_v17, %v3548_v46 }
 0x559   : > { %v4636_v48 = vadd.f32 %v4582_v15, %v4363_v19 }
 0x55a   : > { %4959 = vst.msk [vmem:[%s8247_s14 + $0xa0] sm:$0xff] %vm2147_vm4, %v4927_v38  ;;  %v4367_v38 = vadd.f32 %v4321_v62, %v4094_v28  ;;  %v4095_v23 = vadd.f32 %v4051_v18, %v3821_v40  ;;  %v4864_v31 = vpop.permute.xlu2 %4863  ;;  %v4868_v28 = vpop.permute.xlu1 %4867 }
 0x55b   : > { %v4672_v42 = vadd.f32 %v8236_v29, %v4636_v48 }
 0x55d   : > { %vm4704_vm13 = vcmp.ge.f32.partialorder %v4672_v42, 0.0  ;;  %v4736_v59 = vmul.f32 0.1, %v4672_v42 }
 0x55f   : > { %v4768_v24 = vsel %vm4704_vm13, %v4672_v42, %v4736_v59  ;;  %v4054_v42 = vpop.f32.mrf.mxu3  ;;  %v3549_v59 = vadd.f32 %v8212_v22, %v7991_v36  ;;  %v4327_v57 = vpop.f32.mrf.mxu0  ;;  %v3550_v36 = vadd.f32 %v8221_v30, %v8004_v21  ;;  %v3551_v21 = vadd.f32 %v8224_v8, %v8017_v45 }
 0x560   : > { %v4928_v11 = vadd.f32 %v4854_v44, %v4768_v24  ;;  %v4585_v50 = vpop.f32.mrf.mxu1  ;;  %v3783_v44 = vpop.f32.mrf.mxu2  ;;  %v3552_v45 = vadd.f32 %v8227_v1, %v8030_v10  ;;  %v8858_v10 = vld [vmem:[#allocation10_spill] sm:$0xff] }
 0x561   : > { %v4637_v4 = vadd.f32 %v4585_v50, %v4364_v3  ;;  %v3822_v14 = vadd.f32 %v3780_v34, %v3549_v59  ;;  %v4368_v3 = vadd.f32 %v4324_v27, %v4095_v23  ;;  %v3823_v16 = vadd.f32 %v3783_v44, %v3550_v36 }
 0x562   : > { %4960 = vst.msk [vmem:[%s8247_s14 + $0xa8] sm:$0xff] %vm2147_vm4, %v4928_v11  ;;  %v3553_v1 = vadd.f32 %v8858_v10, %v8043_v26 }
 0x563   : > { %v4673_v43 = vadd.f32 %v8236_v29, %v4637_v4  ;;  %v4096_v4 = vadd.f32 %v4054_v42, %v3822_v14 }
 0x565   : > { %vm4705_vm14 = vcmp.ge.f32.partialorder %v4673_v43, 0.0  ;;  %v4737_v35 = vmul.f32 0.1, %v4673_v43  ;;  %v4369_v20 = vadd.f32 %v4327_v57, %v4096_v4 }
 0x567   : > { %v4769_v7 = vsel %vm4705_vm14, %v4673_v43, %v4737_v35  ;;  %v4057_v43 = vpop.f32.mrf.mxu3  ;;  %v4330_v35 = vpop.f32.mrf.mxu0 }
 0x568   : > { %v4929_v41 = vadd.f32 %v4856_v58, %v4769_v7  ;;  %v4588_v47 = vpop.f32.mrf.mxu1  ;;  %v3786_v7 = vpop.f32.mrf.mxu2  ;;  %v4097_v62 = vadd.f32 %v4057_v43, %v3823_v16 }
 0x569   : > { %v4638_v12 = vadd.f32 %v4588_v47, %v4365_v5 }
 0x56a   : > { %4961 = vst.msk [vmem:[%s8247_s14 + $0xb0] sm:$0xff] %vm2147_vm4, %v4929_v41 }
 0x56b   : > { %v4674_v51 = vadd.f32 %v8236_v29, %v4638_v12 }
 0x56d   : > { %vm4706_vm15 = vcmp.ge.f32.partialorder %v4674_v51, 0.0  ;;  %v4738_v37 = vmul.f32 0.1, %v4674_v51 }
 0x56f   : > { %v4770_v32 = vsel %vm4706_vm15, %v4674_v51, %v4738_v37  ;;  %v4060_v17 = vpop.f32.mrf.mxu3  ;;  %v3824_v51 = vadd.f32 %v3786_v7, %v3551_v21  ;;  %v4370_v37 = vadd.f32 %v4330_v35, %v4097_v62 }
 0x570   : > { %v4930_v49 = vadd.f32 %v4858_v53, %v4770_v32  ;;  %v4591_v6 = vpop.f32.mrf.mxu1  ;;  %v3789_v18 = vpop.f32.mrf.mxu2 }
 0x571   : > { %v4639_v63 = vadd.f32 %v4591_v6, %v4366_v25  ;;  %v4333_v25 = vpop.f32.mrf.mxu0  ;;  %v3825_v27 = vadd.f32 %v3789_v18, %v3552_v45 }
 0x572   : > { %4962 = vst.msk [vmem:[%s8247_s14 + $0xb8] sm:$0xff] %vm2147_vm4, %v4930_v49  ;;  %v4098_v49 = vadd.f32 %v4060_v17, %v3824_v51 }
 0x573   : > { %v4675_v60 = vadd.f32 %v8236_v29, %v4639_v63 }
 0x574   : > { %v4371_v34 = vadd.f32 %v4333_v25, %v4098_v49 }
 0x575   : > { %vm4707_vm0 = vcmp.ge.f32.partialorder %v4675_v60, 0.0  ;;  %v4739_v54 = vmul.f32 0.1, %v4675_v60 }
 0x577   : > { %v4771_v19 = vsel %vm4707_vm0, %v4675_v60, %v4739_v54  ;;  %v4063_v63 = vpop.f32.mrf.mxu3 }
 0x578   : > { %v4931_v15 = vadd.f32 %v4860_v39, %v4771_v19  ;;  %v4594_v48 = vpop.f32.mrf.mxu1  ;;  %v4099_v19 = vadd.f32 %v4063_v63, %v3825_v27 }
 0x579   : > { %v4640_v52 = vadd.f32 %v4594_v48, %v4367_v38  ;;  %v4336_v40 = vpop.f32.mrf.mxu0 }
 0x57a   : > { %4963 = vst.msk [vmem:[%s8247_s14 + $0xc0] sm:$0xff] %vm2147_vm4, %v4931_v15  ;;  %v3792_v15 = vpop.f32.mrf.mxu2  ;;  %v4372_v42 = vadd.f32 %v4336_v40, %v4099_v19 }
 0x57b   : > { %v4676_v56 = vadd.f32 %v8236_v29, %v4640_v52  ;;  %v4870_v52 = vpop.permute.xlu2 %4869  ;;  %v3826_v23 = vadd.f32 %v3792_v15, %v3553_v1 }
 0x57d   : > { %vm4708_vm5 = vcmp.ge.f32.partialorder %v4676_v56, 0.0  ;;  %v4740_v0 = vmul.f32 0.1, %v4676_v56 }
 0x57f   : > { %v4772_v24 = vsel %vm4708_vm5, %v4676_v56, %v4740_v0  ;;  %v4066_v59 = vpop.f32.mrf.mxu3 }
 0x580   : > { %v4932_v61 = vadd.f32 %v4862_v2, %v4772_v24  ;;  %v4597_v11 = vpop.f32.mrf.mxu1  ;;  %v4100_v2 = vadd.f32 %v4066_v59, %v3826_v23 }
 0x581   : > { %v4641_v50 = vadd.f32 %v4597_v11, %v4368_v3  ;;  %v4339_v24 = vpop.f32.mrf.mxu0  ;;  %v4872_v3 = vpop.permute.xlu0 %4871 }
 0x582   : > { %4964 = vst.msk [vmem:[%s8247_s14 + $0xc8] sm:$0xff] %vm2147_vm4, %v4932_v61  ;;  %v4373_v61 = vadd.f32 %v4339_v24, %v4100_v2 }
 0x583   : > { %v4677_v9 = vadd.f32 %v8236_v29, %v4641_v50 }
 0x585   : > { %vm4709_vm6 = vcmp.ge.f32.partialorder %v4677_v9, 0.0  ;;  %v4741_v22 = vmul.f32 0.1, %v4677_v9 }
 0x587   : > { %v4773_v58 = vsel %vm4709_vm6, %v4677_v9, %v4741_v22  ;;  %v4874_v22 = vpop.permute.xlu1 %4873 }
 0x588   : > { %v4933_v5 = vadd.f32 %v4864_v31, %v4773_v58  ;;  %v4600_v41 = vpop.f32.mrf.mxu1 }
 0x589   : > { %v4642_v47 = vadd.f32 %v4600_v41, %v4369_v20 }
 0x58a   : > { %4965 = vst.msk [vmem:[%s8247_s14 + $0xd0] sm:$0xff] %vm2147_vm4, %v4933_v5 }
 0x58b   : > { %v4678_v12 = vadd.f32 %v8236_v29, %v4642_v47 }
 0x58d   : > { %vm4710_vm2 = vcmp.ge.f32.partialorder %v4678_v12, 0.0  ;;  %v4742_v30 = vmul.f32 0.1, %v4678_v12 }
 0x58f   : > { %v4774_v55 = vsel %vm4710_vm2, %v4678_v12, %v4742_v30 }
 0x590   : > { %v4934_v53 = vadd.f32 %v4866_v13, %v4774_v55  ;;  %v4603_v33 = vpop.f32.mrf.mxu1 }
 0x591   : > { %v4643_v32 = vadd.f32 %v4603_v33, %v4370_v37 }
 0x592   : > { %4966 = vst.msk [vmem:[%s8247_s14 + $0xd8] sm:$0xff] %vm2147_vm4, %v4934_v53 }
 0x593   : > { %v4679_v6 = vadd.f32 %v8236_v29, %v4643_v32 }
 0x595   : > { %vm4711_vm1 = vcmp.ge.f32.partialorder %v4679_v6, 0.0  ;;  %v4743_v8 = vmul.f32 0.1, %v4679_v6 }
 0x597   : > { %v4775_v60 = vsel %vm4711_vm1, %v4679_v6, %v4743_v8 }
 0x598   : > { %v4935_v46 = vadd.f32 %v4868_v28, %v4775_v60  ;;  %v4606_v54 = vpop.f32.mrf.mxu1 }
 0x599   : > { %v4644_v39 = vadd.f32 %v4606_v54, %v4371_v34 }
 0x59a   : > { %4967 = vst.msk [vmem:[%s8247_s14 + $0xe0] sm:$0xff] %vm2147_vm4, %v4935_v46 }
 0x59b   : > { %v4680_v38 = vadd.f32 %v8236_v29, %v4644_v39 }
 0x59d   : > { %vm4712_vm3 = vcmp.ge.f32.partialorder %v4680_v38, 0.0  ;;  %v4744_v48 = vmul.f32 0.1, %v4680_v38 }
 0x59f   : > { %v4776_v56 = vsel %vm4712_vm3, %v4680_v38, %v4744_v48 }
 0x5a0   : > { %v4936_v57 = vadd.f32 %v4870_v52, %v4776_v56  ;;  %v4609_v0 = vpop.f32.mrf.mxu1 }
 0x5a1   : > { %v4645_v44 = vadd.f32 %v4609_v0, %v4372_v42 }
 0x5a2   : > { %4968 = vst.msk [vmem:[%s8247_s14 + $0xe8] sm:$0xff] %vm2147_vm4, %v4936_v57 }
 0x5a3   : > { %v4681_v14 = vadd.f32 %v8236_v29, %v4645_v44 }
 0x5a5   : > { %vm4713_vm7 = vcmp.ge.f32.partialorder %v4681_v14, 0.0  ;;  %v4745_v26 = vmul.f32 0.1, %v4681_v14 }
 0x5a7   : > { %v4777_v11 = vsel %vm4713_vm7, %v4681_v14, %v4745_v26 }
 0x5a8   : > { %v4937_v50 = vadd.f32 %v4872_v3, %v4777_v11  ;;  %v4612_v4 = vpop.f32.mrf.mxu1 }
 0x5a9   : > { %v4646_v9 = vadd.f32 %v4612_v4, %v4373_v61 }
 0x5aa   : > { %4969 = vst.msk [vmem:[%s8247_s14 + $0xf0] sm:$0xff] %vm2147_vm4, %v4937_v50 }
 0x5ab   : > { %v4682_v43 = vadd.f32 %v8236_v29, %v4646_v9 }
 0x5ad   : > { %vm4714_vm8 = vcmp.ge.f32.partialorder %v4682_v43, 0.0  ;;  %v4746_v36 = vmul.f32 0.1, %v4682_v43 }
 0x5af   : > { %v4778_v31 = vsel %vm4714_vm8, %v4682_v43, %v4746_v36 }
 0x5b0   : > { %v4938_v35 = vadd.f32 %v4874_v22, %v4778_v31 }
 0x5b2   : > { %4970 = vst.msk [vmem:[%s8247_s14 + $0xf8] sm:$0xff] %vm2147_vm4, %v4938_v35 }
 0x5b3 PF: > { %s15_s18 = sadd.s32 1, %s5673_s18  }
 0x5b4   : > { %p12_p4 = scmp.ge.s32.totalorder %s15_s18, 4  }
 0x5b6   :  { %14 = sbr.rel (!%p12_p4) target bundleno = 1 (0x1), region = 72 }

</bundles_post_ra>
